<compile_context>
chip_gen: v7x
topology: tpu7x:2x2x1
jax: 0.10.0
libtpu: 0.0.40
codegen_flags: <defaults>
</compile_context>

<pallas_src>
import math

import jax
import jax.numpy as jnp
from jax import lax
from jax.experimental import pallas as pl
from jax.experimental.pallas import tpu as pltpu

# ---------------- configuration (small synthetic sizes) ----------------
B = 2          # batch
S = 8          # text sequence length
N = 8          # graph nodes
H = 32         # hidden size
R = 2          # number of relations
NUM_HOPS = 2   # GAT hops
VOCAB = 64
FFN = 4 * H    # 128 -> lane dense
CLS_PAD = 128  # lane-dense padding for the 2-class classifier output
NEG_INF = -1e30
assert FFN == CLS_PAD  # lets wf1 and the padded classifier share one operand


# ======================= fully fused SpatialRank kernel =======================
def _spatial_rank_kernel(text_ref, node_ref, adj_ref, mask_ref,
                         rgat_w_ref, rgat_b_ref, rgat_w2_ref, rgat_b2_ref,
                         enc_w_ref, enc_b_ref, enc_ln_ref,
                         w128_ref, b128_ref, wf2_ref,
                         out_ref):
    n = node_ref.shape[1]
    hdim = node_ref.shape[2]
    num_rel = adj_ref.shape[1]
    num_layers = rgat_w_ref.shape[0]
    num_hops = num_layers // num_rel

    # --------------------- RGAT: all relations x all hops ---------------------
    x = node_ref[0]                                          # (n, H) f32
    for hop in range(num_hops):
        acc = None
        for rel in range(num_rel):
            idx = rel * num_hops + hop
            adj = adj_ref[0, rel]                            # (n, n) f32

            # h = W(x)   (bf16 dot inputs, f32 accumulate)
            h = (jnp.dot(x.astype(jnp.bfloat16), rgat_w_ref[idx, 0],
                         preferred_element_type=jnp.float32)
                 + rgat_b_ref[idx, 0])                       # (n, H)
            hb = h.astype(jnp.bfloat16)

            # afcs first linear on concat([h_i, h_j]) = W1a h_i + W1b h_j + b1
            a = (jnp.dot(hb, rgat_w_ref[idx, 1], preferred_element_type=jnp.float32)
                 + rgat_b_ref[idx, 1])                       # (n, H), b1 folded in
            b = jnp.dot(hb, rgat_w_ref[idx, 2], preferred_element_type=jnp.float32)

            # pairwise scorer via broadcast (no one-hot matmuls / flattening)
            pre = a[:, None, :] + b[None, :, :]              # (n, n, H)
            hid = jnp.maximum(pre, 0.0)                      # ReLU
            e = (jnp.sum(hid * rgat_w2_ref[idx], axis=-1)
                 + rgat_b2_ref[idx])                         # (n, n), lane reduce
            e = jnp.where(e > 0, e, 0.01 * e)                # LeakyReLU(0.01)

            # mask_logits + softmax over the *flattened* N*N pairs (torch dim=1)
            e = e * adj + (1.0 - adj) * NEG_INF
            m = jnp.max(e, axis=-1, keepdims=True)           # (n, 1)
            m = jnp.max(m, axis=-2, keepdims=True)           # (1, 1)
            p = jnp.exp(e - m)
            s = jnp.sum(p, axis=-1, keepdims=True)
            s = jnp.sum(s, axis=-2, keepdims=True)           # (1, 1)
            attn = p * pl.reciprocal(s, approx=True)         # (n, n)

            # output = attention.view(N, N) @ h
            ctx = jnp.dot(attn.astype(jnp.bfloat16), hb,
                          preferred_element_type=jnp.float32)    # (n, H)
            acc = ctx if acc is None else acc + ctx
        # relu(sum over relations); inter-hop dropout = identity in eval mode
        x = jnp.maximum(acc, 0.0)

    # ---------- encoder stand-in (1 layer) + pooler + classifier ----------
    xf = jnp.concatenate([text_ref[0], x], axis=0)           # (T, H) text ++ nodes
    msk = mask_ref[0]                                        # (1, T)

    xb = xf.astype(jnp.bfloat16)
    q = jnp.dot(xb, enc_w_ref[0], preferred_element_type=jnp.float32) + enc_b_ref[0]
    k = jnp.dot(xb, enc_w_ref[1], preferred_element_type=jnp.float32) + enc_b_ref[1]
    v = jnp.dot(xb, enc_w_ref[2], preferred_element_type=jnp.float32) + enc_b_ref[2]

    # q @ k^T without an explicit transpose (contract last dims)
    scores = lax.dot_general(q.astype(jnp.bfloat16), k.astype(jnp.bfloat16),
                             (((1,), (1,)), ((), ())),
                             preferred_element_type=jnp.float32) * (1.0 / math.sqrt(hdim))
    scores = scores + (1.0 - msk) * NEG_INF                  # key-side padding mask
    mx = jnp.max(scores, axis=-1, keepdims=True)
    p = jnp.exp(scores - mx)
    attn = p * pl.reciprocal(jnp.sum(p, axis=-1, keepdims=True), approx=True)
    ctx = jnp.dot(attn.astype(jnp.bfloat16), v.astype(jnp.bfloat16),
                  preferred_element_type=jnp.float32)
    attn_out = (jnp.dot(ctx.astype(jnp.bfloat16), enc_w_ref[3],
                        preferred_element_type=jnp.float32) + enc_b_ref[3])

    def layer_norm(y, g, bta):
        mu = jnp.mean(y, axis=-1, keepdims=True)
        var = jnp.mean((y - mu) ** 2, axis=-1, keepdims=True)
        return (y - mu) * lax.rsqrt(var + 1e-12) * g + bta

    x1 = layer_norm(xf + attn_out, enc_ln_ref[0], enc_ln_ref[1])
    f1 = jnp.maximum(
        jnp.dot(x1.astype(jnp.bfloat16), w128_ref[0],
                preferred_element_type=jnp.float32) + b128_ref[0], 0.0)   # (T, FFN)
    f2 = (jnp.dot(f1.astype(jnp.bfloat16), wf2_ref[...],
                  preferred_element_type=jnp.float32) + enc_b_ref[5])
    x2 = layer_norm(x1 + f2, enc_ln_ref[2], enc_ln_ref[3])

    # tanh pooler over the first token
    pooled = jnp.tanh(
        jnp.dot(x2[0:1, :].astype(jnp.bfloat16), enc_w_ref[4],
                preferred_element_type=jnp.float32) + enc_b_ref[4])       # (1, H)

    # classifier + softmax (nn.Dropout(0.5) -> identity in eval mode).
    # Padded columns carry a -1e30 bias so their softmax weight is exactly 0;
    # real classes live in columns 0:2.  Exact division keeps sum-to-1 tight.
    logits = (jnp.dot(pooled.astype(jnp.bfloat16), w128_ref[1],
                      preferred_element_type=jnp.float32) + b128_ref[1])  # (1, 128)
    mx2 = jnp.max(logits, axis=-1, keepdims=True)
    pe = jnp.exp(logits - mx2)
    out_ref[0] = pe / jnp.sum(pe, axis=-1, keepdims=True)


def _const_spec(shape):
    zeros = (0,) * len(shape)
    return pl.BlockSpec(shape, lambda b: zeros)


def spatial_rank_pallas(text_emb, node_emb, adjs, full_mask, p):
    B_, S_, H_ = text_emb.shape
    N_ = node_emb.shape[1]
    R_ = adjs.shape[1]
    T_ = S_ + N_

    return pl.pallas_call(
        _spatial_rank_kernel,
        out_shape=jax.ShapeDtypeStruct((B_, 1, CLS_PAD), jnp.float32),
        grid=(B_,),
        in_specs=[
            pl.BlockSpec((1, S_, H_), lambda b: (b, 0, 0)),
            pl.BlockSpec((1, N_, H_), lambda b: (b, 0, 0)),
            pl.BlockSpec((1, R_, N_, N_), lambda b: (b, 0, 0, 0)),
            pl.BlockSpec((1, 1, T_), lambda b: (b, 0, 0)),
            _const_spec(p["rgat_w"].shape),
            _const_spec(p["rgat_b"].shape),
            _const_spec(p["rgat_w2"].shape),
            pl.BlockSpec(memory_space=pltpu.MemorySpace.SMEM),   # b2 scalars
            _const_spec(p["enc_w"].shape),
            _const_spec(p["enc_b"].shape),
            _const_spec(p["enc_ln"].shape),
            _const_spec(p["w128"].shape),
            _const_spec(p["b128"].shape),
            _const_spec(p["wf2"].shape),
        ],
        out_specs=pl.BlockSpec((1, 1, CLS_PAD), lambda b: (b, 0, 0)),
        compiler_params=pltpu.CompilerParams(dimension_semantics=("parallel",)),
    )(text_emb, node_emb, adjs, full_mask,
      p["rgat_w"], p["rgat_b"], p["rgat_w2"], p["rgat_b2"],
      p["enc_w"], p["enc_b"], p["enc_ln"], p["w128"], p["b128"], p["wf2"])


# ============================== full forward ==============================
def spatial_rank_forward(params, input_ids, attention_mask, state_nodes, state_adjs):
    emb_table = params["emb"]
    # TODO(synk): plain word-embedding lookup stands in for BertModel.embeddings.
    text_emb = jnp.take(emb_table, input_ids, axis=0)            # (B, S, H)
    node_emb = jnp.take(emb_table, state_nodes, axis=0)          # (B, N, H)
    node_mask = (state_nodes != 0).astype(jnp.float32)           # (B, N)
    full_mask = jnp.concatenate([attention_mask, node_mask], axis=1)[:, None, :]

    probs_pad = spatial_rank_pallas(text_emb, node_emb, state_adjs, full_mask,
                                    params)                      # (B, 1, 128)
    return probs_pad[:, 0, :2]                                   # (B, 2)


# ============================ parameter init ============================
def init_params(key):
    keys = iter(jax.random.split(key, 64))

    def dense(in_dim, out_dim):
        # weights stored pre-transposed as (in, out) so kernels do x @ w (no .T)
        return 0.05 * jax.random.normal(next(keys), (in_dim, out_dim), jnp.float32)

    params = {"emb": 0.05 * jax.random.normal(next(keys), (VOCAB, H), jnp.float32)}

    L = R * NUM_HOPS   # stacked GAT layer index = relation * NUM_HOPS + hop
    # [W, W1a, W1b] stacked per layer -> one bf16 operand / one DMA
    params["rgat_w"] = jnp.stack(
        [jnp.stack([dense(H, H), dense(H, H), dense(H, H)]) for _ in range(L)]
    ).astype(jnp.bfloat16)                                       # (L, 3, H, H)
    params["rgat_b"] = jnp.zeros((L, 2, 1, H), jnp.float32)      # [bW, b1]
    params["rgat_w2"] = 0.05 * jax.random.normal(next(keys), (L, 1, H), jnp.float32)
    params["rgat_b2"] = jnp.zeros((L,), jnp.float32)             # SMEM scalars

    # encoder stand-in: [Wq, Wk, Wv, Wo, Wpooler] and [bq, bk, bv, bo, bp, bf2]
    params["enc_w"] = jnp.stack([dense(H, H) for _ in range(5)]).astype(jnp.bfloat16)
    params["enc_b"] = jnp.zeros((6, 1, H), jnp.float32)
    params["enc_ln"] = jnp.stack([jnp.ones((1, H)), jnp.zeros((1, H)),
                                  jnp.ones((1, H)), jnp.zeros((1, H))]
                                 ).astype(jnp.float32)           # (4, 1, H)

    # 128-lane-wide matrices share one operand: [wf1, padded classifier]
    wf1 = dense(H, FFN)
    wc_pad = jnp.pad(dense(H, 2), ((0, 0), (0, CLS_PAD - 2)))
    params["w128"] = jnp.stack([wf1, wc_pad]).astype(jnp.bfloat16)   # (2, H, 128)
    bf1 = jnp.zeros((1, FFN), jnp.float32)
    bc_pad = jnp.concatenate(
        [jnp.zeros((1, 2), jnp.float32),
         jnp.full((1, CLS_PAD - 2), NEG_INF, jnp.float32)], axis=1)
    params["b128"] = jnp.stack([bf1, bc_pad])                        # (2, 1, 128)
    params["wf2"] = dense(FFN, H).astype(jnp.bfloat16)
    return params


if __name__ == "__main__":
    key = jax.random.PRNGKey(0)
    k1, k2, k3, kp = jax.random.split(key, 4)
    params = init_params(kp)

    input_ids = jax.random.randint(k1, (B, S), 1, VOCAB, dtype=jnp.int32)
    attention_mask = jnp.ones((B, S), jnp.float32)
    state_nodes = jax.random.randint(k2, (B, N), 0, VOCAB, dtype=jnp.int32)
    state_adjs = jax.random.bernoulli(k3, 0.5, (B, R, N, N)).astype(jnp.float32)
    # guarantee at least one unmasked edge per relation (self loops)
    state_adjs = jnp.maximum(state_adjs, jnp.eye(N, dtype=jnp.float32)[None, None])

    probs = jax.jit(spatial_rank_forward)(
        params, input_ids, attention_mask, state_nodes, state_adjs)
    probs = jax.block_until_ready(probs)

    assert probs.shape == (B, 2)
    assert bool(jnp.all(jnp.isfinite(probs)))
    assert bool(jnp.allclose(jnp.sum(probs, axis=-1), 1.0, atol=1e-5))
    print("KERNEL_OK")
</pallas_src>

<mosaic_0001>
module attributes {stable_mosaic.version = 11 : i64} {
  func.func @_spatial_rank_kernel(%arg0: i32, %arg1: memref<1x8x32xf32, #tpu.memory_space<vmem>>, %arg2: memref<1x8x32xf32, #tpu.memory_space<vmem>>, %arg3: memref<1x2x8x8xf32, #tpu.memory_space<vmem>>, %arg4: memref<1x1x16xf32, #tpu.memory_space<vmem>>, %arg5: memref<4x3x32x32xbf16, #tpu.memory_space<vmem>>, %arg6: memref<4x2x1x32xf32, #tpu.memory_space<vmem>>, %arg7: memref<4x1x32xf32, #tpu.memory_space<vmem>>, %arg8: memref<4xf32, #tpu.memory_space<smem>>, %arg9: memref<5x32x32xbf16, #tpu.memory_space<vmem>>, %arg10: memref<6x1x32xf32, #tpu.memory_space<vmem>>, %arg11: memref<4x1x32xf32, #tpu.memory_space<vmem>>, %arg12: memref<2x32x128xbf16, #tpu.memory_space<vmem>>, %arg13: memref<2x1x128xf32, #tpu.memory_space<vmem>>, %arg14: memref<128x32xbf16, #tpu.memory_space<vmem>>, %arg15: memref<1x1x128xf32, #tpu.memory_space<vmem>>) attributes {dimension_semantics = [#tpu.dimension_semantics<parallel>], iteration_bounds = array<i64: 2>, scalar_prefetch = 0 : i64, scratch_operands = 0 : i64, tpu.core_type = #tpu.core_type<tc>, window_params = [{transform_indices = @transform_0, window_bounds = array<i64: 1, 8, 32>}, {transform_indices = @transform_1, window_bounds = array<i64: 1, 8, 32>}, {transform_indices = @transform_2, window_bounds = array<i64: 1, 2, 8, 8>}, {transform_indices = @transform_3, window_bounds = array<i64: 1, 1, 16>}, {pipeline_mode = #tpu.pipeline_mode<synchronous>, transform_indices = @transform_4, window_bounds = array<i64: 4, 3, 32, 32>}, {pipeline_mode = #tpu.pipeline_mode<synchronous>, transform_indices = @transform_5, window_bounds = array<i64: 4, 2, 1, 32>}, {pipeline_mode = #tpu.pipeline_mode<synchronous>, transform_indices = @transform_6, window_bounds = array<i64: 4, 1, 32>}, {transform_indices = @transform_7, window_bounds = array<i64: 4>}, {pipeline_mode = #tpu.pipeline_mode<synchronous>, transform_indices = @transform_8, window_bounds = array<i64: 5, 32, 32>}, {pipeline_mode = #tpu.pipeline_mode<synchronous>, transform_indices = @transform_9, window_bounds = array<i64: 6, 1, 32>}, {pipeline_mode = #tpu.pipeline_mode<synchronous>, transform_indices = @transform_10, window_bounds = array<i64: 4, 1, 32>}, {pipeline_mode = #tpu.pipeline_mode<synchronous>, transform_indices = @transform_11, window_bounds = array<i64: 2, 32, 128>}, {pipeline_mode = #tpu.pipeline_mode<synchronous>, transform_indices = @transform_12, window_bounds = array<i64: 2, 1, 128>}, {pipeline_mode = #tpu.pipeline_mode<synchronous>, transform_indices = @transform_13, window_bounds = array<i64: 128, 32>}, {transform_indices = @transform_14, window_bounds = array<i64: 1, 1, 128>}]} {
    %c0 = arith.constant 0 : index
    %c0_0 = arith.constant 0 : index
    %c0_1 = arith.constant 0 : index
    %0 = vector.load %arg2[%c0, %c0_0, %c0_1] : memref<1x8x32xf32, #tpu.memory_space<vmem>>, vector<1x8x32xf32>
    %1 = vector.shape_cast %0 : vector<1x8x32xf32> to vector<8x32xf32>
    %c0_2 = arith.constant 0 : index
    %c0_3 = arith.constant 0 : index
    %c0_4 = arith.constant 0 : index
    %c0_5 = arith.constant 0 : index
    %2 = vector.load %arg3[%c0_2, %c0_3, %c0_4, %c0_5] : memref<1x2x8x8xf32, #tpu.memory_space<vmem>>, vector<1x1x8x8xf32>
    %3 = vector.shape_cast %2 : vector<1x1x8x8xf32> to vector<8x8xf32>
    %4 = arith.truncf %1 : vector<8x32xf32> to vector<8x32xbf16>
    %c0_6 = arith.constant 0 : index
    %c0_7 = arith.constant 0 : index
    %c0_8 = arith.constant 0 : index
    %c0_9 = arith.constant 0 : index
    %5 = vector.load %arg5[%c0_6, %c0_7, %c0_8, %c0_9] : memref<4x3x32x32xbf16, #tpu.memory_space<vmem>>, vector<1x1x32x32xbf16>
    %6 = vector.shape_cast %5 : vector<1x1x32x32xbf16> to vector<32x32xbf16>
    %cst = arith.constant dense<0.000000e+00> : vector<8x32xf32>
    %7 = tpu.matmul %4, %6, %cst {dimension_numbers = #tpu.dot_dimension_numbers<[1], [0], [0], [1], [0, 0, 1, 1], [], []>} : vector<8x32xbf16>, vector<32x32xbf16>, vector<8x32xf32> -> vector<8x32xf32>
    %c0_10 = arith.constant 0 : index
    %c0_11 = arith.constant 0 : index
    %c0_12 = arith.constant 0 : index
    %c0_13 = arith.constant 0 : index
    %8 = vector.load %arg6[%c0_10, %c0_11, %c0_12, %c0_13] : memref<4x2x1x32xf32, #tpu.memory_space<vmem>>, vector<1x1x1x32xf32>
    %9 = vector.shape_cast %8 : vector<1x1x1x32xf32> to vector<1x32xf32>
    %10 = vector.broadcast %9 : vector<1x32xf32> to vector<8x32xf32>
    %11 = arith.addf %7, %10 : vector<8x32xf32>
    %12 = arith.truncf %11 : vector<8x32xf32> to vector<8x32xbf16>
    %c0_14 = arith.constant 0 : index
    %c1 = arith.constant 1 : index
    %c0_15 = arith.constant 0 : index
    %c0_16 = arith.constant 0 : index
    %13 = vector.load %arg5[%c0_14, %c1, %c0_15, %c0_16] : memref<4x3x32x32xbf16, #tpu.memory_space<vmem>>, vector<1x1x32x32xbf16>
    %14 = vector.shape_cast %13 : vector<1x1x32x32xbf16> to vector<32x32xbf16>
    %cst_17 = arith.constant dense<0.000000e+00> : vector<8x32xf32>
    %15 = tpu.matmul %12, %14, %cst_17 {dimension_numbers = #tpu.dot_dimension_numbers<[1], [0], [0], [1], [0, 0, 1, 1], [], []>} : vector<8x32xbf16>, vector<32x32xbf16>, vector<8x32xf32> -> vector<8x32xf32>
    %c0_18 = arith.constant 0 : index
    %c1_19 = arith.constant 1 : index
    %c0_20 = arith.constant 0 : index
    %c0_21 = arith.constant 0 : index
    %16 = vector.load %arg6[%c0_18, %c1_19, %c0_20, %c0_21] : memref<4x2x1x32xf32, #tpu.memory_space<vmem>>, vector<1x1x1x32xf32>
    %17 = vector.shape_cast %16 : vector<1x1x1x32xf32> to vector<1x32xf32>
    %18 = vector.broadcast %17 : vector<1x32xf32> to vector<8x32xf32>
    %19 = arith.addf %15, %18 : vector<8x32xf32>
    %c0_22 = arith.constant 0 : index
    %c2 = arith.constant 2 : index
    %c0_23 = arith.constant 0 : index
    %c0_24 = arith.constant 0 : index
    %20 = vector.load %arg5[%c0_22, %c2, %c0_23, %c0_24] : memref<4x3x32x32xbf16, #tpu.memory_space<vmem>>, vector<1x1x32x32xbf16>
    %21 = vector.shape_cast %20 : vector<1x1x32x32xbf16> to vector<32x32xbf16>
    %cst_25 = arith.constant dense<0.000000e+00> : vector<8x32xf32>
    %22 = tpu.matmul %12, %21, %cst_25 {dimension_numbers = #tpu.dot_dimension_numbers<[1], [0], [0], [1], [0, 0, 1, 1], [], []>} : vector<8x32xbf16>, vector<32x32xbf16>, vector<8x32xf32> -> vector<8x32xf32>
    %23 = vector.shape_cast %19 : vector<8x32xf32> to vector<8x1x32xf32>
    %24 = vector.shape_cast %22 : vector<8x32xf32> to vector<1x8x32xf32>
    %25 = vector.broadcast %23 : vector<8x1x32xf32> to vector<8x8x32xf32>
    %26 = vector.broadcast %24 : vector<1x8x32xf32> to vector<8x8x32xf32>
    %27 = arith.addf %25, %26 : vector<8x8x32xf32>
    %cst_26 = arith.constant 0.000000e+00 : f32
    %28 = vector.broadcast %cst_26 : f32 to vector<8x8x32xf32>
    %29 = arith.maximumf %27, %28 : vector<8x8x32xf32>
    %c0_27 = arith.constant 0 : index
    %c0_28 = arith.constant 0 : index
    %c0_29 = arith.constant 0 : index
    %30 = vector.load %arg7[%c0_27, %c0_28, %c0_29] : memref<4x1x32xf32, #tpu.memory_space<vmem>>, vector<1x1x32xf32>
    %31 = vector.shape_cast %30 : vector<1x1x32xf32> to vector<1x32xf32>
    %32 = vector.shape_cast %31 : vector<1x32xf32> to vector<1x1x32xf32>
    %33 = vector.broadcast %32 : vector<1x1x32xf32> to vector<8x8x32xf32>
    %34 = arith.mulf %29, %33 : vector<8x8x32xf32>
    %cst_30 = arith.constant dense<0.000000e+00> : vector<8x8xf32>
    %35 = vector.multi_reduction <add>, %34, %cst_30 [2] : vector<8x8x32xf32> to vector<8x8xf32>
    %c0_31 = arith.constant 0 : index
    %36 = memref.load %arg8[%c0_31] : memref<4xf32, #tpu.memory_space<smem>>
    %37 = vector.broadcast %36 : f32 to vector<8x8xf32>
    %38 = arith.addf %35, %37 : vector<8x8xf32>
    %cst_32 = arith.constant 0.000000e+00 : f32
    %39 = vector.broadcast %cst_32 : f32 to vector<8x8xf32>
    %40 = arith.cmpf ogt, %38, %39 : vector<8x8xf32>
    %cst_33 = arith.constant 0.00999999977 : f32
    %41 = vector.broadcast %cst_33 : f32 to vector<8x8xf32>
    %42 = arith.mulf %41, %38 : vector<8x8xf32>
    %43 = arith.select %40, %38, %42 : vector<8x8xi1>, vector<8x8xf32>
    %44 = arith.mulf %43, %3 : vector<8x8xf32>
    %cst_34 = arith.constant 1.000000e+00 : f32
    %45 = vector.broadcast %cst_34 : f32 to vector<8x8xf32>
    %46 = arith.subf %45, %3 : vector<8x8xf32>
    %cst_35 = arith.constant -1.000000e+30 : f32
    %47 = vector.broadcast %cst_35 : f32 to vector<8x8xf32>
    %48 = arith.mulf %46, %47 : vector<8x8xf32>
    %49 = arith.addf %44, %48 : vector<8x8xf32>
    %cst_36 = arith.constant dense<0xFF800000> : vector<8xf32>
    %50 = vector.multi_reduction <maximumf>, %49, %cst_36 [1] : vector<8x8xf32> to vector<8xf32>
    %51 = vector.shape_cast %50 : vector<8xf32> to vector<8x1xf32>
    %cst_37 = arith.constant dense<0xFF800000> : vector<1xf32>
    %52 = vector.multi_reduction <maximumf>, %51, %cst_37 [0] : vector<8x1xf32> to vector<1xf32>
    %53 = vector.shape_cast %52 : vector<1xf32> to vector<1x1xf32>
    %54 = vector.broadcast %53 : vector<1x1xf32> to vector<8x8xf32>
    %55 = arith.subf %49, %54 : vector<8x8xf32>
    %56 = math.exp %55 : vector<8x8xf32>
    %cst_38 = arith.constant dense<0.000000e+00> : vector<8xf32>
    %57 = vector.multi_reduction <add>, %56, %cst_38 [1] : vector<8x8xf32> to vector<8xf32>
    %58 = vector.shape_cast %57 : vector<8xf32> to vector<8x1xf32>
    %cst_39 = arith.constant dense<0.000000e+00> : vector<1xf32>
    %59 = vector.multi_reduction <add>, %58, %cst_39 [0] : vector<8x1xf32> to vector<1xf32>
    %60 = vector.shape_cast %59 : vector<1xf32> to vector<1x1xf32>
    %61 = tpu.reciprocal %60 {approx = true} : vector<1x1xf32> -> vector<1x1xf32>
    %62 = vector.broadcast %61 : vector<1x1xf32> to vector<8x8xf32>
    %63 = arith.mulf %56, %62 : vector<8x8xf32>
    %64 = arith.truncf %63 : vector<8x8xf32> to vector<8x8xbf16>
    %cst_40 = arith.constant dense<0.000000e+00> : vector<8x32xf32>
    %65 = tpu.matmul %64, %12, %cst_40 {dimension_numbers = #tpu.dot_dimension_numbers<[1], [0], [0], [1], [0, 0, 1, 1], [], []>} : vector<8x8xbf16>, vector<8x32xbf16>, vector<8x32xf32> -> vector<8x32xf32>
    %c0_41 = arith.constant 0 : index
    %c1_42 = arith.constant 1 : index
    %c0_43 = arith.constant 0 : index
    %c0_44 = arith.constant 0 : index
    %66 = vector.load %arg3[%c0_41, %c1_42, %c0_43, %c0_44] : memref<1x2x8x8xf32, #tpu.memory_space<vmem>>, vector<1x1x8x8xf32>
    %67 = vector.shape_cast %66 : vector<1x1x8x8xf32> to vector<8x8xf32>
    %68 = arith.truncf %1 : vector<8x32xf32> to vector<8x32xbf16>
    %c2_45 = arith.constant 2 : index
    %c0_46 = arith.constant 0 : index
    %c0_47 = arith.constant 0 : index
    %c0_48 = arith.constant 0 : index
    %69 = vector.load %arg5[%c2_45, %c0_46, %c0_47, %c0_48] : memref<4x3x32x32xbf16, #tpu.memory_space<vmem>>, vector<1x1x32x32xbf16>
    %70 = vector.shape_cast %69 : vector<1x1x32x32xbf16> to vector<32x32xbf16>
    %cst_49 = arith.constant dense<0.000000e+00> : vector<8x32xf32>
    %71 = tpu.matmul %68, %70, %cst_49 {dimension_numbers = #tpu.dot_dimension_numbers<[1], [0], [0], [1], [0, 0, 1, 1], [], []>} : vector<8x32xbf16>, vector<32x32xbf16>, vector<8x32xf32> -> vector<8x32xf32>
    %c2_50 = arith.constant 2 : index
    %c0_51 = arith.constant 0 : index
    %c0_52 = arith.constant 0 : index
    %c0_53 = arith.constant 0 : index
    %72 = vector.load %arg6[%c2_50, %c0_51, %c0_52, %c0_53] : memref<4x2x1x32xf32, #tpu.memory_space<vmem>>, vector<1x1x1x32xf32>
    %73 = vector.shape_cast %72 : vector<1x1x1x32xf32> to vector<1x32xf32>
    %74 = vector.broadcast %73 : vector<1x32xf32> to vector<8x32xf32>
    %75 = arith.addf %71, %74 : vector<8x32xf32>
    %76 = arith.truncf %75 : vector<8x32xf32> to vector<8x32xbf16>
    %c2_54 = arith.constant 2 : index
    %c1_55 = arith.constant 1 : index
    %c0_56 = arith.constant 0 : index
    %c0_57 = arith.constant 0 : index
    %77 = vector.load %arg5[%c2_54, %c1_55, %c0_56, %c0_57] : memref<4x3x32x32xbf16, #tpu.memory_space<vmem>>, vector<1x1x32x32xbf16>
    %78 = vector.shape_cast %77 : vector<1x1x32x32xbf16> to vector<32x32xbf16>
    %cst_58 = arith.constant dense<0.000000e+00> : vector<8x32xf32>
    %79 = tpu.matmul %76, %78, %cst_58 {dimension_numbers = #tpu.dot_dimension_numbers<[1], [0], [0], [1], [0, 0, 1, 1], [], []>} : vector<8x32xbf16>, vector<32x32xbf16>, vector<8x32xf32> -> vector<8x32xf32>
    %c2_59 = arith.constant 2 : index
    %c1_60 = arith.constant 1 : index
    %c0_61 = arith.constant 0 : index
    %c0_62 = arith.constant 0 : index
    %80 = vector.load %arg6[%c2_59, %c1_60, %c0_61, %c0_62] : memref<4x2x1x32xf32, #tpu.memory_space<vmem>>, vector<1x1x1x32xf32>
    %81 = vector.shape_cast %80 : vector<1x1x1x32xf32> to vector<1x32xf32>
    %82 = vector.broadcast %81 : vector<1x32xf32> to vector<8x32xf32>
    %83 = arith.addf %79, %82 : vector<8x32xf32>
    %c2_63 = arith.constant 2 : index
    %c2_64 = arith.constant 2 : index
    %c0_65 = arith.constant 0 : index
    %c0_66 = arith.constant 0 : index
    %84 = vector.load %arg5[%c2_63, %c2_64, %c0_65, %c0_66] : memref<4x3x32x32xbf16, #tpu.memory_space<vmem>>, vector<1x1x32x32xbf16>
    %85 = vector.shape_cast %84 : vector<1x1x32x32xbf16> to vector<32x32xbf16>
    %cst_67 = arith.constant dense<0.000000e+00> : vector<8x32xf32>
    %86 = tpu.matmul %76, %85, %cst_67 {dimension_numbers = #tpu.dot_dimension_numbers<[1], [0], [0], [1], [0, 0, 1, 1], [], []>} : vector<8x32xbf16>, vector<32x32xbf16>, vector<8x32xf32> -> vector<8x32xf32>
    %87 = vector.shape_cast %83 : vector<8x32xf32> to vector<8x1x32xf32>
    %88 = vector.shape_cast %86 : vector<8x32xf32> to vector<1x8x32xf32>
    %89 = vector.broadcast %87 : vector<8x1x32xf32> to vector<8x8x32xf32>
    %90 = vector.broadcast %88 : vector<1x8x32xf32> to vector<8x8x32xf32>
    %91 = arith.addf %89, %90 : vector<8x8x32xf32>
    %cst_68 = arith.constant 0.000000e+00 : f32
    %92 = vector.broadcast %cst_68 : f32 to vector<8x8x32xf32>
    %93 = arith.maximumf %91, %92 : vector<8x8x32xf32>
    %c2_69 = arith.constant 2 : index
    %c0_70 = arith.constant 0 : index
    %c0_71 = arith.constant 0 : index
    %94 = vector.load %arg7[%c2_69, %c0_70, %c0_71] : memref<4x1x32xf32, #tpu.memory_space<vmem>>, vector<1x1x32xf32>
    %95 = vector.shape_cast %94 : vector<1x1x32xf32> to vector<1x32xf32>
    %96 = vector.shape_cast %95 : vector<1x32xf32> to vector<1x1x32xf32>
    %97 = vector.broadcast %96 : vector<1x1x32xf32> to vector<8x8x32xf32>
    %98 = arith.mulf %93, %97 : vector<8x8x32xf32>
    %cst_72 = arith.constant dense<0.000000e+00> : vector<8x8xf32>
    %99 = vector.multi_reduction <add>, %98, %cst_72 [2] : vector<8x8x32xf32> to vector<8x8xf32>
    %c2_73 = arith.constant 2 : index
    %100 = memref.load %arg8[%c2_73] : memref<4xf32, #tpu.memory_space<smem>>
    %101 = vector.broadcast %100 : f32 to vector<8x8xf32>
    %102 = arith.addf %99, %101 : vector<8x8xf32>
    %cst_74 = arith.constant 0.000000e+00 : f32
    %103 = vector.broadcast %cst_74 : f32 to vector<8x8xf32>
    %104 = arith.cmpf ogt, %102, %103 : vector<8x8xf32>
    %cst_75 = arith.constant 0.00999999977 : f32
    %105 = vector.broadcast %cst_75 : f32 to vector<8x8xf32>
    %106 = arith.mulf %105, %102 : vector<8x8xf32>
    %107 = arith.select %104, %102, %106 : vector<8x8xi1>, vector<8x8xf32>
    %108 = arith.mulf %107, %67 : vector<8x8xf32>
    %cst_76 = arith.constant 1.000000e+00 : f32
    %109 = vector.broadcast %cst_76 : f32 to vector<8x8xf32>
    %110 = arith.subf %109, %67 : vector<8x8xf32>
    %cst_77 = arith.constant -1.000000e+30 : f32
    %111 = vector.broadcast %cst_77 : f32 to vector<8x8xf32>
    %112 = arith.mulf %110, %111 : vector<8x8xf32>
    %113 = arith.addf %108, %112 : vector<8x8xf32>
    %cst_78 = arith.constant dense<0xFF800000> : vector<8xf32>
    %114 = vector.multi_reduction <maximumf>, %113, %cst_78 [1] : vector<8x8xf32> to vector<8xf32>
    %115 = vector.shape_cast %114 : vector<8xf32> to vector<8x1xf32>
    %cst_79 = arith.constant dense<0xFF800000> : vector<1xf32>
    %116 = vector.multi_reduction <maximumf>, %115, %cst_79 [0] : vector<8x1xf32> to vector<1xf32>
    %117 = vector.shape_cast %116 : vector<1xf32> to vector<1x1xf32>
    %118 = vector.broadcast %117 : vector<1x1xf32> to vector<8x8xf32>
    %119 = arith.subf %113, %118 : vector<8x8xf32>
    %120 = math.exp %119 : vector<8x8xf32>
    %cst_80 = arith.constant dense<0.000000e+00> : vector<8xf32>
    %121 = vector.multi_reduction <add>, %120, %cst_80 [1] : vector<8x8xf32> to vector<8xf32>
    %122 = vector.shape_cast %121 : vector<8xf32> to vector<8x1xf32>
    %cst_81 = arith.constant dense<0.000000e+00> : vector<1xf32>
    %123 = vector.multi_reduction <add>, %122, %cst_81 [0] : vector<8x1xf32> to vector<1xf32>
    %124 = vector.shape_cast %123 : vector<1xf32> to vector<1x1xf32>
    %125 = tpu.reciprocal %124 {approx = true} : vector<1x1xf32> -> vector<1x1xf32>
    %126 = vector.broadcast %125 : vector<1x1xf32> to vector<8x8xf32>
    %127 = arith.mulf %120, %126 : vector<8x8xf32>
    %128 = arith.truncf %127 : vector<8x8xf32> to vector<8x8xbf16>
    %cst_82 = arith.constant dense<0.000000e+00> : vector<8x32xf32>
    %129 = tpu.matmul %128, %76, %cst_82 {dimension_numbers = #tpu.dot_dimension_numbers<[1], [0], [0], [1], [0, 0, 1, 1], [], []>} : vector<8x8xbf16>, vector<8x32xbf16>, vector<8x32xf32> -> vector<8x32xf32>
    %130 = arith.addf %65, %129 : vector<8x32xf32>
    %cst_83 = arith.constant 0.000000e+00 : f32
    %131 = vector.broadcast %cst_83 : f32 to vector<8x32xf32>
    %132 = arith.maximumf %130, %131 : vector<8x32xf32>
    %c0_84 = arith.constant 0 : index
    %c0_85 = arith.constant 0 : index
    %c0_86 = arith.constant 0 : index
    %c0_87 = arith.constant 0 : index
    %133 = vector.load %arg3[%c0_84, %c0_85, %c0_86, %c0_87] : memref<1x2x8x8xf32, #tpu.memory_space<vmem>>, vector<1x1x8x8xf32>
    %134 = vector.shape_cast %133 : vector<1x1x8x8xf32> to vector<8x8xf32>
    %135 = arith.truncf %132 : vector<8x32xf32> to vector<8x32xbf16>
    %c1_88 = arith.constant 1 : index
    %c0_89 = arith.constant 0 : index
    %c0_90 = arith.constant 0 : index
    %c0_91 = arith.constant 0 : index
    %136 = vector.load %arg5[%c1_88, %c0_89, %c0_90, %c0_91] : memref<4x3x32x32xbf16, #tpu.memory_space<vmem>>, vector<1x1x32x32xbf16>
    %137 = vector.shape_cast %136 : vector<1x1x32x32xbf16> to vector<32x32xbf16>
    %cst_92 = arith.constant dense<0.000000e+00> : vector<8x32xf32>
    %138 = tpu.matmul %135, %137, %cst_92 {dimension_numbers = #tpu.dot_dimension_numbers<[1], [0], [0], [1], [0, 0, 1, 1], [], []>} : vector<8x32xbf16>, vector<32x32xbf16>, vector<8x32xf32> -> vector<8x32xf32>
    %c1_93 = arith.constant 1 : index
    %c0_94 = arith.constant 0 : index
    %c0_95 = arith.constant 0 : index
    %c0_96 = arith.constant 0 : index
    %139 = vector.load %arg6[%c1_93, %c0_94, %c0_95, %c0_96] : memref<4x2x1x32xf32, #tpu.memory_space<vmem>>, vector<1x1x1x32xf32>
    %140 = vector.shape_cast %139 : vector<1x1x1x32xf32> to vector<1x32xf32>
    %141 = vector.broadcast %140 : vector<1x32xf32> to vector<8x32xf32>
    %142 = arith.addf %138, %141 : vector<8x32xf32>
    %143 = arith.truncf %142 : vector<8x32xf32> to vector<8x32xbf16>
    %c1_97 = arith.constant 1 : index
    %c1_98 = arith.constant 1 : index
    %c0_99 = arith.constant 0 : index
    %c0_100 = arith.constant 0 : index
    %144 = vector.load %arg5[%c1_97, %c1_98, %c0_99, %c0_100] : memref<4x3x32x32xbf16, #tpu.memory_space<vmem>>, vector<1x1x32x32xbf16>
    %145 = vector.shape_cast %144 : vector<1x1x32x32xbf16> to vector<32x32xbf16>
    %cst_101 = arith.constant dense<0.000000e+00> : vector<8x32xf32>
    %146 = tpu.matmul %143, %145, %cst_101 {dimension_numbers = #tpu.dot_dimension_numbers<[1], [0], [0], [1], [0, 0, 1, 1], [], []>} : vector<8x32xbf16>, vector<32x32xbf16>, vector<8x32xf32> -> vector<8x32xf32>
    %c1_102 = arith.constant 1 : index
    %c1_103 = arith.constant 1 : index
    %c0_104 = arith.constant 0 : index
    %c0_105 = arith.constant 0 : index
    %147 = vector.load %arg6[%c1_102, %c1_103, %c0_104, %c0_105] : memref<4x2x1x32xf32, #tpu.memory_space<vmem>>, vector<1x1x1x32xf32>
    %148 = vector.shape_cast %147 : vector<1x1x1x32xf32> to vector<1x32xf32>
    %149 = vector.broadcast %148 : vector<1x32xf32> to vector<8x32xf32>
    %150 = arith.addf %146, %149 : vector<8x32xf32>
    %c1_106 = arith.constant 1 : index
    %c2_107 = arith.constant 2 : index
    %c0_108 = arith.constant 0 : index
    %c0_109 = arith.constant 0 : index
    %151 = vector.load %arg5[%c1_106, %c2_107, %c0_108, %c0_109] : memref<4x3x32x32xbf16, #tpu.memory_space<vmem>>, vector<1x1x32x32xbf16>
    %152 = vector.shape_cast %151 : vector<1x1x32x32xbf16> to vector<32x32xbf16>
    %cst_110 = arith.constant dense<0.000000e+00> : vector<8x32xf32>
    %153 = tpu.matmul %143, %152, %cst_110 {dimension_numbers = #tpu.dot_dimension_numbers<[1], [0], [0], [1], [0, 0, 1, 1], [], []>} : vector<8x32xbf16>, vector<32x32xbf16>, vector<8x32xf32> -> vector<8x32xf32>
    %154 = vector.shape_cast %150 : vector<8x32xf32> to vector<8x1x32xf32>
    %155 = vector.shape_cast %153 : vector<8x32xf32> to vector<1x8x32xf32>
    %156 = vector.broadcast %154 : vector<8x1x32xf32> to vector<8x8x32xf32>
    %157 = vector.broadcast %155 : vector<1x8x32xf32> to vector<8x8x32xf32>
    %158 = arith.addf %156, %157 : vector<8x8x32xf32>
    %cst_111 = arith.constant 0.000000e+00 : f32
    %159 = vector.broadcast %cst_111 : f32 to vector<8x8x32xf32>
    %160 = arith.maximumf %158, %159 : vector<8x8x32xf32>
    %c1_112 = arith.constant 1 : index
    %c0_113 = arith.constant 0 : index
    %c0_114 = arith.constant 0 : index
    %161 = vector.load %arg7[%c1_112, %c0_113, %c0_114] : memref<4x1x32xf32, #tpu.memory_space<vmem>>, vector<1x1x32xf32>
    %162 = vector.shape_cast %161 : vector<1x1x32xf32> to vector<1x32xf32>
    %163 = vector.shape_cast %162 : vector<1x32xf32> to vector<1x1x32xf32>
    %164 = vector.broadcast %163 : vector<1x1x32xf32> to vector<8x8x32xf32>
    %165 = arith.mulf %160, %164 : vector<8x8x32xf32>
    %cst_115 = arith.constant dense<0.000000e+00> : vector<8x8xf32>
    %166 = vector.multi_reduction <add>, %165, %cst_115 [2] : vector<8x8x32xf32> to vector<8x8xf32>
    %c1_116 = arith.constant 1 : index
    %167 = memref.load %arg8[%c1_116] : memref<4xf32, #tpu.memory_space<smem>>
    %168 = vector.broadcast %167 : f32 to vector<8x8xf32>
    %169 = arith.addf %166, %168 : vector<8x8xf32>
    %cst_117 = arith.constant 0.000000e+00 : f32
    %170 = vector.broadcast %cst_117 : f32 to vector<8x8xf32>
    %171 = arith.cmpf ogt, %169, %170 : vector<8x8xf32>
    %cst_118 = arith.constant 0.00999999977 : f32
    %172 = vector.broadcast %cst_118 : f32 to vector<8x8xf32>
    %173 = arith.mulf %172, %169 : vector<8x8xf32>
    %174 = arith.select %171, %169, %173 : vector<8x8xi1>, vector<8x8xf32>
    %175 = arith.mulf %174, %134 : vector<8x8xf32>
    %cst_119 = arith.constant 1.000000e+00 : f32
    %176 = vector.broadcast %cst_119 : f32 to vector<8x8xf32>
    %177 = arith.subf %176, %134 : vector<8x8xf32>
    %cst_120 = arith.constant -1.000000e+30 : f32
    %178 = vector.broadcast %cst_120 : f32 to vector<8x8xf32>
    %179 = arith.mulf %177, %178 : vector<8x8xf32>
    %180 = arith.addf %175, %179 : vector<8x8xf32>
    %cst_121 = arith.constant dense<0xFF800000> : vector<8xf32>
    %181 = vector.multi_reduction <maximumf>, %180, %cst_121 [1] : vector<8x8xf32> to vector<8xf32>
    %182 = vector.shape_cast %181 : vector<8xf32> to vector<8x1xf32>
    %cst_122 = arith.constant dense<0xFF800000> : vector<1xf32>
    %183 = vector.multi_reduction <maximumf>, %182, %cst_122 [0] : vector<8x1xf32> to vector<1xf32>
    %184 = vector.shape_cast %183 : vector<1xf32> to vector<1x1xf32>
    %185 = vector.broadcast %184 : vector<1x1xf32> to vector<8x8xf32>
    %186 = arith.subf %180, %185 : vector<8x8xf32>
    %187 = math.exp %186 : vector<8x8xf32>
    %cst_123 = arith.constant dense<0.000000e+00> : vector<8xf32>
    %188 = vector.multi_reduction <add>, %187, %cst_123 [1] : vector<8x8xf32> to vector<8xf32>
    %189 = vector.shape_cast %188 : vector<8xf32> to vector<8x1xf32>
    %cst_124 = arith.constant dense<0.000000e+00> : vector<1xf32>
    %190 = vector.multi_reduction <add>, %189, %cst_124 [0] : vector<8x1xf32> to vector<1xf32>
    %191 = vector.shape_cast %190 : vector<1xf32> to vector<1x1xf32>
    %192 = tpu.reciprocal %191 {approx = true} : vector<1x1xf32> -> vector<1x1xf32>
    %193 = vector.broadcast %192 : vector<1x1xf32> to vector<8x8xf32>
    %194 = arith.mulf %187, %193 : vector<8x8xf32>
    %195 = arith.truncf %194 : vector<8x8xf32> to vector<8x8xbf16>
    %cst_125 = arith.constant dense<0.000000e+00> : vector<8x32xf32>
    %196 = tpu.matmul %195, %143, %cst_125 {dimension_numbers = #tpu.dot_dimension_numbers<[1], [0], [0], [1], [0, 0, 1, 1], [], []>} : vector<8x8xbf16>, vector<8x32xbf16>, vector<8x32xf32> -> vector<8x32xf32>
    %c0_126 = arith.constant 0 : index
    %c1_127 = arith.constant 1 : index
    %c0_128 = arith.constant 0 : index
    %c0_129 = arith.constant 0 : index
    %197 = vector.load %arg3[%c0_126, %c1_127, %c0_128, %c0_129] : memref<1x2x8x8xf32, #tpu.memory_space<vmem>>, vector<1x1x8x8xf32>
    %198 = vector.shape_cast %197 : vector<1x1x8x8xf32> to vector<8x8xf32>
    %199 = arith.truncf %132 : vector<8x32xf32> to vector<8x32xbf16>
    %c3 = arith.constant 3 : index
    %c0_130 = arith.constant 0 : index
    %c0_131 = arith.constant 0 : index
    %c0_132 = arith.constant 0 : index
    %200 = vector.load %arg5[%c3, %c0_130, %c0_131, %c0_132] : memref<4x3x32x32xbf16, #tpu.memory_space<vmem>>, vector<1x1x32x32xbf16>
    %201 = vector.shape_cast %200 : vector<1x1x32x32xbf16> to vector<32x32xbf16>
    %cst_133 = arith.constant dense<0.000000e+00> : vector<8x32xf32>
    %202 = tpu.matmul %199, %201, %cst_133 {dimension_numbers = #tpu.dot_dimension_numbers<[1], [0], [0], [1], [0, 0, 1, 1], [], []>} : vector<8x32xbf16>, vector<32x32xbf16>, vector<8x32xf32> -> vector<8x32xf32>
    %c3_134 = arith.constant 3 : index
    %c0_135 = arith.constant 0 : index
    %c0_136 = arith.constant 0 : index
    %c0_137 = arith.constant 0 : index
    %203 = vector.load %arg6[%c3_134, %c0_135, %c0_136, %c0_137] : memref<4x2x1x32xf32, #tpu.memory_space<vmem>>, vector<1x1x1x32xf32>
    %204 = vector.shape_cast %203 : vector<1x1x1x32xf32> to vector<1x32xf32>
    %205 = vector.broadcast %204 : vector<1x32xf32> to vector<8x32xf32>
    %206 = arith.addf %202, %205 : vector<8x32xf32>
    %207 = arith.truncf %206 : vector<8x32xf32> to vector<8x32xbf16>
    %c3_138 = arith.constant 3 : index
    %c1_139 = arith.constant 1 : index
    %c0_140 = arith.constant 0 : index
    %c0_141 = arith.constant 0 : index
    %208 = vector.load %arg5[%c3_138, %c1_139, %c0_140, %c0_141] : memref<4x3x32x32xbf16, #tpu.memory_space<vmem>>, vector<1x1x32x32xbf16>
    %209 = vector.shape_cast %208 : vector<1x1x32x32xbf16> to vector<32x32xbf16>
    %cst_142 = arith.constant dense<0.000000e+00> : vector<8x32xf32>
    %210 = tpu.matmul %207, %209, %cst_142 {dimension_numbers = #tpu.dot_dimension_numbers<[1], [0], [0], [1], [0, 0, 1, 1], [], []>} : vector<8x32xbf16>, vector<32x32xbf16>, vector<8x32xf32> -> vector<8x32xf32>
    %c3_143 = arith.constant 3 : index
    %c1_144 = arith.constant 1 : index
    %c0_145 = arith.constant 0 : index
    %c0_146 = arith.constant 0 : index
    %211 = vector.load %arg6[%c3_143, %c1_144, %c0_145, %c0_146] : memref<4x2x1x32xf32, #tpu.memory_space<vmem>>, vector<1x1x1x32xf32>
    %212 = vector.shape_cast %211 : vector<1x1x1x32xf32> to vector<1x32xf32>
    %213 = vector.broadcast %212 : vector<1x32xf32> to vector<8x32xf32>
    %214 = arith.addf %210, %213 : vector<8x32xf32>
    %c3_147 = arith.constant 3 : index
    %c2_148 = arith.constant 2 : index
    %c0_149 = arith.constant 0 : index
    %c0_150 = arith.constant 0 : index
    %215 = vector.load %arg5[%c3_147, %c2_148, %c0_149, %c0_150] : memref<4x3x32x32xbf16, #tpu.memory_space<vmem>>, vector<1x1x32x32xbf16>
    %216 = vector.shape_cast %215 : vector<1x1x32x32xbf16> to vector<32x32xbf16>
    %cst_151 = arith.constant dense<0.000000e+00> : vector<8x32xf32>
    %217 = tpu.matmul %207, %216, %cst_151 {dimension_numbers = #tpu.dot_dimension_numbers<[1], [0], [0], [1], [0, 0, 1, 1], [], []>} : vector<8x32xbf16>, vector<32x32xbf16>, vector<8x32xf32> -> vector<8x32xf32>
    %218 = vector.shape_cast %214 : vector<8x32xf32> to vector<8x1x32xf32>
    %219 = vector.shape_cast %217 : vector<8x32xf32> to vector<1x8x32xf32>
    %220 = vector.broadcast %218 : vector<8x1x32xf32> to vector<8x8x32xf32>
    %221 = vector.broadcast %219 : vector<1x8x32xf32> to vector<8x8x32xf32>
    %222 = arith.addf %220, %221 : vector<8x8x32xf32>
    %cst_152 = arith.constant 0.000000e+00 : f32
    %223 = vector.broadcast %cst_152 : f32 to vector<8x8x32xf32>
    %224 = arith.maximumf %222, %223 : vector<8x8x32xf32>
    %c3_153 = arith.constant 3 : index
    %c0_154 = arith.constant 0 : index
    %c0_155 = arith.constant 0 : index
    %225 = vector.load %arg7[%c3_153, %c0_154, %c0_155] : memref<4x1x32xf32, #tpu.memory_space<vmem>>, vector<1x1x32xf32>
    %226 = vector.shape_cast %225 : vector<1x1x32xf32> to vector<1x32xf32>
    %227 = vector.shape_cast %226 : vector<1x32xf32> to vector<1x1x32xf32>
    %228 = vector.broadcast %227 : vector<1x1x32xf32> to vector<8x8x32xf32>
    %229 = arith.mulf %224, %228 : vector<8x8x32xf32>
    %cst_156 = arith.constant dense<0.000000e+00> : vector<8x8xf32>
    %230 = vector.multi_reduction <add>, %229, %cst_156 [2] : vector<8x8x32xf32> to vector<8x8xf32>
    %c3_157 = arith.constant 3 : index
    %231 = memref.load %arg8[%c3_157] : memref<4xf32, #tpu.memory_space<smem>>
    %232 = vector.broadcast %231 : f32 to vector<8x8xf32>
    %233 = arith.addf %230, %232 : vector<8x8xf32>
    %cst_158 = arith.constant 0.000000e+00 : f32
    %234 = vector.broadcast %cst_158 : f32 to vector<8x8xf32>
    %235 = arith.cmpf ogt, %233, %234 : vector<8x8xf32>
    %cst_159 = arith.constant 0.00999999977 : f32
    %236 = vector.broadcast %cst_159 : f32 to vector<8x8xf32>
    %237 = arith.mulf %236, %233 : vector<8x8xf32>
    %238 = arith.select %235, %233, %237 : vector<8x8xi1>, vector<8x8xf32>
    %239 = arith.mulf %238, %198 : vector<8x8xf32>
    %cst_160 = arith.constant 1.000000e+00 : f32
    %240 = vector.broadcast %cst_160 : f32 to vector<8x8xf32>
    %241 = arith.subf %240, %198 : vector<8x8xf32>
    %cst_161 = arith.constant -1.000000e+30 : f32
    %242 = vector.broadcast %cst_161 : f32 to vector<8x8xf32>
    %243 = arith.mulf %241, %242 : vector<8x8xf32>
    %244 = arith.addf %239, %243 : vector<8x8xf32>
    %cst_162 = arith.constant dense<0xFF800000> : vector<8xf32>
    %245 = vector.multi_reduction <maximumf>, %244, %cst_162 [1] : vector<8x8xf32> to vector<8xf32>
    %246 = vector.shape_cast %245 : vector<8xf32> to vector<8x1xf32>
    %cst_163 = arith.constant dense<0xFF800000> : vector<1xf32>
    %247 = vector.multi_reduction <maximumf>, %246, %cst_163 [0] : vector<8x1xf32> to vector<1xf32>
    %248 = vector.shape_cast %247 : vector<1xf32> to vector<1x1xf32>
    %249 = vector.broadcast %248 : vector<1x1xf32> to vector<8x8xf32>
    %250 = arith.subf %244, %249 : vector<8x8xf32>
    %251 = math.exp %250 : vector<8x8xf32>
    %cst_164 = arith.constant dense<0.000000e+00> : vector<8xf32>
    %252 = vector.multi_reduction <add>, %251, %cst_164 [1] : vector<8x8xf32> to vector<8xf32>
    %253 = vector.shape_cast %252 : vector<8xf32> to vector<8x1xf32>
    %cst_165 = arith.constant dense<0.000000e+00> : vector<1xf32>
    %254 = vector.multi_reduction <add>, %253, %cst_165 [0] : vector<8x1xf32> to vector<1xf32>
    %255 = vector.shape_cast %254 : vector<1xf32> to vector<1x1xf32>
    %256 = tpu.reciprocal %255 {approx = true} : vector<1x1xf32> -> vector<1x1xf32>
    %257 = vector.broadcast %256 : vector<1x1xf32> to vector<8x8xf32>
    %258 = arith.mulf %251, %257 : vector<8x8xf32>
    %259 = arith.truncf %258 : vector<8x8xf32> to vector<8x8xbf16>
    %cst_166 = arith.constant dense<0.000000e+00> : vector<8x32xf32>
    %260 = tpu.matmul %259, %207, %cst_166 {dimension_numbers = #tpu.dot_dimension_numbers<[1], [0], [0], [1], [0, 0, 1, 1], [], []>} : vector<8x8xbf16>, vector<8x32xbf16>, vector<8x32xf32> -> vector<8x32xf32>
    %261 = arith.addf %196, %260 : vector<8x32xf32>
    %cst_167 = arith.constant 0.000000e+00 : f32
    %262 = vector.broadcast %cst_167 : f32 to vector<8x32xf32>
    %263 = arith.maximumf %261, %262 : vector<8x32xf32>
    %c0_168 = arith.constant 0 : index
    %c0_169 = arith.constant 0 : index
    %c0_170 = arith.constant 0 : index
    %264 = vector.load %arg1[%c0_168, %c0_169, %c0_170] : memref<1x8x32xf32, #tpu.memory_space<vmem>>, vector<1x8x32xf32>
    %265 = vector.shape_cast %264 : vector<1x8x32xf32> to vector<8x32xf32>
    %266 = tpu.concatenate %265, %263 in 0 : vector<8x32xf32>, vector<8x32xf32> -> vector<16x32xf32>
    %c0_171 = arith.constant 0 : index
    %c0_172 = arith.constant 0 : index
    %c0_173 = arith.constant 0 : index
    %267 = vector.load %arg4[%c0_171, %c0_172, %c0_173] : memref<1x1x16xf32, #tpu.memory_space<vmem>>, vector<1x1x16xf32>
    %268 = vector.shape_cast %267 : vector<1x1x16xf32> to vector<1x16xf32>
    %269 = arith.truncf %266 : vector<16x32xf32> to vector<16x32xbf16>
    %c0_174 = arith.constant 0 : index
    %c0_175 = arith.constant 0 : index
    %c0_176 = arith.constant 0 : index
    %270 = vector.load %arg9[%c0_174, %c0_175, %c0_176] : memref<5x32x32xbf16, #tpu.memory_space<vmem>>, vector<1x32x32xbf16>
    %271 = vector.shape_cast %270 : vector<1x32x32xbf16> to vector<32x32xbf16>
    %cst_177 = arith.constant dense<0.000000e+00> : vector<16x32xf32>
    %272 = tpu.matmul %269, %271, %cst_177 {dimension_numbers = #tpu.dot_dimension_numbers<[1], [0], [0], [1], [0, 0, 1, 1], [], []>} : vector<16x32xbf16>, vector<32x32xbf16>, vector<16x32xf32> -> vector<16x32xf32>
    %c0_178 = arith.constant 0 : index
    %c0_179 = arith.constant 0 : index
    %c0_180 = arith.constant 0 : index
    %273 = vector.load %arg10[%c0_178, %c0_179, %c0_180] : memref<6x1x32xf32, #tpu.memory_space<vmem>>, vector<1x1x32xf32>
    %274 = vector.shape_cast %273 : vector<1x1x32xf32> to vector<1x32xf32>
    %275 = vector.broadcast %274 : vector<1x32xf32> to vector<16x32xf32>
    %276 = arith.addf %272, %275 : vector<16x32xf32>
    %c1_181 = arith.constant 1 : index
    %c0_182 = arith.constant 0 : index
    %c0_183 = arith.constant 0 : index
    %277 = vector.load %arg9[%c1_181, %c0_182, %c0_183] : memref<5x32x32xbf16, #tpu.memory_space<vmem>>, vector<1x32x32xbf16>
    %278 = vector.shape_cast %277 : vector<1x32x32xbf16> to vector<32x32xbf16>
    %cst_184 = arith.constant dense<0.000000e+00> : vector<16x32xf32>
    %279 = tpu.matmul %269, %278, %cst_184 {dimension_numbers = #tpu.dot_dimension_numbers<[1], [0], [0], [1], [0, 0, 1, 1], [], []>} : vector<16x32xbf16>, vector<32x32xbf16>, vector<16x32xf32> -> vector<16x32xf32>
    %c1_185 = arith.constant 1 : index
    %c0_186 = arith.constant 0 : index
    %c0_187 = arith.constant 0 : index
    %280 = vector.load %arg10[%c1_185, %c0_186, %c0_187] : memref<6x1x32xf32, #tpu.memory_space<vmem>>, vector<1x1x32xf32>
    %281 = vector.shape_cast %280 : vector<1x1x32xf32> to vector<1x32xf32>
    %282 = vector.broadcast %281 : vector<1x32xf32> to vector<16x32xf32>
    %283 = arith.addf %279, %282 : vector<16x32xf32>
    %c2_188 = arith.constant 2 : index
    %c0_189 = arith.constant 0 : index
    %c0_190 = arith.constant 0 : index
    %284 = vector.load %arg9[%c2_188, %c0_189, %c0_190] : memref<5x32x32xbf16, #tpu.memory_space<vmem>>, vector<1x32x32xbf16>
    %285 = vector.shape_cast %284 : vector<1x32x32xbf16> to vector<32x32xbf16>
    %cst_191 = arith.constant dense<0.000000e+00> : vector<16x32xf32>
    %286 = tpu.matmul %269, %285, %cst_191 {dimension_numbers = #tpu.dot_dimension_numbers<[1], [0], [0], [1], [0, 0, 1, 1], [], []>} : vector<16x32xbf16>, vector<32x32xbf16>, vector<16x32xf32> -> vector<16x32xf32>
    %c2_192 = arith.constant 2 : index
    %c0_193 = arith.constant 0 : index
    %c0_194 = arith.constant 0 : index
    %287 = vector.load %arg10[%c2_192, %c0_193, %c0_194] : memref<6x1x32xf32, #tpu.memory_space<vmem>>, vector<1x1x32xf32>
    %288 = vector.shape_cast %287 : vector<1x1x32xf32> to vector<1x32xf32>
    %289 = vector.broadcast %288 : vector<1x32xf32> to vector<16x32xf32>
    %290 = arith.addf %286, %289 : vector<16x32xf32>
    %291 = arith.truncf %276 : vector<16x32xf32> to vector<16x32xbf16>
    %292 = arith.truncf %283 : vector<16x32xf32> to vector<16x32xbf16>
    %cst_195 = arith.constant dense<0.000000e+00> : vector<16x16xf32>
    %293 = tpu.matmul %291, %292, %cst_195 {dimension_numbers = #tpu.dot_dimension_numbers<[1], [1], [0], [0], [0, 0, 1, 0], [], []>} : vector<16x32xbf16>, vector<16x32xbf16>, vector<16x16xf32> -> vector<16x16xf32>
    %cst_196 = arith.constant 0.176776692 : f32
    %294 = vector.broadcast %cst_196 : f32 to vector<16x16xf32>
    %295 = arith.mulf %293, %294 : vector<16x16xf32>
    %cst_197 = arith.constant 1.000000e+00 : f32
    %296 = vector.broadcast %cst_197 : f32 to vector<1x16xf32>
    %297 = arith.subf %296, %268 : vector<1x16xf32>
    %cst_198 = arith.constant -1.000000e+30 : f32
    %298 = vector.broadcast %cst_198 : f32 to vector<1x16xf32>
    %299 = arith.mulf %297, %298 : vector<1x16xf32>
    %300 = vector.broadcast %299 : vector<1x16xf32> to vector<16x16xf32>
    %301 = arith.addf %295, %300 : vector<16x16xf32>
    %cst_199 = arith.constant dense<0xFF800000> : vector<16xf32>
    %302 = vector.multi_reduction <maximumf>, %301, %cst_199 [1] : vector<16x16xf32> to vector<16xf32>
    %303 = vector.shape_cast %302 : vector<16xf32> to vector<16x1xf32>
    %304 = vector.broadcast %303 : vector<16x1xf32> to vector<16x16xf32>
    %305 = arith.subf %301, %304 : vector<16x16xf32>
    %306 = math.exp %305 : vector<16x16xf32>
    %cst_200 = arith.constant dense<0.000000e+00> : vector<16xf32>
    %307 = vector.multi_reduction <add>, %306, %cst_200 [1] : vector<16x16xf32> to vector<16xf32>
    %308 = vector.shape_cast %307 : vector<16xf32> to vector<16x1xf32>
    %309 = tpu.reciprocal %308 {approx = true} : vector<16x1xf32> -> vector<16x1xf32>
    %310 = vector.broadcast %309 : vector<16x1xf32> to vector<16x16xf32>
    %311 = arith.mulf %306, %310 : vector<16x16xf32>
    %312 = arith.truncf %311 : vector<16x16xf32> to vector<16x16xbf16>
    %313 = arith.truncf %290 : vector<16x32xf32> to vector<16x32xbf16>
    %cst_201 = arith.constant dense<0.000000e+00> : vector<16x32xf32>
    %314 = tpu.matmul %312, %313, %cst_201 {dimension_numbers = #tpu.dot_dimension_numbers<[1], [0], [0], [1], [0, 0, 1, 1], [], []>} : vector<16x16xbf16>, vector<16x32xbf16>, vector<16x32xf32> -> vector<16x32xf32>
    %315 = arith.truncf %314 : vector<16x32xf32> to vector<16x32xbf16>
    %c3_202 = arith.constant 3 : index
    %c0_203 = arith.constant 0 : index
    %c0_204 = arith.constant 0 : index
    %316 = vector.load %arg9[%c3_202, %c0_203, %c0_204] : memref<5x32x32xbf16, #tpu.memory_space<vmem>>, vector<1x32x32xbf16>
    %317 = vector.shape_cast %316 : vector<1x32x32xbf16> to vector<32x32xbf16>
    %cst_205 = arith.constant dense<0.000000e+00> : vector<16x32xf32>
    %318 = tpu.matmul %315, %317, %cst_205 {dimension_numbers = #tpu.dot_dimension_numbers<[1], [0], [0], [1], [0, 0, 1, 1], [], []>} : vector<16x32xbf16>, vector<32x32xbf16>, vector<16x32xf32> -> vector<16x32xf32>
    %c3_206 = arith.constant 3 : index
    %c0_207 = arith.constant 0 : index
    %c0_208 = arith.constant 0 : index
    %319 = vector.load %arg10[%c3_206, %c0_207, %c0_208] : memref<6x1x32xf32, #tpu.memory_space<vmem>>, vector<1x1x32xf32>
    %320 = vector.shape_cast %319 : vector<1x1x32xf32> to vector<1x32xf32>
    %321 = vector.broadcast %320 : vector<1x32xf32> to vector<16x32xf32>
    %322 = arith.addf %318, %321 : vector<16x32xf32>
    %323 = arith.addf %266, %322 : vector<16x32xf32>
    %c0_209 = arith.constant 0 : index
    %c0_210 = arith.constant 0 : index
    %c0_211 = arith.constant 0 : index
    %324 = vector.load %arg11[%c0_209, %c0_210, %c0_211] : memref<4x1x32xf32, #tpu.memory_space<vmem>>, vector<1x1x32xf32>
    %325 = vector.shape_cast %324 : vector<1x1x32xf32> to vector<1x32xf32>
    %c1_212 = arith.constant 1 : index
    %c0_213 = arith.constant 0 : index
    %c0_214 = arith.constant 0 : index
    %326 = vector.load %arg11[%c1_212, %c0_213, %c0_214] : memref<4x1x32xf32, #tpu.memory_space<vmem>>, vector<1x1x32xf32>
    %327 = vector.shape_cast %326 : vector<1x1x32xf32> to vector<1x32xf32>
    %cst_215 = arith.constant dense<0.000000e+00> : vector<16xf32>
    %328 = vector.multi_reduction <add>, %323, %cst_215 [1] : vector<16x32xf32> to vector<16xf32>
    %329 = vector.shape_cast %328 : vector<16xf32> to vector<16x1xf32>
    %cst_216 = arith.constant 3.200000e+01 : f32
    %330 = vector.broadcast %cst_216 : f32 to vector<16x1xf32>
    %331 = arith.divf %329, %330 : vector<16x1xf32>
    %332 = vector.broadcast %331 : vector<16x1xf32> to vector<16x32xf32>
    %333 = arith.subf %323, %332 : vector<16x32xf32>
    %334 = arith.mulf %333, %333 : vector<16x32xf32>
    %cst_217 = arith.constant dense<0.000000e+00> : vector<16xf32>
    %335 = vector.multi_reduction <add>, %334, %cst_217 [1] : vector<16x32xf32> to vector<16xf32>
    %336 = vector.shape_cast %335 : vector<16xf32> to vector<16x1xf32>
    %cst_218 = arith.constant 3.200000e+01 : f32
    %337 = vector.broadcast %cst_218 : f32 to vector<16x1xf32>
    %338 = arith.divf %336, %337 : vector<16x1xf32>
    %339 = vector.broadcast %331 : vector<16x1xf32> to vector<16x32xf32>
    %340 = arith.subf %323, %339 : vector<16x32xf32>
    %cst_219 = arith.constant 9.99999996E-13 : f32
    %341 = vector.broadcast %cst_219 : f32 to vector<16x1xf32>
    %342 = arith.addf %338, %341 : vector<16x1xf32>
    %343 = math.rsqrt %342 : vector<16x1xf32>
    %344 = vector.broadcast %343 : vector<16x1xf32> to vector<16x32xf32>
    %345 = arith.mulf %340, %344 : vector<16x32xf32>
    %346 = vector.broadcast %325 : vector<1x32xf32> to vector<16x32xf32>
    %347 = arith.mulf %345, %346 : vector<16x32xf32>
    %348 = vector.broadcast %327 : vector<1x32xf32> to vector<16x32xf32>
    %349 = arith.addf %347, %348 : vector<16x32xf32>
    %350 = arith.truncf %349 : vector<16x32xf32> to vector<16x32xbf16>
    %c0_220 = arith.constant 0 : index
    %c0_221 = arith.constant 0 : index
    %c0_222 = arith.constant 0 : index
    %351 = vector.load %arg12[%c0_220, %c0_221, %c0_222] : memref<2x32x128xbf16, #tpu.memory_space<vmem>>, vector<1x32x128xbf16>
    %352 = vector.shape_cast %351 : vector<1x32x128xbf16> to vector<32x128xbf16>
    %cst_223 = arith.constant dense<0.000000e+00> : vector<16x128xf32>
    %353 = tpu.matmul %350, %352, %cst_223 {dimension_numbers = #tpu.dot_dimension_numbers<[1], [0], [0], [1], [0, 0, 1, 1], [], []>} : vector<16x32xbf16>, vector<32x128xbf16>, vector<16x128xf32> -> vector<16x128xf32>
    %c0_224 = arith.constant 0 : index
    %c0_225 = arith.constant 0 : index
    %c0_226 = arith.constant 0 : index
    %354 = vector.load %arg13[%c0_224, %c0_225, %c0_226] : memref<2x1x128xf32, #tpu.memory_space<vmem>>, vector<1x1x128xf32>
    %355 = vector.shape_cast %354 : vector<1x1x128xf32> to vector<1x128xf32>
    %356 = vector.broadcast %355 : vector<1x128xf32> to vector<16x128xf32>
    %357 = arith.addf %353, %356 : vector<16x128xf32>
    %cst_227 = arith.constant 0.000000e+00 : f32
    %358 = vector.broadcast %cst_227 : f32 to vector<16x128xf32>
    %359 = arith.maximumf %357, %358 : vector<16x128xf32>
    %360 = arith.truncf %359 : vector<16x128xf32> to vector<16x128xbf16>
    %c0_228 = arith.constant 0 : index
    %c0_229 = arith.constant 0 : index
    %361 = vector.load %arg14[%c0_228, %c0_229] : memref<128x32xbf16, #tpu.memory_space<vmem>>, vector<128x32xbf16>
    %cst_230 = arith.constant dense<0.000000e+00> : vector<16x32xf32>
    %362 = tpu.matmul %360, %361, %cst_230 {dimension_numbers = #tpu.dot_dimension_numbers<[1], [0], [0], [1], [0, 0, 1, 1], [], []>} : vector<16x128xbf16>, vector<128x32xbf16>, vector<16x32xf32> -> vector<16x32xf32>
    %c5 = arith.constant 5 : index
    %c0_231 = arith.constant 0 : index
    %c0_232 = arith.constant 0 : index
    %363 = vector.load %arg10[%c5, %c0_231, %c0_232] : memref<6x1x32xf32, #tpu.memory_space<vmem>>, vector<1x1x32xf32>
    %364 = vector.shape_cast %363 : vector<1x1x32xf32> to vector<1x32xf32>
    %365 = vector.broadcast %364 : vector<1x32xf32> to vector<16x32xf32>
    %366 = arith.addf %362, %365 : vector<16x32xf32>
    %367 = arith.addf %349, %366 : vector<16x32xf32>
    %c2_233 = arith.constant 2 : index
    %c0_234 = arith.constant 0 : index
    %c0_235 = arith.constant 0 : index
    %368 = vector.load %arg11[%c2_233, %c0_234, %c0_235] : memref<4x1x32xf32, #tpu.memory_space<vmem>>, vector<1x1x32xf32>
    %369 = vector.shape_cast %368 : vector<1x1x32xf32> to vector<1x32xf32>
    %c3_236 = arith.constant 3 : index
    %c0_237 = arith.constant 0 : index
    %c0_238 = arith.constant 0 : index
    %370 = vector.load %arg11[%c3_236, %c0_237, %c0_238] : memref<4x1x32xf32, #tpu.memory_space<vmem>>, vector<1x1x32xf32>
    %371 = vector.shape_cast %370 : vector<1x1x32xf32> to vector<1x32xf32>
    %cst_239 = arith.constant dense<0.000000e+00> : vector<16xf32>
    %372 = vector.multi_reduction <add>, %367, %cst_239 [1] : vector<16x32xf32> to vector<16xf32>
    %373 = vector.shape_cast %372 : vector<16xf32> to vector<16x1xf32>
    %cst_240 = arith.constant 3.200000e+01 : f32
    %374 = vector.broadcast %cst_240 : f32 to vector<16x1xf32>
    %375 = arith.divf %373, %374 : vector<16x1xf32>
    %376 = vector.broadcast %375 : vector<16x1xf32> to vector<16x32xf32>
    %377 = arith.subf %367, %376 : vector<16x32xf32>
    %378 = arith.mulf %377, %377 : vector<16x32xf32>
    %cst_241 = arith.constant dense<0.000000e+00> : vector<16xf32>
    %379 = vector.multi_reduction <add>, %378, %cst_241 [1] : vector<16x32xf32> to vector<16xf32>
    %380 = vector.shape_cast %379 : vector<16xf32> to vector<16x1xf32>
    %cst_242 = arith.constant 3.200000e+01 : f32
    %381 = vector.broadcast %cst_242 : f32 to vector<16x1xf32>
    %382 = arith.divf %380, %381 : vector<16x1xf32>
    %383 = vector.broadcast %375 : vector<16x1xf32> to vector<16x32xf32>
    %384 = arith.subf %367, %383 : vector<16x32xf32>
    %cst_243 = arith.constant 9.99999996E-13 : f32
    %385 = vector.broadcast %cst_243 : f32 to vector<16x1xf32>
    %386 = arith.addf %382, %385 : vector<16x1xf32>
    %387 = math.rsqrt %386 : vector<16x1xf32>
    %388 = vector.broadcast %387 : vector<16x1xf32> to vector<16x32xf32>
    %389 = arith.mulf %384, %388 : vector<16x32xf32>
    %390 = vector.broadcast %369 : vector<1x32xf32> to vector<16x32xf32>
    %391 = arith.mulf %389, %390 : vector<16x32xf32>
    %392 = vector.broadcast %371 : vector<1x32xf32> to vector<16x32xf32>
    %393 = arith.addf %391, %392 : vector<16x32xf32>
    %394 = vector.extract_strided_slice %393 {offsets = [0, 0], sizes = [1, 32], strides = [1, 1]} : vector<16x32xf32> to vector<1x32xf32>
    %395 = arith.truncf %394 : vector<1x32xf32> to vector<1x32xbf16>
    %c4 = arith.constant 4 : index
    %c0_244 = arith.constant 0 : index
    %c0_245 = arith.constant 0 : index
    %396 = vector.load %arg9[%c4, %c0_244, %c0_245] : memref<5x32x32xbf16, #tpu.memory_space<vmem>>, vector<1x32x32xbf16>
    %397 = vector.shape_cast %396 : vector<1x32x32xbf16> to vector<32x32xbf16>
    %cst_246 = arith.constant dense<0.000000e+00> : vector<1x32xf32>
    %398 = tpu.matmul %395, %397, %cst_246 {dimension_numbers = #tpu.dot_dimension_numbers<[1], [0], [0], [1], [0, 0, 1, 1], [], []>} : vector<1x32xbf16>, vector<32x32xbf16>, vector<1x32xf32> -> vector<1x32xf32>
    %c4_247 = arith.constant 4 : index
    %c0_248 = arith.constant 0 : index
    %c0_249 = arith.constant 0 : index
    %399 = vector.load %arg10[%c4_247, %c0_248, %c0_249] : memref<6x1x32xf32, #tpu.memory_space<vmem>>, vector<1x1x32xf32>
    %400 = vector.shape_cast %399 : vector<1x1x32xf32> to vector<1x32xf32>
    %401 = arith.addf %398, %400 : vector<1x32xf32>
    %402 = math.tanh %401 : vector<1x32xf32>
    %403 = arith.truncf %402 : vector<1x32xf32> to vector<1x32xbf16>
    %c1_250 = arith.constant 1 : index
    %c0_251 = arith.constant 0 : index
    %c0_252 = arith.constant 0 : index
    %404 = vector.load %arg12[%c1_250, %c0_251, %c0_252] : memref<2x32x128xbf16, #tpu.memory_space<vmem>>, vector<1x32x128xbf16>
    %405 = vector.shape_cast %404 : vector<1x32x128xbf16> to vector<32x128xbf16>
    %cst_253 = arith.constant dense<0.000000e+00> : vector<1x128xf32>
    %406 = tpu.matmul %403, %405, %cst_253 {dimension_numbers = #tpu.dot_dimension_numbers<[1], [0], [0], [1], [0, 0, 1, 1], [], []>} : vector<1x32xbf16>, vector<32x128xbf16>, vector<1x128xf32> -> vector<1x128xf32>
    %c1_254 = arith.constant 1 : index
    %c0_255 = arith.constant 0 : index
    %c0_256 = arith.constant 0 : index
    %407 = vector.load %arg13[%c1_254, %c0_255, %c0_256] : memref<2x1x128xf32, #tpu.memory_space<vmem>>, vector<1x1x128xf32>
    %408 = vector.shape_cast %407 : vector<1x1x128xf32> to vector<1x128xf32>
    %409 = arith.addf %406, %408 : vector<1x128xf32>
    %cst_257 = arith.constant dense<0xFF800000> : vector<1xf32>
    %410 = vector.multi_reduction <maximumf>, %409, %cst_257 [1] : vector<1x128xf32> to vector<1xf32>
    %411 = vector.shape_cast %410 : vector<1xf32> to vector<1x1xf32>
    %412 = vector.broadcast %411 : vector<1x1xf32> to vector<1x128xf32>
    %413 = arith.subf %409, %412 : vector<1x128xf32>
    %414 = math.exp %413 : vector<1x128xf32>
    %cst_258 = arith.constant dense<0.000000e+00> : vector<1xf32>
    %415 = vector.multi_reduction <add>, %414, %cst_258 [1] : vector<1x128xf32> to vector<1xf32>
    %416 = vector.shape_cast %415 : vector<1xf32> to vector<1x1xf32>
    %417 = vector.broadcast %416 : vector<1x1xf32> to vector<1x128xf32>
    %418 = arith.divf %414, %417 : vector<1x128xf32>
    %c0_259 = arith.constant 0 : index
    %c0_260 = arith.constant 0 : index
    %c0_261 = arith.constant 0 : index
    %419 = vector.load %arg15[%c0_259, %c0_260, %c0_261] : memref<1x1x128xf32, #tpu.memory_space<vmem>>, vector<1x1x128xf32>
    %420 = vector.shape_cast %419 : vector<1x1x128xf32> to vector<1x128xf32>
    %421 = vector.shape_cast %418 : vector<1x128xf32> to vector<1x1x128xf32>
    tpu.vector_store %arg15[%c0_259, %c0_260, %c0_261], %421 {strides = array<i32>} : memref<1x1x128xf32, #tpu.memory_space<vmem>>, vector<1x1x128xf32>,
    return
  }
  func.func @transform_0(%arg0: i32) -> (i32, i32, i32) {
    %c0_i32 = arith.constant 0 : i32
    %c0_i32_0 = arith.constant 0 : i32
    %c0_i32_1 = arith.constant 0 : i32
    return %arg0, %c0_i32, %c0_i32_0 : i32, i32, i32
  }
  func.func @transform_1(%arg0: i32) -> (i32, i32, i32) {
    %c0_i32 = arith.constant 0 : i32
    %c0_i32_0 = arith.constant 0 : i32
    %c0_i32_1 = arith.constant 0 : i32
    return %arg0, %c0_i32, %c0_i32_0 : i32, i32, i32
  }
  func.func @transform_2(%arg0: i32) -> (i32, i32, i32, i32) {
    %c0_i32 = arith.constant 0 : i32
    %c0_i32_0 = arith.constant 0 : i32
    %c0_i32_1 = arith.constant 0 : i32
    %c0_i32_2 = arith.constant 0 : i32
    return %arg0, %c0_i32, %c0_i32_0, %c0_i32_1 : i32, i32, i32, i32
  }
  func.func @transform_3(%arg0: i32) -> (i32, i32, i32) {
    %c0_i32 = arith.constant 0 : i32
    %c0_i32_0 = arith.constant 0 : i32
    %c0_i32_1 = arith.constant 0 : i32
    return %arg0, %c0_i32, %c0_i32_0 : i32, i32, i32
  }
  func.func @transform_4(%arg0: i32) -> (i32, i32, i32, i32) {
    %c0_i32 = arith.constant 0 : i32
    %c0_i32_0 = arith.constant 0 : i32
    %c0_i32_1 = arith.constant 0 : i32
    %c0_i32_2 = arith.constant 0 : i32
    %c0_i32_3 = arith.constant 0 : i32
    return %c0_i32, %c0_i32_0, %c0_i32_1, %c0_i32_2 : i32, i32, i32, i32
  }
  func.func @transform_5(%arg0: i32) -> (i32, i32, i32, i32) {
    %c0_i32 = arith.constant 0 : i32
    %c0_i32_0 = arith.constant 0 : i32
    %c0_i32_1 = arith.constant 0 : i32
    %c0_i32_2 = arith.constant 0 : i32
    %c0_i32_3 = arith.constant 0 : i32
    return %c0_i32, %c0_i32_0, %c0_i32_1, %c0_i32_2 : i32, i32, i32, i32
  }
  func.func @transform_6(%arg0: i32) -> (i32, i32, i32) {
    %c0_i32 = arith.constant 0 : i32
    %c0_i32_0 = arith.constant 0 : i32
    %c0_i32_1 = arith.constant 0 : i32
    %c0_i32_2 = arith.constant 0 : i32
    return %c0_i32, %c0_i32_0, %c0_i32_1 : i32, i32, i32
  }
  func.func @transform_7(%arg0: i32) -> i32 {
    %c0_i32 = arith.constant 0 : i32
    %c0_i32_0 = arith.constant 0 : i32
    return %c0_i32 : i32
  }
  func.func @transform_8(%arg0: i32) -> (i32, i32, i32) {
    %c0_i32 = arith.constant 0 : i32
    %c0_i32_0 = arith.constant 0 : i32
    %c0_i32_1 = arith.constant 0 : i32
    %c0_i32_2 = arith.constant 0 : i32
    return %c0_i32, %c0_i32_0, %c0_i32_1 : i32, i32, i32
  }
  func.func @transform_9(%arg0: i32) -> (i32, i32, i32) {
    %c0_i32 = arith.constant 0 : i32
    %c0_i32_0 = arith.constant 0 : i32
    %c0_i32_1 = arith.constant 0 : i32
    %c0_i32_2 = arith.constant 0 : i32
    return %c0_i32, %c0_i32_0, %c0_i32_1 : i32, i32, i32
  }
  func.func @transform_10(%arg0: i32) -> (i32, i32, i32) {
    %c0_i32 = arith.constant 0 : i32
    %c0_i32_0 = arith.constant 0 : i32
    %c0_i32_1 = arith.constant 0 : i32
    %c0_i32_2 = arith.constant 0 : i32
    return %c0_i32, %c0_i32_0, %c0_i32_1 : i32, i32, i32
  }
  func.func @transform_11(%arg0: i32) -> (i32, i32, i32) {
    %c0_i32 = arith.constant 0 : i32
    %c0_i32_0 = arith.constant 0 : i32
    %c0_i32_1 = arith.constant 0 : i32
    %c0_i32_2 = arith.constant 0 : i32
    return %c0_i32, %c0_i32_0, %c0_i32_1 : i32, i32, i32
  }
  func.func @transform_12(%arg0: i32) -> (i32, i32, i32) {
    %c0_i32 = arith.constant 0 : i32
    %c0_i32_0 = arith.constant 0 : i32
    %c0_i32_1 = arith.constant 0 : i32
    %c0_i32_2 = arith.constant 0 : i32
    return %c0_i32, %c0_i32_0, %c0_i32_1 : i32, i32, i32
  }
  func.func @transform_13(%arg0: i32) -> (i32, i32) {
    %c0_i32 = arith.constant 0 : i32
    %c0_i32_0 = arith.constant 0 : i32
    %c0_i32_1 = arith.constant 0 : i32
    return %c0_i32, %c0_i32_0 : i32, i32
  }
  func.func @transform_14(%arg0: i32) -> (i32, i32, i32) {
    %c0_i32 = arith.constant 0 : i32
    %c0_i32_0 = arith.constant 0 : i32
    %c0_i32_1 = arith.constant 0 : i32
    return %arg0, %c0_i32, %c0_i32_0 : i32, i32, i32
  }
}

</mosaic_0001>

<bundles_post_ra>
// kernel: spatial_rank_forward.1
= control target key start
LH: loop header
LB: loop body
LE: loop exit
PB: predicated region body
PF: predicated region fallthrough
CT: control target
= control target key end

     0   :  { %s6770_s0 = inlined_call_operand.vmem [shape: f32[2,8,32], index: 0, kind: input, shape index: {}]   ;;  %s6771_s1 = inlined_call_operand.vmem [shape: f32[2,8,32], index: 1, kind: input, shape index: {}]   ;;  %s6772_s2 = inlined_call_operand.vmem [shape: f32[2,2,8,8], index: 2, kind: input, shape index: {}]   ;;  %s6773_s3 = inlined_call_operand.vmem [shape: f32[2,1,16], index: 3, kind: input, shape index: {}]   ;;  %s6774_s4 = inlined_call_operand.vmem [shape: bf16[4,3,32,32], index: 4, kind: input, shape index: {}]   ;;  %s6775_s5 = inlined_call_operand.vmem [shape: f32[4,2,1,32], index: 5, kind: input, shape index: {}]   ;;  %s6776_s6 = inlined_call_operand.vmem [shape: f32[4,1,32], index: 6, kind: input, shape index: {}]   ;;  %s6777_s7 = inlined_call_operand.vmem [shape: f32[4], index: 7, kind: input, shape index: {}]   ;;  %s6778_s8 = inlined_call_operand.vmem [shape: bf16[5,32,32], index: 8, kind: input, shape index: {}]   ;;  %s6779_s9 = inlined_call_operand.vmem [shape: f32[6,1,32], index: 9, kind: input, shape index: {}]   ;;  %s6780_s10 = inlined_call_operand.vmem [shape: f32[4,1,32], index: 10, kind: input, shape index: {}]   ;;  %s6781_s11 = inlined_call_operand.vmem [shape: bf16[2,32,128], index: 11, kind: input, shape index: {}]   ;;  %s6782_s12 = inlined_call_operand.vmem [shape: f32[2,1,128], index: 12, kind: input, shape index: {}]   ;;  %s6783_s13 = inlined_call_operand.vmem [shape: bf16[128,32], index: 13, kind: input, shape index: {}]   ;;  %s6784_s14 = inlined_call_operand.hbm [shape: f32[2,1,128], index: 14, kind: output, shape index: {}]  }
   0x1   :  { %6796 = sst [smem:[#allocation16_spill]] %s6770_s0 }
   0x2   :  { %6797 = sst [smem:[#allocation17_spill]] %s6771_s1 }
   0x3   :  { %6798 = sst [smem:[#allocation18_spill]] %s6772_s2 }
   0x4   :  { %6799 = sst [smem:[#allocation19_spill]] %s6777_s7 }
   0x5   :  { %19 = vsyncpa [#allocation4], 0 }
   0x6   :  { %20 = vsyncpa [#allocation3], 0 }
   0x7   :  { %22 = vsyncpa [#allocation3 + $0x1], 0  ;;  %s5439_s29 = smov 0   ;;  %s5441_s30 = smov 0  }
   0x8   :  { %s5443_s15 = smov 0   ;;  %s5445_s16 = smov 0  }
   0x9 LB: > { %s5460_s17 = sadd.s32 4294967295, %s5356_s16   ;;  %s4593_s18 = sadd.s32 4294967294, %s5356_s16   ;;  %s5356_s16 = sphi %s5445_s16, %s6828_s16   ;;  %s5352_s15 = sphi %s5443_s15, %s6827_s15   ;;  %s5348_s30 = sphi %s5441_s30, %s6826_s30   ;;  %s5344_s29 = sphi %s5439_s29, %s6825_s29  }
   0xa   : > { %s5464_s19 = sadd.s32 1, %s5356_s16   ;;  %s349_s20 = sadd.s32 1, %s5352_s15 }
   0xb   : > { %s346_s21 = ssub.s32 %s5356_s16, %s5464_s19  ;;  %p359_p0 = scmp.ne.s32.totalorder %s5352_s15, %s5348_s30 }
   0xc   : > { %p347_p1 = scmp.eq.s32.totalorder %s346_s21, 0  ;;  %p360_p2 = scmp.eq.s32.totalorder %s5460_s17, 1 }
   0xd   : > { %p365_p3 = scmp.ne.s32.totalorder %s5348_s30, %s5344_s29  ;;  %p366_p4 = scmp.eq.s32.totalorder %s4593_s18, 1 }
   0xe   : > { %s5475_s22 = scalar_select %p347_p1, %s5352_s15, %s349_s20  }
   0xf   : > { %p5477_p5 = por %p360_p2, %p359_p0  ;;  %p5481_p6 = por %p366_p4, %p365_p3 }
  0x10   : > { %p4594_p7 = scmp.ge.s32.totalorder %s5356_s16, 1  ;;  %p373_p8 = scmp.lt.s32.totalorder %s5356_s16, 3 }
  0x11   : > { %p5095_p9 = scmp.eq.s32.totalorder %s5460_s17, 0  ;;  %s6803_s7 = sld [smem:[#allocation19_spill]] }
  0x12   : > { %p5488_p10 = pnand %p4594_p7, %p373_p8 }
  0x14   : > { %p5087_p11 = pneg %p5488_p10 }
  0x16   : > { %p5088_p12 = pnand %p5095_p9, %p5087_p11 }
  0x17   : > { %s395_s28 = sshll.u32 %s6803_s7, 4  ;;  %s396_s28 = int_to_ptr.vmem [resolvable:$true] %s395_s28 }
  0x18   : > { %s5275_s18 = scalar_lea.vmem %s396_s28, 16  ;;  %p5277_p0 = pneg %p5088_p12 }
  0x19   : > { %p5276_p13 = scmp.ne.s32.totalorder %s396_s28, %s5275_s18  ;;  %p5283_p3 = scmp.lt.s32.totalorder %s396_s28, %s396_s28 }
  0x1a   : > { %p5284_p4 = scmp.lt.s32.totalorder %s5275_s18, %s5275_s18 }
  0x1b   : > { %p5278_p1 = pnand %p5277_p0, %p5276_p13 }
  0x1c   : > { %p5285_p7 = por %p5284_p4, %p5283_p3 }
  0x1d   : > { %p5279_p2 = pneg %p5278_p1 }
  0x1f   : > { %p5286_p8 = pnand %p5285_p7, %p5279_p2 }
  0x21   : > { %5289 = shalt.err (!%p5286_p8)
}
  0x22   : > { %s5358_s20 = smov [#allocation2]   ;;  %454 = sbr.rel (%p5488_p10) target bundleno = 6859 (0x1acb), region = 76 }
  0x23   : > { %5090 = dma.vmem_to_smem (!%p5088_p12), %s396_s28, 16, %s5358_s20, [#allocation4]  }
  0x29   : > { %5335 = dma.done.wait (%p5095_p9), [#allocation4], 16  }
  0x2a   : > { %5337 = vsyncadd (%p5095_p9), [#allocation4], 4294967280 }
  0x2b   : > { %460 = sfence }
  0x2c   : > { %v5137_v0 = vld [vmem:[%s6774_s4] sm:$0xff]   ;;  %v6786_v1 = vmov 0.0   ;;  %v5138_v2 = vld [vmem:[%s6774_s4 + $0x8] sm:$0xff]   ;;  %vm5360_vm0 = vmmov 0   ;;  %p511_p9 = scmp.lt.s32.totalorder %s5460_s17, 1  ;;  %v5139_v3 = vld [vmem:[%s6774_s4 + $0x10] sm:$0xff]   ;;  %v729_v9 = vlaneseq }
  0x2d   : > { %4865 = vmatprep.subr.bf16.mxu0 %v6786_v1  ;;  %4873 = vmatprep.subr.bf16.mxu1 %v6786_v1  ;;  %s6804_s1 = sld [smem:[#allocation17_spill]]  ;;  %vm554_vm1 = vcmask 261120   ;;  %v5140_v5 = vld [vmem:[%s6774_s4 + $0x20] sm:$0xff]   ;;  %v5141_v7 = vld [vmem:[%s6774_s4 + $0x18] sm:$0xff]   ;;  %v5142_v8 = vld [vmem:[%s6774_s4 + $0x28] sm:$0xff]   ;;  %s6805_s2 = sld [smem:[#allocation18_spill]] }
  0x2e   : > { %4866 = vmatpush3.bf16.msra.mxu0 %v5137_v0  ;;  %4869 = vmatprep.mubr.msk.bf16.mxu0 %vm5360_vm0, %v6786_v1  ;;  %s5523_s20 = scalar_select %p511_p9, %s5460_s17, 1  ;;  %v5558_v11 = vshrl.u32 %v729_v9, 7  ;;  %v1084_v12 = vand.u32 127, %v729_v9  ;;  %v4603_v55 = vld [vmem:[%s6775_s5] ss:$0 sm:$0xff]  ;;  %v5144_v63 = vld [vmem:[%s6774_s4 + $0x68] sm:$0xff]  }
  0x2f   : > { %4867 = vmatprep.subr.bf16.mxu0 %v6786_v1  ;;  %4877 = vmatprep.mubr.msk.bf16.mxu1 %vm5360_vm0, %v6786_v1  ;;  %v5143_v60 = vld [vmem:[%s6774_s4 + $0x60] sm:$0xff]   ;;  %v5145_v0 = vld [vmem:[%s6774_s4 + $0x70] sm:$0xff]   ;;  %vm2071_vm2 = vcmask 1043456   ;;  %s4710_s18 = sld [smem:[#allocation2 + $0x3]]  ;;  %s6824_s0 = sld [smem:[#allocation16_spill]] }
  0x30   : > { %4874 = vmatpush3.bf16.msra.mxu1 %v5139_v3  ;;  %s6785_s21 = sshll.u32 %s5523_s20, 3  ;;  %s4786_s28 = sshll.u32 %s5523_s20, 4  ;;  %v5561_v14 = vsub.s32 0, %v5558_v11  ;;  %v913_v15 = vsub.s32 1, %v5558_v11  ;;  %v5565_v16 = vsub.s32 %v1084_v12, %v5558_v11  ;;  %v920_v17 = vsub.s32 2, %v5558_v11  ;;  %v5147_v3 = vld [vmem:[%s6774_s4 + $0x78] sm:$0xff]  }
  0x31   : > { %4875 = vmatprep.subr.bf16.mxu1 %v6786_v1  ;;  %v927_v22 = vsub.s32 3, %v5558_v11  ;;  %v934_v24 = vsub.s32 4, %v5558_v11  ;;  %v5573_v27 = vsub.s32 5, %v5558_v11  ;;  %v5577_v30 = vsub.s32 6, %v5558_v11 }
  0x32   : > { %4868 = vmatpush3.bf16.msra.mxu0 %v5138_v2  ;;  %v5581_v33 = vsub.s32 7, %v5558_v11  ;;  %v5146_v2 = vld [vmem:[%s6774_s4 + $0x80] sm:$0xff]  }
  0x33   : > { %s518_s27 = scalar_lea.vmem %s6804_s1, %s6785_s21  ;;  %4881 = vmatprep.subr.bf16.mxu0 %v6786_v1  ;;  %s5555_s7 = scalar_lea.vmem %s6805_s2, %s4786_s28 }
  0x34   : > { %v528_v4 = vld [vmem:[%s518_s27] sm:$0xff]  ;;  %4876 = vmatpush3.bf16.msra.mxu1 %v5141_v7  ;;  %v4624_v10 = vld [vmem:[%s5555_s7 + $0x8] sm:$0xff]  ;;  %s869_s1 = sld [smem:[#allocation2]]  ;;  %s4682_s28 = sld [smem:[#allocation2 + $0x1]] }
  0x35   : > { %v5536_v6 = vpack.c.bf16 %v528_v4, %v528_v4  ;;  %4889 = vmatprep.subr.bf16.mxu1 %v6786_v1  ;;  %v1710_v13 = vsub.f32 1.0, %v4624_v10  ;;  %v1648_v18 = vrot.slane %v4624_v10, %v913_v15  ;;  %v1641_v19 = vrot.slane %v4624_v10, %v5561_v14  ;;  %v5586_v38 = vld [vmem:[%s5555_s7] sm:$0xff]  ;;  %v5148_v4 = vld [vmem:[%s6774_s4 + $0x88] sm:$0xff]   ;;  %s4652_s7 = sld [smem:[#allocation2 + $0x2]]  ;;  %s509_s27 = sand.u32 1, %s5348_s30  }
  0x36   : > { %v1655_v21 = vrot.slane %v4624_v10, %v920_v17  ;;  %v1662_v25 = vrot.slane %v4624_v10, %v927_v22  ;;  %v1669_v26 = vrot.slane %v4624_v10, %v934_v24  ;;  %v1676_v29 = vrot.slane %v4624_v10, %v5573_v27 }
  0x37   : > { %4870 = vmatmul.mubr.msk.bf16.vlgmr.msra.gmra.mrb[0].mxu0 %vm554_vm1, %v5536_v6  ;;  %v1711_v20 = vmul.f32 -1e+30, %v1710_v13  ;;  %1650 = vbcast.lane.b32.xlu1 %v1648_v18, 256  ;;  %v1683_v32 = vrot.slane %v4624_v10, %v5577_v30  ;;  %v1690_v35 = vrot.slane %v4624_v10, %v5581_v33  ;;  %v907_v40 = vrot.slane %v5586_v38, %v5561_v14 }
  0x38   : > { %4882 = vmatpush3.bf16.msra.mxu0 %v5140_v5  ;;  %4885 = vmatprep.mubr.msk.bf16.mxu0 %vm5360_vm0, %v6786_v1  ;;  %v976_v41 = vsub.f32 1.0, %v5586_v38  ;;  %v921_v43 = vrot.slane %v5586_v38, %v920_v17  ;;  %v914_v45 = vrot.slane %v5586_v38, %v913_v15  ;;  %v928_v47 = vrot.slane %v5586_v38, %v927_v22 }
  0x39   : > { %4883 = vmatprep.subr.bf16.mxu0 %v6786_v1  ;;  %1643 = vbcast.lane.b32.xlu0 %v1641_v19, 256  ;;  %v1716_v23 = vrot.slane %v1711_v20, %v5561_v14  ;;  %v1723_v28 = vrot.slane %v1711_v20, %v913_v15  ;;  %v1730_v31 = vrot.slane %v1711_v20, %v920_v17  ;;  %v5361_v5 = vmov 1966171168  }
  0x3a   : > { %v1737_v34 = vrot.slane %v1711_v20, %v927_v22  ;;  %v1744_v36 = vrot.slane %v1711_v20, %v934_v24  ;;  %v1758_v37 = vrot.slane %v1711_v20, %v5577_v30  ;;  %v1751_v39 = vrot.slane %v1711_v20, %v5573_v27 }
  0x3b   : > { %1657 = vbcast.lane.b32.xlu1 %v1655_v21, 256  ;;  %v1765_v42 = vrot.slane %v1711_v20, %v5581_v33  ;;  %v5594_v44 = vmul.f32 -1e+30, %v976_v41  ;;  %v935_v48 = vrot.slane %v5586_v38, %v934_v24  ;;  %v942_v50 = vrot.slane %v5586_v38, %v5573_v27 }
  0x3c   : > { %4884 = vmatpush3.bf16.msra.mxu0 %v5142_v8  ;;  %v949_v52 = vrot.slane %v5586_v38, %v5577_v30  ;;  %v4612_v8 = vld [vmem:[%s6775_s5 + $0x1] ss:$0 sm:$0xff] }
  0x3d   : > { %4897 = vmatprep.subr.bf16.mxu0 %v6786_v1  ;;  %1718 = vbcast.lane.b32.xlu0 %v1716_v23, 256  ;;  %v982_v46 = vrot.slane %v5594_v44, %v5561_v14  ;;  %v989_v49 = vrot.slane %v5594_v44, %v913_v15  ;;  %v996_v51 = vrot.slane %v5594_v44, %v920_v17 }
  0x3e   : > { %v1003_v53 = vrot.slane %v5594_v44, %v927_v22  ;;  %v1010_v54 = vrot.slane %v5594_v44, %v934_v24 }
  0x3f   : > { %1664 = vbcast.lane.b32.xlu1 %v1662_v25, 256 }
  0x41   : > { %1671 = vbcast.lane.b32.xlu0 %v1669_v26, 256 }
  0x43   : > { %1725 = vbcast.lane.b32.xlu1 %v1723_v28, 256 }
  0x45   : > { %1678 = vbcast.lane.b32.xlu0 %v1676_v29, 256 }
  0x47   : > { %1732 = vbcast.lane.b32.xlu1 %v1730_v31, 256 }
  0x49   : > { %1685 = vbcast.lane.b32.xlu0 %v1683_v32, 256 }
  0x4b   : > { %1739 = vbcast.lane.b32.xlu1 %v1737_v34, 256 }
  0x4d   : > { %1692 = vbcast.lane.b32.xlu0 %v1690_v35, 256 }
  0x4f   : > { %1746 = vbcast.lane.b32.xlu1 %v1744_v36, 256 }
  0x51   : > { %1760 = vbcast.lane.b32.xlu0 %v1758_v37, 256 }
  0x53   : > { %1753 = vbcast.lane.b32.xlu1 %v1751_v39, 256 }
  0x55   : > { %909 = vbcast.lane.b32.xlu0 %v907_v40, 256 }
  0x57   : > { %1767 = vbcast.lane.b32.xlu1 %v1765_v42, 256 }
  0x59   : > { %923 = vbcast.lane.b32.xlu0 %v921_v43, 256 }
  0x5b   : > { %916 = vbcast.lane.b32.xlu1 %v914_v45, 256 }
  0x5d   : > { %984 = vbcast.lane.b32.xlu0 %v982_v46, 256 }
  0x5f   : > { %930 = vbcast.lane.b32.xlu1 %v928_v47, 256 }
  0x61   : > { %937 = vbcast.lane.b32.xlu0 %v935_v48, 256 }
  0x63   : > { %991 = vbcast.lane.b32.xlu1 %v989_v49, 256 }
  0x65   : > { %944 = vbcast.lane.b32.xlu0 %v942_v50, 256  ;;  %v4623_v50 = vld [vmem:[%s6776_s6] ss:$0 sm:$0xff] }
  0x67   : > { %998 = vbcast.lane.b32.xlu1 %v996_v51, 256 }
  0x69   : > { %951 = vbcast.lane.b32.xlu0 %v949_v52, 256 }
  0x6b   : > { %1005 = vbcast.lane.b32.xlu1 %v1003_v53, 256 }
  0x6f   : > { %1012 = vbcast.lane.b32.xlu1 %v1010_v54, 256 }
 0x10a   : > { %v592_v56 = vpop.f32.mrb[0].mxu0 }
 0x10b   : > { %v593_v57 = vadd.f32 %v4603_v55, %v592_v56  ;;  %v4871_v58 = vpop.f32.mrb[1].mxu0 }
 0x10c   : > { %v595_v59 = vpop.f32.mrb[2].mxu0 }
 0x10d   : > { %v5615_v61 = vpack.c.bf16 %v593_v57, %v593_v57  ;;  %v4872_v62 = vpop.f32.mrb[3].mxu0 }
 0x10f   : > { %4878 = vmatmul.mubr.msk.bf16.vlgmr.msra.gmra.mrb[0].mxu1 %vm554_vm1, %v5615_v61  ;;  %4886 = vmatmul.mubr.msk.bf16.vlgmr.msra.gmra.mrb[4].mxu0 %vm554_vm1, %v5615_v61 }
 0x110   : > { %4890 = vmatpush3.bf16.msra.mxu1 %v5143_v60  ;;  %4893 = vmatprep.mubr.msk.bf16.mxu1 %vm5360_vm0, %v6786_v1 }
 0x111   : > { %4891 = vmatprep.subr.bf16.mxu1 %v6786_v1  ;;  %4901 = vmatprep.mubr.msk.bf16.mxu0 %vm5360_vm0, %v6786_v1 }
 0x112   : > { %4898 = vmatpush3.bf16.msra.mxu0 %v5145_v0 }
 0x113   : > { %4899 = vmatprep.subr.bf16.mxu0 %v6786_v1 }
 0x114   : > { %4892 = vmatpush3.bf16.msra.mxu1 %v5144_v63 }
 0x115   : > { %4905 = vmatprep.subr.bf16.mxu1 %v6786_v1 }
 0x116   : > { %4900 = vmatpush3.bf16.msra.mxu0 %v5147_v3 }
 0x117   : > { %4894 = vmatmul.mubr.msk.bf16.vlgmr.msra.gmra.mrb[4].mxu1 %vm554_vm1, %v5536_v6  ;;  %4913 = vmatprep.subr.bf16.mxu0 %v6786_v1  ;;  %v727_v6 = vunpack.c.l.s4 %v5361_v5 }
 0x118   : > { %4909 = vmatprep.mubr.msk.bf16.mxu1 %vm5360_vm0, %v6786_v1  ;;  %4906 = vmatpush3.bf16.msra.mxu1 %v5146_v2 }
 0x119   : > { %4907 = vmatprep.subr.bf16.mxu1 %v6786_v1  ;;  %v728_v7 = vunpack.c.0.s8 %v727_v6 }
 0x11b   : > { %v5654_v9 = vsub.s32 %v728_v7, %v5558_v11  ;;  %v4630_v11 = vld [vmem:[%s6775_s5 + $0x4] ss:$0 sm:$0xff] }
 0x11c   : > { %4908 = vmatpush3.bf16.msra.mxu1 %v5148_v4 }
 0x11d   : > { %4925 = vmatprep.subr.bf16.mxu1 %v6786_v1 }
 0x1e2   : > { %v661_v10 = vpop.f32.mrb[0].mxu1  ;;  %v5656_v12 = vpop.f32.mrb[4].mxu0 }
 0x1e3   : > { %v662_v13 = vadd.f32 %v4612_v8, %v661_v10  ;;  %v4879_v15 = vpop.f32.mrb[1].mxu1  ;;  %v4887_v17 = vpop.f32.mrb[5].mxu0 }
 0x1e4   : > { %v664_v18 = vpop.f32.mrb[2].mxu1  ;;  %v721_v19 = vpop.f32.mrb[6].mxu0 }
 0x1e5   : > { %v725_v20 = vcombine.high %v662_v13, %v662_v13  ;;  %v732_v21 = vrot.slane %v662_v13, %v5654_v9  ;;  %v4880_v22 = vpop.f32.mrb[3].mxu1  ;;  %v4888_v23 = vpop.f32.mrb[7].mxu0 }
 0x1e7   : > { %v739_v24 = vrot.slane %v725_v20, %v5654_v9  ;;  %v740_v25 = vcombine.high %v732_v21, %v732_v21  ;;  %v748_v26 = vrot.slane %v732_v21, %v5654_v9 }
 0x1e9   : > { %v741_v28 = vcombine.high %v739_v24, %v739_v24  ;;  %v755_v29 = vrot.slane %v739_v24, %v5654_v9  ;;  %v762_v31 = vrot.slane %v740_v25, %v5654_v9  ;;  %v770_v32 = vcombine.high %v748_v26, %v748_v26 }
 0x1ea   : > { %v777_v34 = vrot.slane %v748_v26, %v5561_v14  ;;  %v1325_v35 = vpop.f32.mrb[4].mxu1 }
 0x1eb   : > { %v769_v36 = vrot.slane %v741_v28, %v5654_v9  ;;  %v771_v37 = vcombine.high %v755_v29, %v755_v29  ;;  %v772_v39 = vcombine.high %v762_v31, %v762_v31  ;;  %v1326_v40 = vadd.f32 %v4630_v11, %v1325_v35  ;;  %v4895_v41 = vpop.f32.mrb[5].mxu1 }
 0x1ec   : > { %v1328_v42 = vpop.f32.mrb[6].mxu1  ;;  %v814_v43 = vadd.f32 %v777_v34, %v5656_v12  ;;  %v781_v45 = vrot.slane %v762_v31, %v5561_v14  ;;  %v785_v46 = vrot.slane %v770_v32, %v5561_v14  ;;  %v793_v47 = vrot.slane %v755_v29, %v5561_v14  ;;  %v5702_v32 = vpop.permute.xlu1 %1650 }
 0x1ed   : > { %v1331_v48 = vpack.c.bf16 %v1326_v40, %v1326_v40  ;;  %v4896_v49 = vpop.f32.mrb[7].mxu1  ;;  %v789_v51 = vrot.slane %v772_v39, %v5561_v14  ;;  %v797_v52 = vrot.slane %v769_v36, %v5561_v14  ;;  %v801_v53 = vrot.slane %v771_v37, %v5561_v14 }
 0x1ee   : > { %v822_v54 = vmax.f32 %v814_v43, 0.0  ;;  %v815_v55 = vadd.f32 %v781_v45, %v5656_v12  ;;  %v816_v56 = vadd.f32 %v785_v46, %v5656_v12  ;;  %v818_v57 = vadd.f32 %v793_v47, %v5656_v12  ;;  %v4639_v43 = vld [vmem:[%s6775_s5 + $0x5] ss:$0 sm:$0xff]  ;;  %v5723_v45 = vpop.permute.xlu0 %1643 }
 0x1ef   : > { %4902 = vmatmul.mubr.msk.bf16.vlgmr.msra.gmra.mrb[8].mxu0 %vm554_vm1, %v1331_v48  ;;  %4910 = vmatmul.mubr.msk.bf16.vlgmr.msra.gmra.mrb[8].mxu1 %vm554_vm1, %v1331_v48  ;;  %v2072_v58 = vsel %vm2071_vm2, %v1331_v48, 0  ;;  %v817_v59 = vadd.f32 %v789_v51, %v5656_v12  ;;  %v819_v60 = vadd.f32 %v797_v52, %v5656_v12  ;;  %v820_v62 = vadd.f32 %v801_v53, %v5656_v12 }
 0x1f0   : > { %4914 = vmatpush3.bf16.msra.mxu0 %v2072_v58  ;;  %v837_v63 = vmul.f32 %v4623_v50, %v822_v54  ;;  %v823_v0 = vmax.f32 %v815_v55, 0.0  ;;  %v824_v2 = vmax.f32 %v816_v56, 0.0  ;;  %4915 = vmatprep.mubr.msk.bf16.mxu0 %vm5360_vm0, %v6786_v1  ;;  %v773_v4 = vcombine.high %v769_v36, %v769_v36  ;;  %v5704_v34 = vpop.permute.xlu1 %1657 }
 0x1f1   : > { %v825_v3 = vmax.f32 %v817_v59, 0.0  ;;  %4919 = vmatprep.subr.bf16.mxu0 %v6786_v1  ;;  %4929 = vmatprep.mubr.msk.bf16.mxu1 %vm5360_vm0, %v6786_v1  ;;  %v826_v8 = vmax.f32 %v818_v57, 0.0  ;;  %v827_v17 = vmax.f32 %v819_v60, 0.0  ;;  %v828_v21 = vmax.f32 %v820_v62, 0.0 }
 0x1f2   : > { %v845_v5 = vsel %vm554_vm1, %v837_v63, 0.0  ;;  %v838_v6 = vmul.f32 %v4623_v50, %v823_v0  ;;  %v839_v7 = vmul.f32 %v4623_v50, %v824_v2  ;;  %v805_v10 = vrot.slane %v773_v4, %v5561_v14 }
 0x1f3   : > { %846 = vadd.xlane.f32.xlu0 %v845_v5  ;;  %v840_v15 = vmul.f32 %v4623_v50, %v825_v3  ;;  %v841_v20 = vmul.f32 %v4623_v50, %v826_v8  ;;  %v842_v23 = vmul.f32 %v4623_v50, %v827_v17  ;;  %v843_v26 = vmul.f32 %v4623_v50, %v828_v21  ;;  %v5732_v3 = vpop.permute.xlu0 %1718 }
 0x1f4   : > { %v848_v13 = vsel %vm554_vm1, %v838_v6, 0.0  ;;  %v821_v18 = vadd.f32 %v805_v10, %v5656_v12  ;;  %v851_v19 = vsel %vm554_vm1, %v839_v7, 0.0  ;;  %v5362_v31 = vmov 0   ;;  %v5706_v35 = vpop.permute.xlu1 %1664 }
 0x1f5   : > { %849 = vadd.xlane.f32.xlu1 %v848_v13  ;;  %v854_v22 = vsel %vm554_vm1, %v840_v15, 0.0  ;;  %v857_v25 = vsel %vm554_vm1, %v841_v20, 0.0  ;;  %v860_v11 = vsel %vm554_vm1, %v842_v23, 0.0  ;;  %v863_v12 = vsel %vm554_vm1, %v843_v26, 0.0  ;;  %5136 = vset.pattern.permute.xlu0 %v5362_v31 }
 0x1f6   : > { %v829_v24 = vmax.f32 %v821_v18, 0.0  ;;  %5135 = vset.pattern.permute.xlu1 %v5362_v31  ;;  %v5744_v18 = vld [vmem:[%s6776_s6 + $0x2] ss:$0 sm:$0xff] }
 0x1f7   : > { %852 = vadd.xlane.f32.xlu0 %v851_v19  ;;  %v5749_v31 = vpop.permute.xlu0 %1671 }
 0x1f8   : > { %v844_v28 = vmul.f32 %v4623_v50, %v829_v24  ;;  %v5708_v36 = vpop.permute.xlu1 %1725 }
 0x1f9   : > { %855 = vadd.xlane.f32.xlu1 %v854_v22 }
 0x1fa   : > { %v866_v29 = vsel %vm554_vm1, %v844_v28, 0.0 }
 0x1fb   : > { %858 = vadd.xlane.f32.xlu0 %v857_v25 }
 0x1fc   : > { %v5710_v37 = vpop.permute.xlu1 %1732 }
 0x1fd   : > { %861 = vadd.xlane.f32.xlu1 %v860_v11 }
 0x1ff   : > { %864 = vadd.xlane.f32.xlu0 %v863_v12 }
 0x200   : > { %v5712_v39 = vpop.permute.xlu1 %1739 }
 0x201   : > { %867 = vadd.xlane.f32.xlu1 %v866_v29 }
 0x204   : > { %v5714_v40 = vpop.permute.xlu1 %1746 }
 0x208   : > { %v5716_v41 = vpop.permute.xlu1 %1753 }
 0x20c   : > { %v5718_v42 = vpop.permute.xlu1 %1767 }
 0x210   : > { %v5725_v46 = vpop.permute.xlu1 %916 }
 0x214   : > { %v5735_v5 = vpop.permute.xlu1 %930 }
 0x2c2   : > { %v1394_v47 = vpop.f32.mrb[8].mxu0  ;;  %v1451_v48 = vpop.f32.mrb[8].mxu1 }
 0x2c3   : > { %v1395_v49 = vadd.f32 %v4639_v43, %v1394_v47  ;;  %v4903_v50 = vpop.f32.mrb[9].mxu0  ;;  %v4911_v51 = vpop.f32.mrb[9].mxu1 }
 0x2c4   : > { %v1397_v52 = vpop.f32.mrb[10].mxu0  ;;  %v1454_v53 = vpop.f32.mrb[10].mxu1 }
 0x2c5   : > { %v1458_v54 = vcombine.high %v1395_v49, %v1395_v49  ;;  %v1465_v55 = vrot.slane %v1395_v49, %v5654_v9  ;;  %v4904_v56 = vpop.f32.mrb[11].mxu0  ;;  %v4912_v57 = vpop.f32.mrb[11].mxu1 }
 0x2c6   : > { %v5753_v50 = vpop.permute.xlu1 %991 }
 0x2c7   : > { %v1472_v58 = vrot.slane %v1458_v54, %v5654_v9  ;;  %v1473_v59 = vcombine.high %v1465_v55, %v1465_v55  ;;  %v1481_v60 = vrot.slane %v1465_v55, %v5654_v9 }
 0x2c9   : > { %v1474_v62 = vcombine.high %v1472_v58, %v1472_v58  ;;  %v1488_v63 = vrot.slane %v1472_v58, %v5654_v9  ;;  %v1495_v0 = vrot.slane %v1473_v59, %v5654_v9  ;;  %v1503_v2 = vcombine.high %v1481_v60, %v1481_v60 }
 0x2ca   : > { %v1510_v4 = vrot.slane %v1481_v60, %v5561_v14  ;;  %v5760_v60 = vpop.permute.xlu0 %1678 }
 0x2cb   : > { %v1502_v6 = vrot.slane %v1474_v62, %v5654_v9  ;;  %v1504_v7 = vcombine.high %v1488_v63, %v1488_v63  ;;  %v1505_v8 = vcombine.high %v1495_v0, %v1495_v0  ;;  %v1518_v10 = vrot.slane %v1503_v2, %v5561_v14  ;;  %v5764_v2 = vpop.permute.xlu1 %998 }
 0x2cc   : > { %v1547_v13 = vadd.f32 %v1510_v4, %v1451_v48  ;;  %v1514_v15 = vrot.slane %v1495_v0, %v5561_v14  ;;  %v1526_v17 = vrot.slane %v1488_v63, %v5561_v14 }
 0x2cd   : > { %v1549_v19 = vadd.f32 %v1518_v10, %v1451_v48  ;;  %v1522_v20 = vrot.slane %v1505_v8, %v5561_v14  ;;  %v1530_v21 = vrot.slane %v1502_v6, %v5561_v14  ;;  %v1534_v22 = vrot.slane %v1504_v7, %v5561_v14 }
 0x2ce   : > { %v1555_v23 = vmax.f32 %v1547_v13, 0.0  ;;  %v1548_v24 = vadd.f32 %v1514_v15, %v1451_v48  ;;  %v1551_v25 = vadd.f32 %v1526_v17, %v1451_v48  ;;  %v1506_v26 = vcombine.high %v1502_v6, %v1502_v6  ;;  %v5771_v10 = vpop.permute.xlu0 %1685 }
 0x2cf   : > { %v1557_v11 = vmax.f32 %v1549_v19, 0.0  ;;  %v1550_v28 = vadd.f32 %v1522_v20, %v1451_v48  ;;  %v1552_v12 = vadd.f32 %v1530_v21, %v1451_v48  ;;  %v1553_v29 = vadd.f32 %v1534_v22, %v1451_v48  ;;  %v5773_v13 = vpop.permute.xlu1 %1005 }
 0x2d0   : > { %v1571_v43 = vmul.f32 %v5744_v18, %v1555_v23  ;;  %v1556_v47 = vmax.f32 %v1548_v24, 0.0  ;;  %v1538_v49 = vrot.slane %v1506_v26, %v5561_v14  ;;  %v1559_v55 = vmax.f32 %v1551_v25, 0.0  ;;  %6806 = vst [vmem:[#allocation8_spill] sm:$0xff] %v5773_v13 }
 0x2d1   : > { %v1573_v51 = vmul.f32 %v5744_v18, %v1557_v11  ;;  %v1558_v52 = vmax.f32 %v1550_v28, 0.0  ;;  %v1560_v59 = vmax.f32 %v1552_v12, 0.0  ;;  %v1561_v0 = vmax.f32 %v1553_v29, 0.0 }
 0x2d2   : > { %v1579_v53 = vsel %vm554_vm1, %v1571_v43, 0.0  ;;  %v1572_v54 = vmul.f32 %v5744_v18, %v1556_v47  ;;  %v1554_v56 = vadd.f32 %v1538_v49, %v1451_v48  ;;  %v1575_v63 = vmul.f32 %v5744_v18, %v1559_v55  ;;  %v5776_v17 = vpop.permute.xlu0 %1692 }
 0x2d3   : > { %1580 = vadd.xlane.f32.xlu0 %v1579_v53  ;;  %v1585_v57 = vsel %vm554_vm1, %v1573_v51, 0.0  ;;  %v1574_v58 = vmul.f32 %v5744_v18, %v1558_v52  ;;  %v1576_v48 = vmul.f32 %v5744_v18, %v1560_v59  ;;  %v1577_v7 = vmul.f32 %v5744_v18, %v1561_v0  ;;  %v5778_v19 = vpop.permute.xlu1 %1012 }
 0x2d4   : > { %1586 = vadd.xlane.f32.xlu1 %v1585_v57  ;;  %v1582_v62 = vsel %vm554_vm1, %v1572_v54, 0.0  ;;  %v1591_v6 = vsel %vm554_vm1, %v1575_v63, 0.0  ;;  %6807 = vst [vmem:[#allocation9_spill] sm:$0xff] %v5778_v19  ;;  %v1017_v22 = vrot.slane %v5594_v44, %v5573_v27  ;;  %v5784_v23 = vstv %s869_s1  ;;  %s6823_s1 = sshll.u32 %s5523_s20, 3 }
 0x2d5   : > { %v1588_v4 = vsel %vm554_vm1, %v1574_v58, 0.0  ;;  %v1594_v8 = vsel %vm554_vm1, %v1576_v48, 0.0  ;;  %v1597_v15 = vsel %vm554_vm1, %v1577_v7, 0.0  ;;  %v956_v11 = vrot.slane %v5586_v38, %v5581_v33  ;;  %s514_s26 = scalar_lea.vmem %s6824_s0, %s6823_s1  ;;  %s526_s1 = scalar_lea.vmem %s6773_s3, %s5523_s20 }
 0x2d6   : > { %v5780_v20 = vpop.permute.xlu0 %1760  ;;  %v1024_v29 = vrot.slane %v5594_v44, %v5577_v30  ;;  %v1562_v51 = vmax.f32 %v1554_v56, 0.0  ;;  %v1031_v59 = vrot.slane %v5594_v44, %v5581_v33  ;;  %v5826_v33 = vstv %s4652_s7 }
 0x2d7   : > { %1583 = vadd.xlane.f32.xlu0 %v1582_v62  ;;  %v850_v21 = vpop.xlane.xlu1 %849 }
 0x2d8   : > { %1589 = vadd.xlane.f32.xlu1 %v1588_v4  ;;  %v872_v24 = vadd.f32 %v5784_v23, %v850_v21  ;;  %v1578_v53 = vmul.f32 %v5744_v18, %v1562_v51 }
 0x2da   : > { %v5787_v25 = vpop.permute.xlu0 %909  ;;  %v888_v26 = vmul.f32 0.01, %v872_v24  ;;  %vm880_vm3 = vcmp.gt.f32.partialorder %v872_v24, 0.0  ;;  %v1600_v30 = vsel %vm554_vm1, %v1578_v53, 0.0 }
 0x2db   : > { %1592 = vadd.xlane.f32.xlu0 %v1591_v6  ;;  %v5818_v63 = vpop.xlane.xlu1 %855 }
 0x2dc   : > { %1595 = vadd.xlane.f32.xlu1 %v1594_v8  ;;  %v896_v12 = vsel %vm880_vm3, %v872_v24, %v888_v26 }
 0x2dd   : > { %v969_v27 = vmul.f32 %v5725_v46, %v896_v12 }
 0x2de   : > { %v5791_v28 = vpop.permute.xlu0 %923 }
 0x2df   : > { %1598 = vadd.xlane.f32.xlu0 %v1597_v15  ;;  %v5799_v47 = vadd.f32 %v5753_v50, %v969_v27  ;;  %v5820_v4 = vpop.xlane.xlu1 %861 }
 0x2e2   : > { %v5796_v43 = vpop.permute.xlu0 %984 }
 0x2e3   : > { %v5824_v6 = vpop.xlane.xlu1 %867 }
 0x2e6   : > { %v5802_v49 = vpop.permute.xlu0 %937 }
 0x2ea   : > { %v5804_v38 = vpop.permute.xlu0 %944 }
 0x2eb   : > { %6808 = vst [vmem:[#allocation10_spill] sm:$0xff] %v5804_v38 }
 0x2ed   : > { %1019 = vbcast.lane.b32.xlu1 %v1017_v22, 256 }
 0x2ee   : > { %v5806_v52 = vpop.permute.xlu0 %951 }
 0x2ef   : > { %6809 = vst [vmem:[#allocation11_spill] sm:$0xff] %v5806_v52 }
 0x2f2   : > { %v847_v54 = vpop.xlane.xlu0 %846 }
 0x2f3   : > { %v871_v55 = vadd.f32 %v5784_v23, %v847_v54 }
 0x2f5   : > { %958 = vbcast.lane.b32.xlu0 %v956_v11, 256  ;;  %v887_v57 = vmul.f32 0.01, %v871_v55  ;;  %vm879_vm4 = vcmp.gt.f32.partialorder %v871_v55, 0.0 }
 0x2f6   : > { %v853_v18 = vpop.xlane.xlu0 %852 }
 0x2f7   : > { %v895_v58 = vsel %vm879_vm4, %v871_v55, %v887_v57 }
 0x2f8   : > { %v968_v62 = vmul.f32 %v5787_v25, %v895_v58 }
 0x2f9   : > { %1026 = vbcast.lane.b32.xlu0 %v1024_v29, 256 }
 0x2fa   : > { %v5815_v56 = vadd.f32 %v5796_v43, %v968_v62  ;;  %v859_v0 = vpop.xlane.xlu0 %858 }
 0x2fd   : > { %1063 = vperm.xlu0 %5136, %v5799_v47  }
 0x2fe   : > { %v5822_v48 = vpop.xlane.xlu0 %864 }
 0x311   : > { %1601 = vadd.xlane.f32.xlu1 %v1600_v30 }
 0x322   : > { %1033 = vbcast.lane.b32.xlu1 %v1031_v59, 256 }
 0x326   : > { %1060 = vperm.xlu1 %5135, %v5815_v56  }
 0x360   : > { %v1581_v44 = vpop.xlane.xlu0 %1580 }
 0x361   : > { %v1605_v7 = vadd.f32 %v5826_v33, %v1581_v44  ;;  %v1587_v8 = vpop.xlane.xlu1 %1586 }
 0x362   : > { %v1607_v15 = vadd.f32 %v5826_v33, %v1587_v8 }
 0x363   : > { %vm1613_vm5 = vcmp.gt.f32.partialorder %v1605_v7, 0.0  ;;  %v1621_v21 = vmul.f32 0.01, %v1605_v7 }
 0x364   : > { %v1584_v22 = vpop.xlane.xlu0 %1583  ;;  %v1623_v26 = vmul.f32 0.01, %v1607_v15  ;;  %vm1615_vm6 = vcmp.gt.f32.partialorder %v1607_v15, 0.0 }
 0x365   : > { %v1629_v24 = vsel %vm1613_vm5, %v1605_v7, %v1621_v21  ;;  %v1606_v11 = vadd.f32 %v5826_v33, %v1584_v22  ;;  %v1590_v12 = vpop.xlane.xlu1 %1589 }
 0x366   : > { %v1608_v29 = vadd.f32 %v5826_v33, %v1590_v12  ;;  %v1702_v27 = vmul.f32 %v5723_v45, %v1629_v24  ;;  %v1631_v55 = vsel %vm1615_vm6, %v1607_v15, %v1623_v26  ;;  %vm1119_vm6 = vcmask 1042434  }
 0x367   : > { %vm1614_vm7 = vcmp.gt.f32.partialorder %v1606_v11, 0.0  ;;  %v1622_v51 = vmul.f32 0.01, %v1606_v11  ;;  %v1704_v26 = vmul.f32 %v5704_v34, %v1631_v55 }
 0x368   : > { %vm1616_vm8 = vcmp.gt.f32.partialorder %v1608_v29, 0.0  ;;  %v1624_v53 = vmul.f32 0.01, %v1608_v29  ;;  %v1593_v30 = vpop.xlane.xlu0 %1592  ;;  %v5834_v54 = vadd.f32 %v5732_v3, %v1702_v27 }
 0x369   : > { %v1630_v57 = vsel %vm1614_vm7, %v1606_v11, %v1622_v51  ;;  %v1609_v58 = vadd.f32 %v5826_v33, %v1593_v30  ;;  %v1596_v59 = vpop.xlane.xlu1 %1595  ;;  %v873_v11 = vadd.f32 %v5784_v23, %v853_v18  ;;  %vm1117_vm7 = vcmask 1041409  }
 0x36a   : > { %v1632_v62 = vsel %vm1616_vm8, %v1608_v29, %v1624_v53  ;;  %1794 = vperm.xlu0 %5136, %v5834_v54   ;;  %v1610_v44 = vadd.f32 %v5826_v33, %v1596_v59  ;;  %v1703_v7 = vmul.f32 %v5702_v32, %v1630_v57  ;;  %v5854_v57 = vadd.f32 %v5710_v37, %v1704_v26 }
 0x36b   : > { %vm1617_vm9 = vcmp.gt.f32.partialorder %v1609_v58, 0.0  ;;  %v1625_v8 = vmul.f32 0.01, %v1609_v58  ;;  %v1705_v21 = vmul.f32 %v5706_v35, %v1632_v62  ;;  %v889_v55 = vmul.f32 0.01, %v873_v11 }
 0x36c   : > { %vm1618_vm10 = vcmp.gt.f32.partialorder %v1610_v44, 0.0  ;;  %v1626_v22 = vmul.f32 0.01, %v1610_v44  ;;  %v1599_v24 = vpop.xlane.xlu0 %1598  ;;  %v5842_v15 = vadd.f32 %v5708_v36, %v1703_v7  ;;  %vm881_vm12 = vcmp.gt.f32.partialorder %v873_v11, 0.0 }
 0x36d   : > { %v1633_v12 = vsel %vm1617_vm9, %v1609_v58, %v1625_v8  ;;  %v1611_v29 = vadd.f32 %v5826_v33, %v1599_v24  ;;  %v5848_v27 = vadd.f32 %v5712_v39, %v1705_v21  ;;  %v875_v58 = vadd.f32 %v5784_v23, %v859_v0 }
 0x36e   : > { %v1634_v51 = vsel %vm1618_vm10, %v1610_v44, %v1626_v22  ;;  %1797 = vperm.xlu1 %5135, %v5842_v15   ;;  %v1706_v18 = vmul.f32 %v5749_v31, %v1633_v12  ;;  %v897_v8 = vsel %vm881_vm12, %v873_v11, %v889_v55  ;;  %v877_v0 = vadd.f32 %v5784_v23, %v5822_v48 }
 0x36f   : > { %vm1619_vm11 = vcmp.gt.f32.partialorder %v1611_v29, 0.0  ;;  %v1627_v53 = vmul.f32 0.01, %v1611_v29  ;;  %1803 = vperm.xlu0 %5136, %v5848_v27   ;;  %v1707_v30 = vmul.f32 %v5760_v60, %v1634_v51  ;;  %v891_v21 = vmul.f32 0.01, %v875_v58 }
 0x370   : > { %v5864_v44 = vadd.f32 %v5714_v40, %v1706_v18  ;;  %vm883_vm13 = vcmp.gt.f32.partialorder %v875_v58, 0.0  ;;  %v970_v24 = vmul.f32 %v5791_v28, %v897_v8  ;;  %v893_v12 = vmul.f32 0.01, %v877_v0 }
 0x371   : > { %v1635_v59 = vsel %vm1619_vm11, %v1611_v29, %v1627_v53  ;;  %v5859_v62 = vadd.f32 %v5716_v41, %v1707_v30  ;;  %v899_v26 = vsel %vm883_vm13, %v875_v58, %v891_v21  ;;  %v5875_v29 = vpop.permute.xlu0 %958  ;;  %vm885_vm14 = vcmp.gt.f32.partialorder %v877_v0, 0.0  ;;  %v5893_v58 = vpop.permute.xlu1 %1019 }
 0x372   : > { %1800 = vperm.xlu1 %5135, %v5854_v57   ;;  %v1708_v7 = vmul.f32 %v5771_v10, %v1635_v59  ;;  %6810 = vst [vmem:[#allocation12_spill] sm:$0xff] %v5875_v29  ;;  %v5878_v11 = vadd.f32 %v5764_v2, %v970_v24  ;;  %v972_v51 = vmul.f32 %v5802_v49, %v899_v26  ;;  %6812 = vst [vmem:[#allocation14_spill] sm:$0xff] %v5893_v58  ;;  %vm1121_vm8 = vcmask 1043459  }
 0x373   : > { %1809 = vperm.xlu0 %5136, %v5859_v62   ;;  %v901_v48 = vsel %vm885_vm14, %v877_v0, %v893_v12  ;;  %v874_v59 = vadd.f32 %v5784_v23, %v5818_v63  ;;  %v876_v0 = vadd.f32 %v5784_v23, %v5820_v4  ;;  %vm1123_vm9 = vcmask 1044484  }
 0x374   : > { %v5871_v22 = vadd.f32 %v5780_v20, %v1708_v7  ;;  %v5883_v53 = vadd.f32 %v5778_v19, %v972_v51  ;;  %v974_v18 = vmul.f32 %v5806_v52, %v901_v48  ;;  %vm1125_vm10 = vcmask 1045509  }
 0x375   : > { %v5885_v30 = vpop.permute.xlu0 %1026  ;;  %v890_v8 = vmul.f32 0.01, %v874_v59  ;;  %vm882_vm15 = vcmp.gt.f32.partialorder %v874_v59, 0.0  ;;  %v892_v48 = vmul.f32 0.01, %v876_v0  ;;  %vm884_vm4 = vcmp.gt.f32.partialorder %v876_v0, 0.0 }
 0x376   : > { %1806 = vperm.xlu1 %5135, %v5864_v44   ;;  %6811 = vst [vmem:[#allocation13_spill] sm:$0xff] %v5885_v30  ;;  %v5890_v55 = vadd.f32 %v5885_v30, %v974_v18  ;;  %vm1127_vm11 = vcmask 1046534   ;;  %vm1129_vm12 = vcmask 1047559   ;;  %vm1132_vm13 = vcmask 64512  }
 0x377   : > { %v898_v26 = vsel %vm882_vm15, %v874_v59, %v890_v8 }
 0x378   : > { %v971_v63 = vmul.f32 %v5735_v5, %v898_v26 }
 0x37a   : > { %1812 = vperm.xlu1 %5135, %v5871_v22   ;;  %v5909_v4 = vadd.f32 %v5773_v13, %v971_v63 }
 0x37e   : > { %1066 = vperm.xlu1 %5135, %v5878_v11  }
 0x382   : > { %1072 = vperm.xlu1 %5135, %v5883_v53  }
 0x386   : > { %1078 = vperm.xlu1 %5135, %v5890_v55  }
 0x39e   : > { %v1602_v7 = vpop.xlane.xlu1 %1601 }
 0x39f   : > { %v1612_v21 = vadd.f32 %v5826_v33, %v1602_v7  ;;  %v878_v33 = vadd.f32 %v5784_v23, %v5824_v6  ;;  %v900_v7 = vsel %vm884_vm4, %v876_v0, %v892_v48  ;;  %v1064_v48 = vpop.permute.xlu0 %1063 }
 0x3a0   : > { %v973_v8 = vmul.f32 %v5804_v38, %v900_v7 }
 0x3a1   : > { %vm1620_vm3 = vcmp.gt.f32.partialorder %v1612_v21, 0.0  ;;  %v1628_v24 = vmul.f32 0.01, %v1612_v21  ;;  %v894_v59 = vmul.f32 0.01, %v878_v33  ;;  %vm886_vm5 = vcmp.gt.f32.partialorder %v878_v33, 0.0 }
 0x3a2   : > { %v5916_v26 = vpop.permute.xlu1 %1033 }
 0x3a3   : > { %v1636_v12 = vsel %vm1620_vm3, %v1612_v21, %v1628_v24  ;;  %v5914_v21 = vadd.f32 %v5893_v58, %v973_v8  ;;  %v902_v24 = vsel %vm886_vm5, %v878_v33, %v894_v59  ;;  %6813 = vst [vmem:[#allocation15_spill] sm:$0xff] %v5916_v26 }
 0x3a4   : > { %v1709_v51 = vmul.f32 %v5776_v17, %v1636_v12  ;;  %v975_v23 = vmul.f32 %v5875_v29, %v902_v24 }
 0x3a6   : > { %v5902_v18 = vadd.f32 %v5718_v42, %v1709_v51  ;;  %v5921_v6 = vadd.f32 %v5916_v26, %v975_v23  ;;  %v1061_v0 = vpop.permute.xlu1 %1060 }
 0x3a8   : > { %1815 = vperm.xlu0 %5136, %v5902_v18  }
 0x3ac   : > { %1069 = vperm.xlu0 %5136, %v5909_v4  }
 0x3b0   : > { %1075 = vperm.xlu0 %5136, %v5914_v21  }
 0x3b4   : > { %1081 = vperm.xlu0 %5136, %v5921_v6  }
 0x3e9   : > { %v1795_v7 = vpop.permute.xlu0 %1794 }
 0x3ea   : > { %v1820_v24 = vrot.slane %v1795_v7, %v5565_v16 }
 0x3ed   : > { %v1798_v12 = vpop.permute.xlu1 %1797 }
 0x3ee   : > { %v1824_v8 = vrot.slane %v1798_v12, %v5565_v16  ;;  %v1804_v33 = vpop.permute.xlu0 %1803 }
 0x3ef   : > { %v1832_v29 = vrot.slane %v1804_v33, %v5565_v16 }
 0x3f0   : > { %v1849_v23 = vsel %vm1117_vm7, %v1824_v8, %v1820_v24 }
 0x3f1   : > { %v1801_v51 = vpop.permute.xlu1 %1800 }
 0x3f2   : > { %v1828_v59 = vrot.slane %v1801_v51, %v5565_v16  ;;  %v1810_v58 = vpop.permute.xlu0 %1809 }
 0x3f3   : > { %v1840_v52 = vrot.slane %v1810_v58, %v5565_v16 }
 0x3f4   : > { %v1850_v26 = vsel %vm1119_vm6, %v1828_v59, %v1849_v23  ;;  %v1088_v59 = vrot.slane %v1061_v0, %v5565_v16 }
 0x3f5   : > { %v1807_v63 = vpop.permute.xlu1 %1806  ;;  %v1851_v12 = vsel %vm1121_vm8, %v1832_v29, %v1850_v26 }
 0x3f6   : > { %v1836_v30 = vrot.slane %v1807_v63, %v5565_v16 }
 0x3f8   : > { %v1852_v51 = vsel %vm1123_vm9, %v1836_v30, %v1851_v12  ;;  %v1092_v30 = vrot.slane %v1064_v48, %v5565_v16 }
 0x3f9   : > { %v1813_v1 = vpop.permute.xlu1 %1812  ;;  %v1853_v33 = vsel %vm1125_vm10, %v1840_v52, %v1852_v51 }
 0x3fa   : > { %v1844_v7 = vrot.slane %v1813_v1, %v5565_v16  ;;  %v1118_v12 = vsel %vm1117_vm7, %v1092_v30, %v1088_v59 }
 0x3fc   : > { %v1854_v26 = vsel %vm1127_vm11, %v1844_v7, %v1853_v33 }
 0x3fd   : > { %v1067_v19 = vpop.permute.xlu1 %1066 }
 0x3fe   : > { %v1096_v29 = vrot.slane %v1067_v19, %v5565_v16 }
 0x401   : > { %v1073_v1 = vpop.permute.xlu1 %1072 }
 0x402   : > { %v1104_v19 = vrot.slane %v1073_v1, %v5565_v16 }
 0x405   : > { %v1079_v7 = vpop.permute.xlu1 %1078 }
 0x427   : > { %v1816_v8 = vpop.permute.xlu0 %1815 }
 0x428   : > { %v1848_v63 = vrot.slane %v1816_v8, %v5565_v16  ;;  %v1120_v8 = vsel %vm1119_vm6, %v1096_v29, %v1118_v12 }
 0x42a   : > { %v1855_v24 = vsel %vm1129_vm12, %v1848_v63, %v1854_v26  ;;  %v1112_v26 = vrot.slane %v1079_v7, %v5565_v16 }
 0x42b   : > { %v1070_v58 = vpop.permute.xlu0 %1069  ;;  %v1857_v23 = vsel %vm1132_vm13, %v1855_v24, -inf }
 0x42c   : > { %v1100_v0 = vrot.slane %v1070_v58, %v5565_v16  ;;  %1858 = vmax.xlane.f32.xlu1 %v1857_v23 }
 0x42e   : > { %v1122_v52 = vsel %vm1121_vm8, %v1100_v0, %v1120_v8 }
 0x42f   : > { %v1076_v51 = vpop.permute.xlu0 %1075  ;;  %v1124_v63 = vsel %vm1123_vm9, %v1104_v19, %v1122_v52 }
 0x430   : > { %v1108_v48 = vrot.slane %v1076_v51, %v5565_v16 }
 0x432   : > { %v1126_v33 = vsel %vm1125_vm10, %v1108_v48, %v1124_v63 }
 0x433   : > { %v1082_v59 = vpop.permute.xlu0 %1081  ;;  %v1128_v24 = vsel %vm1127_vm11, %v1112_v26, %v1126_v33 }
 0x434   : > { %v1116_v30 = vrot.slane %v1082_v59, %v5565_v16 }
 0x436   : > { %v1130_v29 = vsel %vm1129_vm12, %v1116_v30, %v1128_v24 }
 0x437   : > { %v1133_v58 = vsel %vm1132_vm13, %v1130_v29, -inf }
 0x438   : > { %1134 = vmax.xlane.f32.xlu0 %v1133_v58 }
 0x4b9   : > { %v1859_v1 = vpop.xlane.xlu1 %1858 }
 0x4ba   : > { %v1860_v23 = vrot.slane %v1859_v1, 4 }
 0x4bc   : > { %v1861_v12 = vmax.f32 %v1859_v1, %v1860_v23 }
 0x4be   : > { %v1862_v0 = vrot.slane %v1861_v12, 2 }
 0x4c0   : > { %v1863_v52 = vmax.f32 %v1861_v12, %v1862_v0 }
 0x4c2   : > { %v1864_v48 = vrot.slane %v1863_v52, 1 }
 0x4c4   : > { %v1865_v38 = vmax.f32 %v1863_v52, %v1864_v48 }
 0x4c5   : > { %v1135_v8 = vpop.xlane.xlu0 %1134 }
 0x4c6   : > { %v1136_v19 = vrot.slane %v1135_v8, 4  ;;  %v1866_v30 = vsub.f32 %v5834_v54, %v1865_v38  ;;  %v1867_v24 = vsub.f32 %v5842_v15, %v1865_v38  ;;  %v1869_v23 = vsub.f32 %v5848_v27, %v1865_v38 }
 0x4c7   : > { %v1868_v0 = vsub.f32 %v5854_v57, %v1865_v38  ;;  %v1870_v54 = vsub.f32 %v5864_v44, %v1865_v38  ;;  %v1873_v52 = vsub.f32 %v5902_v18, %v1865_v38  ;;  %v1872_v27 = vsub.f32 %v5871_v22, %v1865_v38 }
 0x4c8   : > { %v1137_v51 = vmax.f32 %v1135_v8, %v1136_v19  ;;  %v1874_v1 = vmul.f32 1.442695, %v1866_v30  ;;  %v1876_v12 = vmul.f32 1.442695, %v1867_v24  ;;  %v1880_v8 = vmul.f32 1.442695, %v1869_v23 }
 0x4c9   : > { %v1882_v19 = vmul.f32 1.442695, %v1870_v54  ;;  %v1888_v57 = vmul.f32 1.442695, %v1873_v52  ;;  %v1886_v44 = vmul.f32 1.442695, %v1872_v27 }
 0x4ca   : > { %v1138_v7 = vrot.slane %v1137_v51, 2 }
 0x4cc   : > { %v1139_v63 = vmax.f32 %v1137_v51, %v1138_v7 }
 0x4ce   : > { %v1140_v59 = vrot.slane %v1139_v63, 1 }
 0x4d0   : > { %v1141_v13 = vmax.f32 %v1139_v63, %v1140_v59 }
 0x4d2   : > { %v1143_v33 = vsub.f32 %v5799_v47, %v1141_v13  ;;  %v1142_v26 = vsub.f32 %v5815_v56, %v1141_v13  ;;  %v1871_v47 = vsub.f32 %v5859_v62, %v1865_v38  ;;  %v1878_v56 = vmul.f32 1.442695, %v1868_v0 }
 0x4d3   : > { %v1145_v62 = vsub.f32 %v5909_v4, %v1141_v13  ;;  %v1144_v18 = vsub.f32 %v5878_v11, %v1141_v13  ;;  %v1147_v22 = vsub.f32 %v5914_v21, %v1141_v13  ;;  %v1146_v4 = vsub.f32 %v5883_v53, %v1141_v13 }
 0x4d4   : > { %v1152_v29 = vmul.f32 1.442695, %v1143_v33  ;;  %v1150_v58 = vmul.f32 1.442695, %v1142_v26  ;;  %v1884_v15 = vmul.f32 1.442695, %v1871_v47  ;;  %v1149_v30 = vsub.f32 %v5921_v6, %v1141_v13 }
 0x4d5   : > { %v1156_v38 = vmul.f32 1.442695, %v1145_v62  ;;  %v1154_v59 = vmul.f32 1.442695, %v1144_v18  ;;  %v1160_v11 = vmul.f32 1.442695, %v1147_v22  ;;  %v1148_v21 = vsub.f32 %v5890_v55, %v1141_v13 }
 0x4d6   : > { %5183 = vpow2.f32 %v1152_v29  ;;  %v1158_v24 = vmul.f32 1.442695, %v1146_v4  ;;  %v1164_v53 = vmul.f32 1.442695, %v1149_v30 }
 0x4d7   : > { %5185 = vpow2.f32 %v1150_v58 }
 0x4d8   : > { %5187 = vpow2.f32 %v1874_v1  ;;  %v1162_v1 = vmul.f32 1.442695, %v1148_v21 }
 0x4d9   : > { %5189 = vpow2.f32 %v1876_v12 }
 0x4da   : > { %5191 = vpow2.f32 %v1880_v8 }
 0x4db   : > { %5193 = vpow2.f32 %v1878_v56 }
 0x4dc   : > { %5195 = vpow2.f32 %v1884_v15 }
 0x4dd   : > { %5197 = vpow2.f32 %v1882_v19 }
 0x4de   : > { %5199 = vpow2.f32 %v1888_v57 }
 0x4df   : > { %5201 = vpow2.f32 %v1886_v44 }
 0x4e0   : > { %v5966_v51 = vpop.eup %5183  ;;  %5203 = vpow2.f32 %v1156_v38 }
 0x4e1   : > { %v5968_v48 = vpop.eup %5185  ;;  %1178 = vperm.xlu0 %5136, %v5966_v51   ;;  %5205 = vpow2.f32 %v1154_v59 }
 0x4e2   : > { %1175 = vperm.xlu1 %5135, %v5968_v48   ;;  %v5974_v7 = vpop.eup %5187  ;;  %5207 = vpow2.f32 %v1160_v11 }
 0x4e3   : > { %v5976_v63 = vpop.eup %5189  ;;  %5209 = vpow2.f32 %v1158_v24 }
 0x4e4   : > { %v5982_v33 = vpop.eup %5191  ;;  %5211 = vpow2.f32 %v1164_v53 }
 0x4e5   : > { %1899 = vperm.xlu0 %5136, %v5974_v7   ;;  %v5984_v26 = vpop.eup %5193  ;;  %5213 = vpow2.f32 %v1162_v1 }
 0x4e6   : > { %1902 = vperm.xlu1 %5135, %v5976_v63   ;;  %v5990_v29 = vpop.eup %5195 }
 0x4e7   : > { %v5992_v58 = vpop.eup %5197 }
 0x4e8   : > { %v5996_v23 = vpop.eup %5199 }
 0x4e9   : > { %1908 = vperm.xlu0 %5136, %v5982_v33   ;;  %v5998_v12 = vpop.eup %5201 }
 0x4ea   : > { %1905 = vperm.xlu1 %5135, %v5984_v26   ;;  %v6002_v13 = vpop.eup %5203 }
 0x4eb   : > { %v6004_v55 = vpop.eup %5205 }
 0x4ec   : > { %v6008_v6 = vpop.eup %5207 }
 0x4ed   : > { %1914 = vperm.xlu0 %5136, %v5990_v29   ;;  %v6010_v0 = vpop.eup %5209 }
 0x4ee   : > { %1911 = vperm.xlu1 %5135, %v5992_v58   ;;  %v6014_v8 = vpop.eup %5211 }
 0x4ef   : > { %v6016_v47 = vpop.eup %5213 }
 0x4f1   : > { %1920 = vperm.xlu0 %5136, %v5996_v23  }
 0x4f2   : > { %1917 = vperm.xlu1 %5135, %v5998_v12  }
 0x4f5   : > { %1184 = vperm.xlu0 %5136, %v6002_v13  }
 0x4f6   : > { %1181 = vperm.xlu1 %5135, %v6004_v55  }
 0x4f9   : > { %1190 = vperm.xlu0 %5136, %v6008_v6  }
 0x4fa   : > { %1187 = vperm.xlu1 %5135, %v6010_v0  }
 0x4fd   : > { %1196 = vperm.xlu0 %5136, %v6014_v8  }
 0x4fe   : > { %1193 = vperm.xlu1 %5135, %v6016_v47  }
 0x560   : > { %v1179_v56 = vpop.permute.xlu0 %1178 }
 0x561   : > { %v1176_v54 = vpop.permute.xlu1 %1175 }
 0x564   : > { %v1900_v15 = vpop.permute.xlu0 %1899 }
 0x565   : > { %v1903_v52 = vpop.permute.xlu1 %1902  ;;  %v1925_v19 = vrot.slane %v1900_v15, %v5565_v16 }
 0x566   : > { %v1929_v27 = vrot.slane %v1903_v52, %v5565_v16 }
 0x568   : > { %v1909_v57 = vpop.permute.xlu0 %1908  ;;  %v1954_v18 = vsel %vm1117_vm7, %v1929_v27, %v1925_v19  ;;  %v1205_v19 = vrot.slane %v1179_v56, %v5565_v16  ;;  %v1201_v27 = vrot.slane %v1176_v54, %v5565_v16 }
 0x569   : > { %v1906_v62 = vpop.permute.xlu1 %1905  ;;  %v1937_v38 = vrot.slane %v1909_v57, %v5565_v16 }
 0x56a   : > { %v1933_v44 = vrot.slane %v1906_v62, %v5565_v16 }
 0x56c   : > { %v1955_v22 = vsel %vm1119_vm6, %v1933_v44, %v1954_v18  ;;  %v1915_v59 = vpop.permute.xlu0 %1914 }
 0x56d   : > { %v1912_v4 = vpop.permute.xlu1 %1911  ;;  %v1945_v30 = vrot.slane %v1915_v59, %v5565_v16  ;;  %v1956_v24 = vsel %vm1121_vm8, %v1937_v38, %v1955_v22 }
 0x56e   : > { %v1941_v11 = vrot.slane %v1912_v4, %v5565_v16  ;;  %v1230_v4 = vsel %vm1117_vm7, %v1205_v19, %v1201_v27 }
 0x570   : > { %v1957_v21 = vsel %vm1123_vm9, %v1941_v11, %v1956_v24  ;;  %v1921_v53 = vpop.permute.xlu0 %1920 }
 0x571   : > { %v1953_v1 = vrot.slane %v1921_v53, %v5565_v16  ;;  %v1918_v15 = vpop.permute.xlu1 %1917  ;;  %v1958_v57 = vsel %vm1125_vm10, %v1945_v30, %v1957_v21 }
 0x572   : > { %v1949_v52 = vrot.slane %v1918_v15, %v5565_v16 }
 0x574   : > { %v1185_v62 = vpop.permute.xlu0 %1184  ;;  %v1959_v44 = vsel %vm1127_vm11, %v1949_v52, %v1958_v57 }
 0x575   : > { %v1182_v18 = vpop.permute.xlu1 %1181  ;;  %v1960_v38 = vsel %vm1129_vm12, %v1953_v1, %v1959_v44  ;;  %v1213_v11 = vrot.slane %v1185_v62, %v5565_v16 }
 0x576   : > { %v1209_v22 = vrot.slane %v1182_v18, %v5565_v16  ;;  %v1962_v59 = vsel %vm1132_vm13, %v1960_v38, 0.0 }
 0x577   : > { %1963 = vadd.xlane.f32.xlu1 %v1962_v59 }
 0x578   : > { %v1231_v56 = vsel %vm1119_vm6, %v1209_v22, %v1230_v4  ;;  %v1191_v54 = vpop.permute.xlu0 %1190 }
 0x579   : > { %v1188_v24 = vpop.permute.xlu1 %1187  ;;  %v1221_v21 = vrot.slane %v1191_v54, %v5565_v16  ;;  %v1232_v53 = vsel %vm1121_vm8, %v1213_v11, %v1231_v56 }
 0x57a   : > { %v1217_v30 = vrot.slane %v1188_v24, %v5565_v16 }
 0x57c   : > { %v1233_v1 = vsel %vm1123_vm9, %v1217_v30, %v1232_v53  ;;  %v1197_v15 = vpop.permute.xlu0 %1196 }
 0x57d   : > { %v1229_v52 = vrot.slane %v1197_v15, %v5565_v16  ;;  %v1194_v57 = vpop.permute.xlu1 %1193  ;;  %v1234_v27 = vsel %vm1125_vm10, %v1221_v21, %v1233_v1 }
 0x57e   : > { %v1225_v19 = vrot.slane %v1194_v57, %v5565_v16 }
 0x580   : > { %v1235_v62 = vsel %vm1127_vm11, %v1225_v19, %v1234_v27 }
 0x581   : > { %v1236_v44 = vsel %vm1129_vm12, %v1229_v52, %v1235_v62 }
 0x582   : > { %v1238_v18 = vsel %vm1132_vm13, %v1236_v44, 0.0 }
 0x583   : > { %1239 = vadd.xlane.f32.xlu0 %v1238_v18 }
 0x604   : > { %v1964_v38 = vpop.xlane.xlu1 %1963 }
 0x605   : > { %v1965_v22 = vrot.slane %v1964_v38, 4 }
 0x607   : > { %v1966_v59 = vadd.f32 %v1965_v22, %v1964_v38 }
 0x609   : > { %v1967_v4 = vrot.slane %v1966_v59, 2 }
 0x60b   : > { %v1968_v11 = vadd.f32 %v1967_v4, %v1966_v59 }
 0x60d   : > { %v1969_v24 = vrot.slane %v1968_v11, 1 }
 0x60f   : > { %v1970_v15 = vadd.f32 %v1969_v24, %v1968_v11 }
 0x610   : > { %v1240_v56 = vpop.xlane.xlu0 %1239 }
 0x611   : > { %v1241_v54 = vrot.slane %v1240_v56, 4  ;;  %5215 = vrcp.f32 %v1970_v15 }
 0x613   : > { %v1242_v30 = vadd.f32 %v1241_v54, %v1240_v56 }
 0x615   : > { %v1243_v53 = vrot.slane %v1242_v30, 2 }
 0x617   : > { %v1244_v57 = vadd.f32 %v1243_v53, %v1242_v30 }
 0x619   : > { %v1245_v21 = vrot.slane %v1244_v57, 1 }
 0x61b   : > { %v1246_v1 = vadd.f32 %v1245_v21, %v1244_v57  ;;  %v5216_v52 = vpop.eup %5215 }
 0x61c   : > { %v1973_v44 = vmul.f32 %v5216_v52, %v5976_v63  ;;  %v1972_v18 = vmul.f32 %v5216_v52, %v5974_v7  ;;  %v1974_v59 = vmul.f32 %v5216_v52, %v5984_v26  ;;  %v1975_v4 = vmul.f32 %v5216_v52, %v5982_v33 }
 0x61d   : > { %5217 = vrcp.f32 %v1246_v1  ;;  %v1978_v26 = vmul.f32 %v5216_v52, %v5998_v12  ;;  %v1979_v33 = vmul.f32 %v5216_v52, %v5996_v23 }
 0x61e   : > { %v1981_v54 = vpack.c.bf16 %v1973_v44, %v1973_v44  ;;  %v1980_v24 = vpack.c.bf16 %v1972_v18, %v1972_v18  ;;  %v1982_v53 = vpack.c.bf16 %v1974_v59, %v1974_v59  ;;  %v1983_v7 = vpack.c.bf16 %v1975_v4, %v1975_v4 }
 0x620   : > { %v1997_v30 = vunpack.c.l.b16 %v1981_v54  ;;  %v1996_v63 = vunpack.c.l.b16 %v1980_v24  ;;  %v1998_v15 = vunpack.c.l.b16 %v1982_v53  ;;  %v1999_v57 = vunpack.c.l.b16 %v1983_v7 }
 0x627   : > { %v5218_v19 = vpop.eup %5217 }
 0x628   : > { %v1249_v27 = vmul.f32 %v5218_v19, %v5966_v51  ;;  %v1248_v62 = vmul.f32 %v5218_v19, %v5968_v48  ;;  %v1976_v51 = vmul.f32 %v5216_v52, %v5992_v58  ;;  %v1977_v48 = vmul.f32 %v5216_v52, %v5990_v29 }
 0x629   : > { %v1987_v58 = vpack.c.bf16 %v1979_v33, %v1979_v33  ;;  %v1250_v44 = vmul.f32 %v5218_v19, %v6004_v55  ;;  %v1251_v18 = vmul.f32 %v5218_v19, %v6002_v13  ;;  %v1252_v52 = vmul.f32 %v5218_v19, %v6010_v0 }
 0x62a   : > { %v1257_v38 = vpack.c.bf16 %v1249_v27, %v1249_v27  ;;  %v1256_v22 = vpack.c.bf16 %v1248_v62, %v1248_v62  ;;  %v1984_v21 = vpack.c.bf16 %v1976_v51, %v1976_v51  ;;  %v1985_v1 = vpack.c.bf16 %v1977_v48, %v1977_v48 }
 0x62b   : > { %v1986_v27 = vpack.c.bf16 %v1978_v26, %v1978_v26  ;;  %v2003_v12 = vunpack.c.l.b16 %v1987_v58  ;;  %v1259_v23 = vpack.c.bf16 %v1251_v18, %v1251_v18  ;;  %v1253_v59 = vmul.f32 %v5218_v19, %v6008_v6 }
 0x62c   : > { %v2123_v11 = vunpack.c.l.b16 %v1257_v38  ;;  %v2122_v56 = vunpack.c.l.b16 %v1256_v22  ;;  %v2000_v62 = vunpack.c.l.b16 %v1984_v21  ;;  %v2001_v29 = vunpack.c.l.b16 %v1985_v1 }
 0x62d   : > { %v2002_v38 = vunpack.c.l.b16 %v1986_v27  ;;  %v1258_v22 = vpack.c.bf16 %v1250_v44, %v1250_v44  ;;  %v1254_v4 = vmul.f32 %v5218_v19, %v6016_v47  ;;  %v2125_v55 = vunpack.c.l.b16 %v1259_v23 }
 0x62e   : > { %2134 = vperm.xlu0 %5136, %v2123_v11   ;;  %2131 = vperm.xlu1 %5135, %v2122_v56   ;;  %v1255_v11 = vmul.f32 %v5218_v19, %v6014_v8  ;;  %v1260_v54 = vpack.c.bf16 %v1252_v52, %v1252_v52  ;;  %v1261_v13 = vpack.c.bf16 %v1253_v59, %v1253_v59  ;;  %v5149_v8 = vld [vmem:[%s6774_s4 + $0x30] sm:$0xff]   ;;  %v6814_v47 = vmov 0.0  }
 0x62f   : > { %v2124_v56 = vunpack.c.l.b16 %v1258_v22  ;;  %v1262_v48 = vpack.c.bf16 %v1254_v4, %v1254_v4  ;;  %4926 = vmatpush3.bf16.msra.mxu1 %v5149_v8  ;;  %v2197_v8 = vsel %vm2071_vm2, %v5615_v61, 0 }
 0x630   : > { %v2126_v24 = vunpack.c.l.b16 %v1260_v54  ;;  %v2127_v51 = vunpack.c.l.b16 %v1261_v13  ;;  %4927 = vmatprep.subr.bf16.mxu1 %v6814_v47 }
 0x631   : > { %v2128_v0 = vunpack.c.l.b16 %v1262_v48 }
 0x632   : > { %2008 = vperm.xlu1 %5135, %v1997_v30   ;;  %2005 = vperm.xlu0 %5136, %v1996_v63   ;;  %v1263_v30 = vpack.c.bf16 %v1255_v11, %v1255_v11 }
 0x634   : > { %v2129_v6 = vunpack.c.l.b16 %v1263_v30 }
 0x636   : > { %2011 = vperm.xlu1 %5135, %v1998_v15   ;;  %2014 = vperm.xlu0 %5136, %v1999_v57  }
 0x63a   : > { %2017 = vperm.xlu1 %5135, %v2000_v62   ;;  %2020 = vperm.xlu0 %5136, %v2001_v29  }
 0x63e   : > { %2023 = vperm.xlu1 %5135, %v2002_v38   ;;  %2026 = vperm.xlu0 %5136, %v2003_v12  }
 0x642   : > { %2137 = vperm.xlu1 %5135, %v2124_v56   ;;  %2140 = vperm.xlu0 %5136, %v2125_v55  }
 0x646   : > { %2143 = vperm.xlu1 %5135, %v2126_v24   ;;  %2146 = vperm.xlu0 %5136, %v2127_v51  }
 0x64a   : > { %2149 = vperm.xlu1 %5135, %v2128_v0   ;;  %2152 = vperm.xlu0 %5136, %v2129_v6  }
 0x6ad   : > { %v2135_v19 = vpop.permute.xlu0 %2134  ;;  %v2132_v63 = vpop.permute.xlu1 %2131 }
 0x6ae   : > { %v2161_v4 = vrot.slane %v2135_v19, %v5565_v16  ;;  %v2157_v11 = vrot.slane %v2132_v63, %v5565_v16 }
 0x6b0   : > { %v2186_v30 = vsel %vm1117_vm7, %v2161_v4, %v2157_v11  ;;  %v5153_v4 = vld [vmem:[%s6774_s4 + $0x48] sm:$0xff]   ;;  %v5154_v11 = vld [vmem:[%s6774_s4 + $0x58] sm:$0xff]  }
 0x6b1   : > { %v2006_v53 = vpop.permute.xlu0 %2005  ;;  %v2009_v7 = vpop.permute.xlu1 %2008 }
 0x6b2   : > { %v2031_v26 = vrot.slane %v2006_v53, %v5565_v16  ;;  %v2035_v33 = vrot.slane %v2009_v7, %v5565_v16 }
 0x6b4   : > { %v2060_v1 = vsel %vm1117_vm7, %v2035_v33, %v2031_v26 }
 0x6b5   : > { %v2015_v15 = vpop.permute.xlu0 %2014  ;;  %v2012_v57 = vpop.permute.xlu1 %2011 }
 0x6b6   : > { %v2039_v21 = vrot.slane %v2012_v57, %v5565_v16  ;;  %v2043_v27 = vrot.slane %v2015_v15, %v5565_v16 }
 0x6b8   : > { %v2061_v58 = vsel %vm1119_vm6, %v2039_v21, %v2060_v1 }
 0x6b9   : > { %v2021_v62 = vpop.permute.xlu0 %2020  ;;  %v2018_v29 = vpop.permute.xlu1 %2017  ;;  %v2062_v38 = vsel %vm1121_vm8, %v2043_v27, %v2061_v58 }
 0x6ba   : > { %v2047_v44 = vrot.slane %v2018_v29, %v5565_v16  ;;  %v2051_v18 = vrot.slane %v2021_v62, %v5565_v16  ;;  %v5150_v29 = vld [vmem:[%s6774_s4 + $0x38] sm:$0xff]  }
 0x6bb   : > { %4928 = vmatpush3.bf16.msra.mxu1 %v5150_v29 }
 0x6bc   : > { %v2063_v12 = vsel %vm1123_vm9, %v2047_v44, %v2062_v38  ;;  %4933 = vmatprep.subr.bf16.mxu1 %v6814_v47  ;;  %v5152_v44 = vld [vmem:[%s6774_s4 + $0x50] sm:$0xff]  }
 0x6bd   : > { %v2027_v22 = vpop.permute.xlu0 %2026  ;;  %v2024_v23 = vpop.permute.xlu1 %2023  ;;  %v2064_v56 = vsel %vm1125_vm10, %v2051_v18, %v2063_v12 }
 0x6be   : > { %v2059_v52 = vrot.slane %v2027_v22, %v5565_v16  ;;  %v2055_v59 = vrot.slane %v2024_v23, %v5565_v16  ;;  %v5151_v23 = vld [vmem:[%s6774_s4 + $0x40] sm:$0xff]  }
 0x6c0   : > { %v2065_v55 = vsel %vm1127_vm11, %v2055_v59, %v2064_v56  ;;  %v4660_v56 = vld [vmem:[%s6775_s5 + $0x2] ss:$0 sm:$0xff] }
 0x6c1   : > { %v2066_v54 = vsel %vm1129_vm12, %v2059_v52, %v2065_v55  ;;  %v2141_v13 = vpop.permute.xlu0 %2140  ;;  %v2138_v24 = vpop.permute.xlu1 %2137 }
 0x6c2   : > { %v2067_v51 = vpack.c.b16 %v2066_v54, %v2066_v54  ;;  %v2165_v48 = vrot.slane %v2138_v24, %v5565_v16  ;;  %v2169_v0 = vrot.slane %v2141_v13, %v5565_v16 }
 0x6c4   : > { %v2187_v6 = vsel %vm1119_vm6, %v2165_v48, %v2186_v30  ;;  %4916 = vmatmul.mubr.msk.bf16.vlgmr.msra.gmra.mrb[12].mxu0 %vm1132_vm13, %v2067_v51  ;;  %v5155_v51 = vld [vmem:[%s6774_s4 + $0x90] sm:$0xff]  }
 0x6c5   : > { %4920 = vmatpush3.bf16.msra.mxu0 %v2197_v8  ;;  %v2147_v19 = vpop.permute.xlu0 %2146  ;;  %v2144_v63 = vpop.permute.xlu1 %2143  ;;  %4921 = vmatprep.mubr.msk.bf16.mxu0 %vm5360_vm0, %v6814_v47  ;;  %v2188_v26 = vsel %vm1121_vm8, %v2169_v0, %v2187_v6  ;;  %v5156_v0 = vld [vmem:[%s6774_s4 + $0x98] sm:$0xff]   ;;  %v5157_v6 = vld [vmem:[%s6774_s4 + $0xa0] sm:$0xff]   ;;  %v5158_v8 = vld [vmem:[%s6774_s4 + $0xb0] sm:$0xff]  }
 0x6c6   : > { %v2173_v53 = vrot.slane %v2144_v63, %v5565_v16  ;;  %4941 = vmatprep.subr.bf16.mxu0 %v6814_v47  ;;  %v2177_v7 = vrot.slane %v2147_v19, %v5565_v16  ;;  %v5159_v19 = vld [vmem:[%s6774_s4 + $0xa8] sm:$0xff]   ;;  %v5160_v63 = vld [vmem:[%s6774_s4 + $0xb8] sm:$0xff]  }
 0x6c8   : > { %v2189_v33 = vsel %vm1123_vm9, %v2173_v53, %v2188_v26  ;;  %v4669_v53 = vld [vmem:[%s6775_s5 + $0x3] ss:$0 sm:$0xff] }
 0x6c9   : > { %v2153_v15 = vpop.permute.xlu0 %2152  ;;  %v2150_v57 = vpop.permute.xlu1 %2149  ;;  %v2190_v1 = vsel %vm1125_vm10, %v2177_v7, %v2189_v33 }
 0x6ca   : > { %v2185_v61 = vrot.slane %v2153_v15, %v5565_v16  ;;  %v2181_v21 = vrot.slane %v2150_v57, %v5565_v16 }
 0x6cc   : > { %v2191_v27 = vsel %vm1127_vm11, %v2181_v21, %v2190_v1 }
 0x6cd   : > { %v2192_v58 = vsel %vm1129_vm12, %v2185_v61, %v2191_v27 }
 0x6ce   : > { %v2193_v62 = vpack.c.b16 %v2192_v58, %v2192_v58 }
 0x6d0   : > { %4922 = vmatmul.mubr.msk.bf16.vlgmr.msra.gmra.mrb[12].mxu0 %vm1132_vm13, %v2193_v62 }
 0x6d1   : > { %4945 = vmatprep.mubr.msk.bf16.mxu0 %vm5360_vm0, %v6814_v47  ;;  %4942 = vmatpush3.bf16.msra.mxu0 %v5152_v44 }
 0x6d2   : > { %4943 = vmatprep.subr.bf16.mxu0 %v6814_v47 }
 0x6d5   : > { %4944 = vmatpush3.bf16.msra.mxu0 %v5154_v11 }
 0x6d6   : > { %4957 = vmatprep.subr.bf16.mxu0 %v6814_v47 }
 0x7a3   : > { %v2233_v18 = vpop.f32.mrb[12].mxu0 }
 0x7a4   : > { %v2239_v38 = vmax.f32 %v2233_v18, 0.0  ;;  %v4923_v12 = vpop.f32.mrb[13].mxu0 }
 0x7a5   : > { %v2236_v22 = vpop.f32.mrb[14].mxu0 }
 0x7a6   : > { %v2240_v52 = vpack.c.bf16 %v2239_v38, %v2239_v38  ;;  %v4924_v59 = vpop.f32.mrb[15].mxu0  ;;  %v4688_v38 = vld [vmem:[%s6775_s5 + $0x6] ss:$0 sm:$0xff] }
 0x7a8   : > { %4930 = vmatmul.mubr.msk.bf16.vlgmr.msra.gmra.mrb[12].mxu1 %vm554_vm1, %v2240_v52 }
 0x7a9   : > { %4934 = vmatpush3.bf16.msra.mxu1 %v5151_v23  ;;  %4937 = vmatprep.mubr.msk.bf16.mxu1 %vm5360_vm0, %v6814_v47 }
 0x7aa   : > { %4935 = vmatprep.subr.bf16.mxu1 %v6814_v47 }
 0x7ad   : > { %4936 = vmatpush3.bf16.msra.mxu1 %v5153_v4 }
 0x7ae   : > { %4949 = vmatprep.subr.bf16.mxu1 %v6814_v47 }
 0x87b   : > { %v2303_v55 = vpop.f32.mrb[12].mxu1 }
 0x87c   : > { %v2304_v54 = vadd.f32 %v4660_v56, %v2303_v55  ;;  %v4931_v13 = vpop.f32.mrb[13].mxu1 }
 0x87d   : > { %v2306_v24 = vpop.f32.mrb[14].mxu1 }
 0x87e   : > { %v6140_v48 = vpack.c.bf16 %v2304_v54, %v2304_v54  ;;  %v4932_v30 = vpop.f32.mrb[15].mxu1 }
 0x880   : > { %4938 = vmatmul.mubr.msk.bf16.vlgmr.msra.gmra.mrb[16].mxu1 %vm554_vm1, %v6140_v48  ;;  %4946 = vmatmul.mubr.msk.bf16.vlgmr.msra.gmra.mrb[16].mxu0 %vm554_vm1, %v6140_v48 }
 0x881   : > { %4950 = vmatpush3.bf16.msra.mxu1 %v5155_v51  ;;  %4953 = vmatprep.mubr.msk.bf16.mxu1 %vm5360_vm0, %v6814_v47 }
 0x882   : > { %4951 = vmatprep.subr.bf16.mxu1 %v6814_v47  ;;  %4961 = vmatprep.mubr.msk.bf16.mxu0 %vm5360_vm0, %v6814_v47 }
 0x883   : > { %4958 = vmatpush3.bf16.msra.mxu0 %v5157_v6 }
 0x884   : > { %4959 = vmatprep.subr.bf16.mxu0 %v6814_v47 }
 0x885   : > { %4952 = vmatpush3.bf16.msra.mxu1 %v5156_v0 }
 0x886   : > { %4965 = vmatprep.subr.bf16.mxu1 %v6814_v47 }
 0x887   : > { %4960 = vmatpush3.bf16.msra.mxu0 %v5159_v19 }
 0x888   : > { %4954 = vmatmul.mubr.msk.bf16.vlgmr.msra.gmra.mrb[20].mxu1 %vm554_vm1, %v2240_v52  ;;  %4973 = vmatprep.subr.bf16.mxu0 %v6814_v47 }
 0x889   : > { %4969 = vmatprep.mubr.msk.bf16.mxu1 %vm5360_vm0, %v6814_v47  ;;  %4966 = vmatpush3.bf16.msra.mxu1 %v5158_v8 }
 0x88a   : > { %4967 = vmatprep.subr.bf16.mxu1 %v6814_v47 }
 0x88d   : > { %4968 = vmatpush3.bf16.msra.mxu1 %v5160_v63  ;;  %v4681_v63 = vld [vmem:[%s6776_s6 + $0x1] ss:$0 sm:$0xff] }
 0x88e   : > { %4985 = vmatprep.subr.bf16.mxu1 %v6814_v47 }
 0x953   : > { %v2372_v7 = vpop.f32.mrb[16].mxu1  ;;  %v6177_v26 = vpop.f32.mrb[16].mxu0 }
 0x954   : > { %v2373_v33 = vadd.f32 %v4669_v53, %v2372_v7  ;;  %v4939_v15 = vpop.f32.mrb[17].mxu1  ;;  %v4947_v57 = vpop.f32.mrb[17].mxu0 }
 0x955   : > { %v2375_v61 = vpop.f32.mrb[18].mxu1  ;;  %v2432_v21 = vpop.f32.mrb[18].mxu0 }
 0x956   : > { %v2436_v1 = vcombine.high %v2373_v33, %v2373_v33  ;;  %v2443_v27 = vrot.slane %v2373_v33, %v5654_v9  ;;  %v4940_v58 = vpop.f32.mrb[19].mxu1  ;;  %v4948_v62 = vpop.f32.mrb[19].mxu0 }
 0x958   : > { %v2450_v29 = vrot.slane %v2436_v1, %v5654_v9  ;;  %v2451_v44 = vcombine.high %v2443_v27, %v2443_v27  ;;  %v2459_v18 = vrot.slane %v2443_v27, %v5654_v9 }
 0x95a   : > { %v2452_v12 = vcombine.high %v2450_v29, %v2450_v29  ;;  %v2466_v22 = vrot.slane %v2450_v29, %v5654_v9  ;;  %v2473_v23 = vrot.slane %v2451_v44, %v5654_v9  ;;  %v2481_v52 = vcombine.high %v2459_v18, %v2459_v18 }
 0x95b   : > { %v2488_v59 = vrot.slane %v2459_v18, %v5561_v14  ;;  %v2893_v4 = vpop.f32.mrb[20].mxu1 }
 0x95c   : > { %v2480_v11 = vrot.slane %v2452_v12, %v5654_v9  ;;  %v2482_v56 = vcombine.high %v2466_v22, %v2466_v22  ;;  %v2483_v55 = vcombine.high %v2473_v23, %v2473_v23  ;;  %v2894_v54 = vadd.f32 %v4688_v38, %v2893_v4  ;;  %v4955_v13 = vpop.f32.mrb[21].mxu1 }
 0x95d   : > { %v2896_v24 = vpop.f32.mrb[22].mxu1  ;;  %v2525_v51 = vadd.f32 %v2488_v59, %v6177_v26  ;;  %v2492_v30 = vrot.slane %v2473_v23, %v5561_v14  ;;  %v2496_v0 = vrot.slane %v2481_v52, %v5561_v14  ;;  %v2504_v6 = vrot.slane %v2466_v22, %v5561_v14 }
 0x95e   : > { %v2899_v8 = vpack.c.bf16 %v2894_v54, %v2894_v54  ;;  %v4956_v19 = vpop.f32.mrb[23].mxu1  ;;  %v2512_v53 = vrot.slane %v2482_v56, %v5561_v14  ;;  %v2500_v7 = vrot.slane %v2483_v55, %v5561_v14  ;;  %v2508_v33 = vrot.slane %v2480_v11, %v5561_v14 }
 0x95f   : > { %v2533_v15 = vmax.f32 %v2525_v51, 0.0  ;;  %v2526_v57 = vadd.f32 %v2492_v30, %v6177_v26  ;;  %v2527_v61 = vadd.f32 %v2496_v0, %v6177_v26  ;;  %v2529_v21 = vadd.f32 %v2504_v6, %v6177_v26 }
 0x960   : > { %4962 = vmatmul.mubr.msk.bf16.vlgmr.msra.gmra.mrb[20].mxu0 %vm554_vm1, %v2899_v8  ;;  %4970 = vmatmul.mubr.msk.bf16.vlgmr.msra.gmra.mrb[24].mxu1 %vm554_vm1, %v2899_v8  ;;  %v3507_v1 = vsel %vm2071_vm2, %v2899_v8, 0  ;;  %v2531_v27 = vadd.f32 %v2512_v53, %v6177_v26  ;;  %v2528_v58 = vadd.f32 %v2500_v7, %v6177_v26  ;;  %v2530_v62 = vadd.f32 %v2508_v33, %v6177_v26  ;;  %v4697_v8 = vld [vmem:[%s6775_s5 + $0x7] ss:$0 sm:$0xff] }
 0x961   : > { %4974 = vmatpush3.bf16.msra.mxu0 %v3507_v1  ;;  %v2549_v29 = vmul.f32 %v4681_v63, %v2533_v15  ;;  %v2534_v44 = vmax.f32 %v2526_v57, 0.0  ;;  %v2535_v18 = vmax.f32 %v2527_v61, 0.0  ;;  %v2537_v38 = vmax.f32 %v2529_v21, 0.0  ;;  %4975 = vmatprep.mubr.msk.bf16.mxu0 %vm5360_vm0, %v6814_v47 }
 0x962   : > { %v2539_v12 = vmax.f32 %v2531_v27, 0.0  ;;  %v2536_v22 = vmax.f32 %v2528_v58, 0.0  ;;  %v2538_v23 = vmax.f32 %v2530_v62, 0.0  ;;  %v2484_v52 = vcombine.high %v2480_v11, %v2480_v11  ;;  %4979 = vmatprep.subr.bf16.mxu0 %v6814_v47  ;;  %4989 = vmatprep.mubr.msk.bf16.mxu1 %vm5360_vm0, %v6814_v47 }
 0x963   : > { %v2557_v59 = vsel %vm554_vm1, %v2549_v29, 0.0  ;;  %v2550_v4 = vmul.f32 %v4681_v63, %v2534_v44  ;;  %v6214_v56 = vmul.f32 %v4681_v63, %v2535_v18  ;;  %v6216_v55 = vmul.f32 %v4681_v63, %v2537_v38 }
 0x964   : > { %2558 = vadd.xlane.f32.xlu1 %v2557_v59  ;;  %v6218_v54 = vmul.f32 %v4681_v63, %v2539_v12  ;;  %v6220_v13 = vmul.f32 %v4681_v63, %v2536_v22  ;;  %v6222_v24 = vmul.f32 %v4681_v63, %v2538_v23  ;;  %v2516_v11 = vrot.slane %v2484_v52, %v5561_v14 }
 0x965   : > { %v2560_v51 = vsel %vm554_vm1, %v2550_v4, 0.0 }
 0x966   : > { %2561 = vadd.xlane.f32.xlu0 %v2560_v51  ;;  %v2532_v30 = vadd.f32 %v2516_v11, %v6177_v26 }
 0x968   : > { %v2540_v0 = vmax.f32 %v2532_v30, 0.0  ;;  %v4709_v30 = vld [vmem:[%s6776_s6 + $0x3] ss:$0 sm:$0xff] }
 0x96a   : > { %v6227_v6 = vmul.f32 %v4681_v63, %v2540_v0 }
 0xa33   : > { %v2962_v19 = vpop.f32.mrb[20].mxu0  ;;  %v3019_v53 = vpop.f32.mrb[24].mxu1 }
 0xa34   : > { %v2963_v7 = vadd.f32 %v4697_v8, %v2962_v19  ;;  %v4963_v33 = vpop.f32.mrb[21].mxu0  ;;  %v4971_v15 = vpop.f32.mrb[25].mxu1 }
 0xa35   : > { %v2965_v57 = vpop.f32.mrb[22].mxu0  ;;  %v3022_v61 = vpop.f32.mrb[26].mxu1 }
 0xa36   : > { %v3026_v21 = vcombine.high %v2963_v7, %v2963_v7  ;;  %v3033_v1 = vrot.slane %v2963_v7, %v5654_v9  ;;  %v4964_v27 = vpop.f32.mrb[23].mxu0  ;;  %v4972_v58 = vpop.f32.mrb[27].mxu1 }
 0xa38   : > { %v3040_v26 = vrot.slane %v3026_v21, %v5654_v9  ;;  %v3041_v63 = vcombine.high %v3033_v1, %v3033_v1  ;;  %v3049_v62 = vrot.slane %v3033_v1, %v5654_v9 }
 0xa3a   : > { %v3042_v29 = vcombine.high %v3040_v26, %v3040_v26  ;;  %v3056_v44 = vrot.slane %v3040_v26, %v5654_v9  ;;  %v3063_v18 = vrot.slane %v3041_v63, %v5654_v9  ;;  %v3071_v38 = vcombine.high %v3049_v62, %v3049_v62 }
 0xa3b   : > { %v3078_v12 = vrot.slane %v3049_v62, %v5561_v14 }
 0xa3c   : > { %v3070_v22 = vrot.slane %v3042_v29, %v5654_v9  ;;  %v3072_v23 = vcombine.high %v3056_v44, %v3056_v44  ;;  %v3073_v52 = vcombine.high %v3063_v18, %v3063_v18  ;;  %v3082_v59 = vrot.slane %v3063_v18, %v5561_v14 }
 0xa3d   : > { %v3115_v4 = vadd.f32 %v3078_v12, %v3019_v53  ;;  %v3094_v11 = vrot.slane %v3056_v44, %v5561_v14  ;;  %v3086_v51 = vrot.slane %v3071_v38, %v5561_v14 }
 0xa3e   : > { %v3116_v0 = vadd.f32 %v3082_v59, %v3019_v53  ;;  %v3102_v8 = vrot.slane %v3072_v23, %v5561_v14  ;;  %v3090_v19 = vrot.slane %v3073_v52, %v5561_v14  ;;  %v3098_v9 = vrot.slane %v3070_v22, %v5561_v14 }
 0xa3f   : > { %v3123_v7 = vmax.f32 %v3115_v4, 0.0  ;;  %v3119_v33 = vadd.f32 %v3094_v11, %v3019_v53  ;;  %v3117_v15 = vadd.f32 %v3086_v51, %v3019_v53  ;;  %v3074_v57 = vcombine.high %v3070_v22, %v3070_v22 }
 0xa40   : > { %v3124_v61 = vmax.f32 %v3116_v0, 0.0  ;;  %v3121_v21 = vadd.f32 %v3102_v8, %v3019_v53  ;;  %v3118_v1 = vadd.f32 %v3090_v19, %v3019_v53  ;;  %v3120_v27 = vadd.f32 %v3098_v9, %v3019_v53 }
 0xa41   : > { %v3139_v58 = vmul.f32 %v4709_v30, %v3123_v7  ;;  %v3127_v26 = vmax.f32 %v3119_v33, 0.0  ;;  %v3125_v63 = vmax.f32 %v3117_v15, 0.0  ;;  %v3106_v62 = vrot.slane %v3074_v57, %v5561_v14 }
 0xa42   : > { %v3140_v29 = vmul.f32 %v4709_v30, %v3124_v61  ;;  %v3129_v38 = vmax.f32 %v3121_v21, 0.0  ;;  %v3126_v22 = vmax.f32 %v3118_v1, 0.0  ;;  %v3128_v0 = vmax.f32 %v3120_v27, 0.0  ;;  %v2559_v1 = vpop.xlane.xlu1 %2558 }
 0xa43   : > { %v3147_v44 = vsel %vm554_vm1, %v3139_v58, 0.0  ;;  %v3143_v18 = vmul.f32 %v4709_v30, %v3127_v26  ;;  %v3122_v12 = vadd.f32 %v3106_v62, %v3019_v53  ;;  %v3141_v52 = vmul.f32 %v4709_v30, %v3125_v63  ;;  %v2562_v62 = vpop.xlane.xlu0 %2561 }
 0xa44   : > { %3148 = vadd.xlane.f32.xlu1 %v3147_v44  ;;  %v3150_v23 = vsel %vm554_vm1, %v3140_v29, 0.0  ;;  %v3145_v4 = vmul.f32 %v4709_v30, %v3129_v38  ;;  %v3142_v51 = vmul.f32 %v4709_v30, %v3126_v22  ;;  %v3144_v19 = vmul.f32 %v4709_v30, %v3128_v0 }
 0xa45   : > { %3151 = vadd.xlane.f32.xlu0 %v3150_v23  ;;  %v3159_v59 = vsel %vm554_vm1, %v3143_v18, 0.0  ;;  %v3153_v11 = vsel %vm554_vm1, %v3141_v52, 0.0  ;;  %v3130_v9 = vmax.f32 %v3122_v12, 0.0  ;;  %v2563_v7 = vsel %vm554_vm1, %v6214_v56, 0.0 }
 0xa46   : > { %v3165_v8 = vsel %vm554_vm1, %v3145_v4, 0.0  ;;  %v3156_v53 = vsel %vm554_vm1, %v3142_v51, 0.0  ;;  %v3162_v33 = vsel %vm554_vm1, %v3144_v19, 0.0  ;;  %v2569_v57 = vsel %vm554_vm1, %v6216_v55, 0.0 }
 0xa47   : > { %v3146_v15 = vmul.f32 %v4709_v30, %v3130_v9  ;;  %v6261_v21 = vstv %s4682_s28  ;;  %v2575_v27 = vsel %vm554_vm1, %v6218_v54, 0.0  ;;  %v2566_v30 = vsel %vm554_vm1, %v6220_v13, 0.0  ;;  %s4783_s28 = sshll.u32 %s5460_s17, 4  ;;  %s5363_s17 = smov [#allocation5]  }
 0xa48   : > { %3160 = vadd.xlane.f32.xlu1 %v3159_v59  ;;  %v2583_v56 = vadd.f32 %v6261_v21, %v2559_v1  ;;  %v2572_v55 = vsel %vm554_vm1, %v6222_v24, 0.0  ;;  %v2578_v63 = vsel %vm554_vm1, %v6227_v6, 0.0  ;;  %v2584_v29 = vadd.f32 %v6261_v21, %v2562_v62  ;;  %s6728_s21 = scalar_lea.hbm %s6784_s14, %s4783_s28  ;;  %s5294_s0 = sshll.u32 %s5363_s17, 4  ;;  %s5295_s0 = int_to_ptr.vmem [resolvable:$false] %s5294_s0 }
 0xa49   : > { %3154 = vadd.xlane.f32.xlu0 %v3153_v11  ;;  %v3168_v61 = vsel %vm554_vm1, %v3146_v15, 0.0  ;;  %s5296_s2 = scalar_lea.vmem %s5295_s0, 32 }
 0xa4a   : > { %v2599_v58 = vmul.f32 0.01, %v2583_v56  ;;  %vm2591_vm14 = vcmp.gt.f32.partialorder %v2583_v56, 0.0  ;;  %v2600_v13 = vmul.f32 0.01, %v2584_v29  ;;  %vm2592_vm15 = vcmp.gt.f32.partialorder %v2584_v29, 0.0 }
 0xa4c   : > { %3166 = vadd.xlane.f32.xlu1 %v3165_v8  ;;  %v2607_v26 = vsel %vm2591_vm14, %v2583_v56, %v2599_v58  ;;  %v2608_v24 = vsel %vm2592_vm15, %v2584_v29, %v2600_v13 }
 0xa4d   : > { %3157 = vadd.xlane.f32.xlu0 %v3156_v53  ;;  %v2615_v54 = vmul.f32 %v2607_v26, %v5787_v25  ;;  %v2616_v18 = vmul.f32 %v2608_v24, %v5725_v46  ;;  %v3172_v25 = vstv %s4710_s18  ;;  %s510_s18 = scalar_lea.vmem [#allocation5], %s509_s27 }
 0xa4f   : > { %v6275_v44 = vadd.f32 %v2615_v54, %v5796_v43  ;;  %v6280_v38 = vadd.f32 %v2616_v18, %v5753_v50 }
 0xa50   : > { %2564 = vadd.xlane.f32.xlu1 %v2563_v7 }
 0xa51   : > { %3163 = vadd.xlane.f32.xlu0 %v3162_v33 }
 0xa54   : > { %2570 = vadd.xlane.f32.xlu1 %v2569_v57 }
 0xa55   : > { %3169 = vadd.xlane.f32.xlu0 %v3168_v61 }
 0xa58   : > { %2576 = vadd.xlane.f32.xlu1 %v2575_v27 }
 0xa59   : > { %2567 = vadd.xlane.f32.xlu0 %v2566_v30 }
 0xa5d   : > { %2573 = vadd.xlane.f32.xlu0 %v2572_v55 }
 0xa61   : > { %2579 = vadd.xlane.f32.xlu0 %v2578_v63 }
 0xa69   : > { %2640 = vperm.xlu1 %5135, %v6275_v44  }
 0xa77   : > { %2643 = vperm.xlu0 %5136, %v6280_v38  }
 0xad1   : > { %v3149_v6 = vpop.xlane.xlu1 %3148 }
 0xad2   : > { %v3173_v12 = vadd.f32 %v3172_v25, %v3149_v6  ;;  %v3152_v23 = vpop.xlane.xlu0 %3151 }
 0xad3   : > { %v3174_v52 = vadd.f32 %v3172_v25, %v3152_v23 }
 0xad4   : > { %vm3181_vm3 = vcmp.gt.f32.partialorder %v3173_v12, 0.0  ;;  %v3189_v43 = vmul.f32 0.01, %v3173_v12 }
 0xad5   : > { %vm3182_vm4 = vcmp.gt.f32.partialorder %v3174_v52, 0.0  ;;  %v3190_v22 = vmul.f32 0.01, %v3174_v52  ;;  %v3161_v59 = vpop.xlane.xlu1 %3160 }
 0xad6   : > { %v3197_v4 = vsel %vm3181_vm3, %v3173_v12, %v3189_v43  ;;  %v3177_v11 = vadd.f32 %v3172_v25, %v3161_v59  ;;  %v3155_v51 = vpop.xlane.xlu0 %3154 }
 0xad7   : > { %v3205_v46 = vmul.f32 %v3197_v4, %v5723_v45  ;;  %v3198_v50 = vsel %vm3182_vm4, %v3174_v52, %v3190_v22  ;;  %v3175_v0 = vadd.f32 %v3172_v25, %v3155_v51 }
 0xad8   : > { %v3206_v8 = vmul.f32 %v3198_v50, %v5702_v32  ;;  %vm3185_vm5 = vcmp.gt.f32.partialorder %v3177_v11, 0.0  ;;  %v3193_v53 = vmul.f32 0.01, %v3177_v11 }
 0xad9   : > { %vm3183_vm14 = vcmp.gt.f32.partialorder %v3175_v0, 0.0  ;;  %v3191_v19 = vmul.f32 0.01, %v3175_v0  ;;  %v3167_v9 = vpop.xlane.xlu1 %3166  ;;  %v6286_v7 = vadd.f32 %v3205_v46, %v5732_v3 }
 0xada   : > { %v3179_v33 = vadd.f32 %v3172_v25, %v3167_v9  ;;  %v3158_v15 = vpop.xlane.xlu0 %3157  ;;  %v6289_v57 = vadd.f32 %v3206_v8, %v5708_v36  ;;  %v3201_v61 = vsel %vm3185_vm5, %v3177_v11, %v3193_v53 }
 0xadb   : > { %v3199_v1 = vsel %vm3183_vm14, %v3175_v0, %v3191_v19  ;;  %v3176_v45 = vadd.f32 %v3172_v25, %v3158_v15  ;;  %3230 = vperm.xlu1 %5135, %v6286_v7   ;;  %v3209_v3 = vmul.f32 %v3201_v61, %v5749_v31 }
 0xadc   : > { %v3207_v32 = vmul.f32 %v3199_v1, %v5704_v34  ;;  %3233 = vperm.xlu0 %5136, %v6289_v57   ;;  %v3195_v30 = vmul.f32 0.01, %v3179_v33  ;;  %vm3187_vm3 = vcmp.gt.f32.partialorder %v3179_v33, 0.0 }
 0xadd   : > { %vm3184_vm15 = vcmp.gt.f32.partialorder %v3176_v45, 0.0  ;;  %v3192_v27 = vmul.f32 0.01, %v3176_v45  ;;  %v2565_v56 = vpop.xlane.xlu1 %2564  ;;  %v6302_v24 = vadd.f32 %v3209_v3, %v5714_v40  ;;  %v6818_v3 = vld [vmem:[#allocation9_spill] sm:$0xff] }
 0xade   : > { %v2585_v58 = vadd.f32 %v6261_v21, %v2565_v56  ;;  %v3164_v55 = vpop.xlane.xlu0 %3163  ;;  %v6297_v36 = vadd.f32 %v3207_v32, %v5710_v37  ;;  %v3203_v62 = vsel %vm3187_vm3, %v3179_v33, %v3195_v30  ;;  %v6815_v33 = vld [vmem:[#allocation8_spill] sm:$0xff]  ;;  %v6819_v30 = vld [vmem:[#allocation14_spill] sm:$0xff] }
 0xadf   : > { %v3200_v26 = vsel %vm3184_vm15, %v3176_v45, %v3192_v27  ;;  %v3178_v63 = vadd.f32 %v3172_v25, %v3164_v55  ;;  %v3211_v43 = vmul.f32 %v3203_v62, %v5771_v10 }
 0xae0   : > { %3236 = vperm.xlu1 %5135, %v6297_v36   ;;  %v3208_v29 = vmul.f32 %v3200_v26, %v5706_v35  ;;  %v2601_v13 = vmul.f32 0.01, %v2585_v58  ;;  %vm2593_vm5 = vcmp.gt.f32.partialorder %v2585_v58, 0.0  ;;  %v6820_v26 = vld [vmem:[#allocation12_spill] sm:$0xff] }
 0xae1   : > { %vm3186_vm4 = vcmp.gt.f32.partialorder %v3178_v63, 0.0  ;;  %v3194_v34 = vmul.f32 0.01, %v3178_v63  ;;  %v2571_v54 = vpop.xlane.xlu1 %2570 }
 0xae2   : > { %v3170_v31 = vpop.xlane.xlu0 %3169  ;;  %v2587_v37 = vadd.f32 %v6261_v21, %v2571_v54  ;;  %v2609_v35 = vsel %vm2593_vm5, %v2585_v58, %v2601_v13  ;;  %v6309_v59 = vadd.f32 %v3208_v29, %v5712_v39  ;;  %v6822_v54 = vld [vmem:[#allocation15_spill] sm:$0xff] }
 0xae3   : > { %v3202_v18 = vsel %vm3186_vm4, %v3178_v63, %v3194_v34  ;;  %v3180_v6 = vadd.f32 %v3172_v25, %v3170_v31  ;;  %v2617_v39 = vmul.f32 %v2609_v35, %v5791_v28 }
 0xae4   : > { %v3210_v12 = vmul.f32 %v3202_v18, %v5760_v60  ;;  %3242 = vperm.xlu1 %5135, %v6302_v24   ;;  %v2603_v4 = vmul.f32 0.01, %v2587_v37  ;;  %vm2595_vm15 = vcmp.gt.f32.partialorder %v2587_v37, 0.0 }
 0xae5   : > { %vm3188_vm14 = vcmp.gt.f32.partialorder %v3180_v6, 0.0  ;;  %v3196_v23 = vmul.f32 0.01, %v3180_v6  ;;  %v2577_v52 = vpop.xlane.xlu1 %2576 }
 0xae6   : > { %v2568_v22 = vpop.xlane.xlu0 %2567  ;;  %v6312_v40 = vadd.f32 %v3210_v12, %v5716_v41  ;;  %v2589_v25 = vadd.f32 %v6261_v21, %v2577_v52  ;;  %v6321_v41 = vadd.f32 %v3211_v43, %v5780_v20  ;;  %v2611_v0 = vsel %vm2595_vm15, %v2587_v37, %v2603_v4 }
 0xae7   : > { %v3204_v11 = vsel %vm3188_vm14, %v3180_v6, %v3196_v23  ;;  %v2586_v60 = vadd.f32 %v6261_v21, %v2568_v22  ;;  %v2619_v20 = vmul.f32 %v2611_v0, %v5802_v49  ;;  %v6817_v49 = vld [vmem:[#allocation11_spill] sm:$0xff] }
 0xae8   : > { %v3212_v51 = vmul.f32 %v3204_v11, %v5776_v17  ;;  %3239 = vperm.xlu1 %5135, %v6309_v59   ;;  %3245 = vperm.xlu0 %5136, %v6312_v40   ;;  %v2605_v8 = vmul.f32 0.01, %v2589_v25  ;;  %vm2597_vm4 = vcmp.gt.f32.partialorder %v2589_v25, 0.0 }
 0xae9   : > { %vm2594_vm3 = vcmp.gt.f32.partialorder %v2586_v60, 0.0  ;;  %v2602_v10 = vmul.f32 0.01, %v2586_v60  ;;  %v2641_v29 = vpop.permute.xlu1 %2640 }
 0xaea   : > { %v2574_v46 = vpop.xlane.xlu0 %2573  ;;  %v6324_v50 = vadd.f32 %v3212_v51, %v5718_v42  ;;  %v6332_v42 = vadd.f32 %v2617_v39, %v5764_v2  ;;  %v2613_v61 = vsel %vm2597_vm4, %v2589_v25, %v2605_v8  ;;  %v6343_v2 = vadd.f32 %v2619_v20, %v6818_v3 }
 0xaeb   : > { %v2610_v53 = vsel %vm2594_vm3, %v2586_v60, %v2602_v10  ;;  %v2588_v17 = vadd.f32 %v6261_v21, %v2574_v46  ;;  %v2621_v56 = vmul.f32 %v2613_v61, %v6817_v49 }
 0xaec   : > { %v2618_v19 = vmul.f32 %v2610_v53, %v5735_v5  ;;  %3248 = vperm.xlu1 %5135, %v6321_v41   ;;  %3251 = vperm.xlu0 %5136, %v6324_v50   ;;  %v6816_v5 = vld [vmem:[#allocation10_spill] sm:$0xff] }
 0xaed   : > { %vm2596_vm5 = vcmp.gt.f32.partialorder %v2588_v17, 0.0  ;;  %v2604_v28 = vmul.f32 0.01, %v2588_v17 }
 0xaee   : > { %v2580_v9 = vpop.xlane.xlu0 %2579  ;;  %v6335_v15 = vadd.f32 %v2618_v19, %v6815_v33 }
 0xaef   : > { %v2612_v1 = vsel %vm2596_vm5, %v2588_v17, %v2604_v28  ;;  %v2590_v45 = vadd.f32 %v6261_v21, %v2580_v9  ;;  %v6821_v21 = vld [vmem:[#allocation13_spill] sm:$0xff]  ;;  %v2666_v28 = vrot.slane %v2641_v29, %v5565_v16 }
 0xaf0   : > { %v2620_v32 = vmul.f32 %v2612_v1, %v6816_v5  ;;  %2646 = vperm.xlu1 %5135, %v6332_v42   ;;  %2649 = vperm.xlu0 %5136, %v6335_v15   ;;  %v6352_v34 = vadd.f32 %v2621_v56, %v6821_v21 }
 0xaf1   : > { %vm2598_vm14 = vcmp.gt.f32.partialorder %v2590_v45, 0.0  ;;  %v2606_v27 = vmul.f32 0.01, %v2590_v45 }
 0xaf2   : > { %v6346_v58 = vadd.f32 %v2620_v32, %v6819_v30 }
 0xaf3   : > { %v2614_v55 = vsel %vm2598_vm14, %v2590_v45, %v2606_v27 }
 0xaf4   : > { %v2622_v63 = vmul.f32 %v2614_v55, %v6820_v26  ;;  %2652 = vperm.xlu1 %5135, %v6343_v2   ;;  %2655 = vperm.xlu0 %5136, %v6346_v58  }
 0xaf6   : > { %v6355_v62 = vadd.f32 %v2622_v63, %v6822_v54  ;;  %v2644_v31 = vpop.permute.xlu0 %2643 }
 0xaf7   : > { %v2670_v17 = vrot.slane %v2644_v31, %v5565_v16 }
 0xaf8   : > { %2658 = vperm.xlu1 %5135, %v6352_v34   ;;  %2661 = vperm.xlu0 %5136, %v6355_v62  }
 0xaf9   : > { %v2695_v45 = vsel %vm1117_vm7, %v2670_v17, %v2666_v28 }
 0xb5a   : > { %v3231_v13 = vpop.permute.xlu1 %3230 }
 0xb5b   : > { %v3234_v37 = vpop.permute.xlu0 %3233  ;;  %v3256_v52 = vrot.slane %v3231_v13, %v5565_v16 }
 0xb5c   : > { %v3260_v12 = vrot.slane %v3234_v37, %v5565_v16 }
 0xb5e   : > { %v3285_v22 = vsel %vm1117_vm7, %v3260_v12, %v3256_v52 }
 0xb5f   : > { %v3237_v18 = vpop.permute.xlu1 %3236 }
 0xb60   : > { %v3264_v23 = vrot.slane %v3237_v18, %v5565_v16 }
 0xb62   : > { %v3286_v11 = vsel %vm1119_vm6, %v3264_v23, %v3285_v22 }
 0xb63   : > { %v3243_v6 = vpop.permute.xlu1 %3242 }
 0xb64   : > { %v3272_v25 = vrot.slane %v3243_v6, %v5565_v16 }
 0xb67   : > { %v3240_v43 = vpop.permute.xlu1 %3239  ;;  %v3246_v35 = vpop.permute.xlu0 %3245 }
 0xb68   : > { %v3268_v4 = vrot.slane %v3240_v43, %v5565_v16  ;;  %v3276_v51 = vrot.slane %v3246_v35, %v5565_v16 }
 0xb6a   : > { %v3287_v60 = vsel %vm1121_vm8, %v3268_v4, %v3286_v11 }
 0xb6b   : > { %v3288_v10 = vsel %vm1123_vm9, %v3272_v25, %v3287_v60  ;;  %v3249_v39 = vpop.permute.xlu1 %3248  ;;  %v3252_v46 = vpop.permute.xlu0 %3251 }
 0xb6c   : > { %v3289_v0 = vsel %vm1125_vm10, %v3276_v51, %v3288_v10  ;;  %v3280_v8 = vrot.slane %v3249_v39, %v5565_v16  ;;  %v3284_v53 = vrot.slane %v3252_v46, %v5565_v16 }
 0xb6e   : > { %v3290_v19 = vsel %vm1127_vm11, %v3280_v8, %v3289_v0 }
 0xb6f   : > { %v2647_v20 = vpop.permute.xlu1 %2646  ;;  %v2650_v9 = vpop.permute.xlu0 %2649  ;;  %v3291_v33 = vsel %vm1129_vm12, %v3284_v53, %v3290_v19 }
 0xb70   : > { %v2674_v61 = vrot.slane %v2647_v20, %v5565_v16  ;;  %v3293_v1 = vsel %vm1132_vm13, %v3291_v33, -inf  ;;  %v2678_v5 = vrot.slane %v2650_v9, %v5565_v16 }
 0xb71   : > { %3294 = vmax.xlane.f32.xlu1 %v3293_v1 }
 0xb72   : > { %v2696_v32 = vsel %vm1119_vm6, %v2674_v61, %v2695_v45 }
 0xb73   : > { %v2653_v27 = vpop.permute.xlu1 %2652  ;;  %v2656_v49 = vpop.permute.xlu0 %2655  ;;  %v2697_v3 = vsel %vm1121_vm8, %v2678_v5, %v2696_v32 }
 0xb74   : > { %v2682_v56 = vrot.slane %v2653_v27, %v5565_v16  ;;  %v2686_v30 = vrot.slane %v2656_v49, %v5565_v16 }
 0xb76   : > { %v2698_v55 = vsel %vm1123_vm9, %v2682_v56, %v2697_v3 }
 0xb77   : > { %v2659_v26 = vpop.permute.xlu1 %2658  ;;  %v2662_v63 = vpop.permute.xlu0 %2661  ;;  %v2699_v29 = vsel %vm1125_vm10, %v2686_v30, %v2698_v55 }
 0xb78   : > { %v2690_v21 = vrot.slane %v2659_v26, %v5565_v16  ;;  %v2694_v54 = vrot.slane %v2662_v63, %v5565_v16 }
 0xb7a   : > { %v2700_v13 = vsel %vm1127_vm11, %v2690_v21, %v2699_v29 }
 0xb7b   : > { %v2701_v31 = vsel %vm1129_vm12, %v2694_v54, %v2700_v13 }
 0xb7c   : > { %v2703_v18 = vsel %vm1132_vm13, %v2701_v31, -inf }
 0xb7d   : > { %2704 = vmax.xlane.f32.xlu0 %v2703_v18 }
 0xbfe   : > { %v3295_v37 = vpop.xlane.xlu1 %3294 }
 0xbff   : > { %v3296_v6 = vrot.slane %v3295_v37, 4 }
 0xc01   : > { %v3297_v12 = vmax.f32 %v3295_v37, %v3296_v6 }
 0xc03   : > { %v3298_v23 = vrot.slane %v3297_v12, 2 }
 0xc05   : > { %v3299_v43 = vmax.f32 %v3297_v12, %v3298_v23 }
 0xc07   : > { %v3300_v4 = vrot.slane %v3299_v43, 1 }
 0xc09   : > { %v3301_v60 = vmax.f32 %v3299_v43, %v3300_v4 }
 0xc0a   : > { %v2705_v52 = vpop.xlane.xlu0 %2704 }
 0xc0b   : > { %v2706_v35 = vrot.slane %v2705_v52, 4  ;;  %v3303_v39 = vsub.f32 %v6289_v57, %v3301_v60  ;;  %v3302_v8 = vsub.f32 %v6286_v7, %v3301_v60  ;;  %v3304_v19 = vsub.f32 %v6297_v36, %v3301_v60 }
 0xc0c   : > { %v3305_v20 = vsub.f32 %v6309_v59, %v3301_v60  ;;  %v3306_v33 = vsub.f32 %v6302_v24, %v3301_v60  ;;  %v3308_v7 = vsub.f32 %v6321_v41, %v3301_v60  ;;  %v3309_v36 = vsub.f32 %v6324_v50, %v3301_v60 }
 0xc0d   : > { %v2707_v22 = vmax.f32 %v2705_v52, %v2706_v35  ;;  %v3312_v28 = vmul.f32 1.442695, %v3303_v39  ;;  %v3310_v9 = vmul.f32 1.442695, %v3302_v8  ;;  %v3314_v57 = vmul.f32 1.442695, %v3304_v19 }
 0xc0e   : > { %v3318_v61 = vmul.f32 1.442695, %v3306_v33  ;;  %v3322_v24 = vmul.f32 1.442695, %v3308_v7  ;;  %v3324_v41 = vmul.f32 1.442695, %v3309_v36 }
 0xc0f   : > { %v2708_v11 = vrot.slane %v2707_v22, 2 }
 0xc11   : > { %v2709_v25 = vmax.f32 %v2707_v22, %v2708_v11 }
 0xc13   : > { %v2710_v51 = vrot.slane %v2709_v25, 1 }
 0xc15   : > { %v2711_v10 = vmax.f32 %v2709_v25, %v2710_v51 }
 0xc17   : > { %v2712_v46 = vsub.f32 %v6275_v44, %v2711_v10  ;;  %v2713_v0 = vsub.f32 %v6280_v38, %v2711_v10  ;;  %v3307_v44 = vsub.f32 %v6312_v40, %v3301_v60  ;;  %v3316_v38 = vmul.f32 1.442695, %v3305_v20 }
 0xc18   : > { %v2714_v40 = vsub.f32 %v6332_v42, %v2711_v10  ;;  %v2715_v5 = vsub.f32 %v6335_v15, %v2711_v10  ;;  %v2716_v27 = vsub.f32 %v6343_v2, %v2711_v10  ;;  %v2717_v42 = vsub.f32 %v6346_v58, %v2711_v10 }
 0xc19   : > { %v2720_v53 = vmul.f32 1.442695, %v2712_v46  ;;  %v2722_v17 = vmul.f32 1.442695, %v2713_v0  ;;  %v3320_v1 = vmul.f32 1.442695, %v3307_v44  ;;  %v2718_v15 = vsub.f32 %v6352_v34, %v2711_v10 }
 0xc1a   : > { %v2724_v49 = vmul.f32 1.442695, %v2714_v40  ;;  %v2726_v56 = vmul.f32 1.442695, %v2715_v5  ;;  %v2728_v55 = vmul.f32 1.442695, %v2716_v27  ;;  %v2719_v2 = vsub.f32 %v6355_v62, %v2711_v10 }
 0xc1b   : > { %5219 = vpow2.f32 %v2720_v53  ;;  %v2730_v26 = vmul.f32 1.442695, %v2717_v42  ;;  %v2732_v21 = vmul.f32 1.442695, %v2718_v15 }
 0xc1c   : > { %5221 = vpow2.f32 %v2722_v17  ;;  %v2734_v34 = vmul.f32 1.442695, %v2719_v2 }
 0xc1d   : > { %5223 = vpow2.f32 %v3312_v28 }
 0xc1e   : > { %5225 = vpow2.f32 %v3310_v9 }
 0xc1f   : > { %5227 = vpow2.f32 %v3314_v57 }
 0xc20   : > { %5229 = vpow2.f32 %v3316_v38 }
 0xc21   : > { %5231 = vpow2.f32 %v3318_v61 }
 0xc22   : > { %5233 = vpow2.f32 %v3320_v1 }
 0xc23   : > { %5235 = vpow2.f32 %v3322_v24 }
 0xc24   : > { %5237 = vpow2.f32 %v3324_v41 }
 0xc25   : > { %v6401_v45 = vpop.eup %5219  ;;  %5239 = vpow2.f32 %v2724_v49 }
 0xc26   : > { %v6403_v59 = vpop.eup %5221  ;;  %2745 = vperm.xlu1 %5135, %v6401_v45   ;;  %5241 = vpow2.f32 %v2726_v56 }
 0xc27   : > { %2748 = vperm.xlu0 %5136, %v6403_v59   ;;  %v6409_v32 = vpop.eup %5223  ;;  %5243 = vpow2.f32 %v2728_v55 }
 0xc28   : > { %v6411_v50 = vpop.eup %5225  ;;  %5245 = vpow2.f32 %v2730_v26 }
 0xc29   : > { %v6417_v3 = vpop.eup %5227  ;;  %5247 = vpow2.f32 %v2732_v21 }
 0xc2a   : > { %3338 = vperm.xlu1 %5135, %v6409_v32   ;;  %v6419_v30 = vpop.eup %5229  ;;  %5249 = vpow2.f32 %v2734_v34 }
 0xc2b   : > { %3335 = vperm.xlu0 %5136, %v6411_v50   ;;  %v6425_v63 = vpop.eup %5231 }
 0xc2c   : > { %v6427_v58 = vpop.eup %5233 }
 0xc2d   : > { %v6431_v54 = vpop.eup %5235 }
 0xc2e   : > { %3341 = vperm.xlu1 %5135, %v6417_v3   ;;  %v6433_v29 = vpop.eup %5237 }
 0xc2f   : > { %3344 = vperm.xlu0 %5136, %v6419_v30   ;;  %v6437_v62 = vpop.eup %5239 }
 0xc30   : > { %v6439_v13 = vpop.eup %5241 }
 0xc31   : > { %v6443_v31 = vpop.eup %5243 }
 0xc32   : > { %3347 = vperm.xlu1 %5135, %v6425_v63   ;;  %v6445_v18 = vpop.eup %5245 }
 0xc33   : > { %3350 = vperm.xlu0 %5136, %v6427_v58   ;;  %v6449_v37 = vpop.eup %5247 }
 0xc34   : > { %v6451_v6 = vpop.eup %5249 }
 0xc36   : > { %3353 = vperm.xlu1 %5135, %v6431_v54  }
 0xc37   : > { %3356 = vperm.xlu0 %5136, %v6433_v29  }
 0xc3a   : > { %2751 = vperm.xlu1 %5135, %v6437_v62  }
 0xc3b   : > { %2754 = vperm.xlu0 %5136, %v6439_v13  }
 0xc3e   : > { %2757 = vperm.xlu1 %5135, %v6443_v31  }
 0xc3f   : > { %2760 = vperm.xlu0 %5136, %v6445_v18  }
 0xc42   : > { %2763 = vperm.xlu1 %5135, %v6449_v37  }
 0xc43   : > { %2766 = vperm.xlu0 %5136, %v6451_v6  }
 0xca5   : > { %v2746_v12 = vpop.permute.xlu1 %2745 }
 0xca6   : > { %v2749_v23 = vpop.permute.xlu0 %2748  ;;  %v2771_v33 = vrot.slane %v2746_v12, %v5565_v16 }
 0xca7   : > { %v2775_v9 = vrot.slane %v2749_v23, %v5565_v16 }
 0xca9   : > { %v3339_v52 = vpop.permute.xlu1 %3338  ;;  %v2800_v40 = vsel %vm1117_vm7, %v2775_v9, %v2771_v33 }
 0xcaa   : > { %v3336_v43 = vpop.permute.xlu0 %3335  ;;  %v3365_v22 = vrot.slane %v3339_v52, %v5565_v16 }
 0xcab   : > { %v3361_v35 = vrot.slane %v3336_v43, %v5565_v16 }
 0xcad   : > { %v3342_v4 = vpop.permute.xlu1 %3341  ;;  %v3390_v60 = vsel %vm1117_vm7, %v3365_v22, %v3361_v35 }
 0xcae   : > { %v3345_v11 = vpop.permute.xlu0 %3344  ;;  %v3369_v25 = vrot.slane %v3342_v4, %v5565_v16 }
 0xcaf   : > { %v3373_v51 = vrot.slane %v3345_v11, %v5565_v16 }
 0xcb0   : > { %v3391_v10 = vsel %vm1119_vm6, %v3369_v25, %v3390_v60 }
 0xcb1   : > { %v3348_v39 = vpop.permute.xlu1 %3347  ;;  %v3392_v53 = vsel %vm1121_vm8, %v3373_v51, %v3391_v10 }
 0xcb2   : > { %v3351_v46 = vpop.permute.xlu0 %3350  ;;  %v3377_v0 = vrot.slane %v3348_v39, %v5565_v16 }
 0xcb3   : > { %v3381_v8 = vrot.slane %v3351_v46, %v5565_v16 }
 0xcb4   : > { %v3393_v17 = vsel %vm1123_vm9, %v3377_v0, %v3392_v53 }
 0xcb5   : > { %v3354_v19 = vpop.permute.xlu1 %3353  ;;  %v3394_v44 = vsel %vm1125_vm10, %v3381_v8, %v3393_v17 }
 0xcb6   : > { %v3357_v28 = vpop.permute.xlu0 %3356  ;;  %v3385_v20 = vrot.slane %v3354_v19, %v5565_v16 }
 0xcb7   : > { %v3389_v57 = vrot.slane %v3357_v28, %v5565_v16 }
 0xcb8   : > { %v3395_v38 = vsel %vm1127_vm11, %v3385_v20, %v3394_v44 }
 0xcb9   : > { %v2752_v7 = vpop.permute.xlu1 %2751  ;;  %v3396_v61 = vsel %vm1129_vm12, %v3389_v57, %v3395_v38 }
 0xcba   : > { %v2755_v36 = vpop.permute.xlu0 %2754  ;;  %v2779_v1 = vrot.slane %v2752_v7, %v5565_v16  ;;  %v3398_v24 = vsel %vm1132_vm13, %v3396_v61, 0.0 }
 0xcbb   : > { %v2783_v41 = vrot.slane %v2755_v36, %v5565_v16  ;;  %3399 = vadd.xlane.f32.xlu1 %v3398_v24 }
 0xcbc   : > { %v2801_v5 = vsel %vm1119_vm6, %v2779_v1, %v2800_v40 }
 0xcbd   : > { %v2758_v27 = vpop.permute.xlu1 %2757  ;;  %v2802_v15 = vsel %vm1121_vm8, %v2783_v41, %v2801_v5 }
 0xcbe   : > { %v2761_v49 = vpop.permute.xlu0 %2760  ;;  %v2787_v42 = vrot.slane %v2758_v27, %v5565_v16 }
 0xcbf   : > { %v2791_v56 = vrot.slane %v2761_v49, %v5565_v16 }
 0xcc0   : > { %v2803_v55 = vsel %vm1123_vm9, %v2787_v42, %v2802_v15 }
 0xcc1   : > { %v2764_v2 = vpop.permute.xlu1 %2763  ;;  %v2804_v12 = vsel %vm1125_vm10, %v2791_v56, %v2803_v55 }
 0xcc2   : > { %v2767_v26 = vpop.permute.xlu0 %2766  ;;  %v2795_v21 = vrot.slane %v2764_v2, %v5565_v16 }
 0xcc3   : > { %v2799_v34 = vrot.slane %v2767_v26, %v5565_v16 }
 0xcc4   : > { %v2805_v23 = vsel %vm1127_vm11, %v2795_v21, %v2804_v12 }
 0xcc5   : > { %v2806_v52 = vsel %vm1129_vm12, %v2799_v34, %v2805_v23 }
 0xcc6   : > { %v2808_v43 = vsel %vm1132_vm13, %v2806_v52, 0.0 }
 0xcc7   : > { %2809 = vadd.xlane.f32.xlu0 %v2808_v43 }
 0xd48   : > { %v3400_v35 = vpop.xlane.xlu1 %3399 }
 0xd49   : > { %v3401_v22 = vrot.slane %v3400_v35, 4 }
 0xd4b   : > { %v3402_v4 = vadd.f32 %v3401_v22, %v3400_v35 }
 0xd4d   : > { %v3403_v11 = vrot.slane %v3402_v4, 2 }
 0xd4f   : > { %v3404_v25 = vadd.f32 %v3403_v11, %v3402_v4 }
 0xd51   : > { %v3405_v10 = vrot.slane %v3404_v25, 1 }
 0xd53   : > { %v3406_v0 = vadd.f32 %v3405_v10, %v3404_v25 }
 0xd54   : > { %v2810_v60 = vpop.xlane.xlu0 %2809 }
 0xd55   : > { %v2811_v51 = vrot.slane %v2810_v60, 4  ;;  %5251 = vrcp.f32 %v3406_v0 }
 0xd57   : > { %v2812_v39 = vadd.f32 %v2811_v51, %v2810_v60 }
 0xd59   : > { %v2813_v46 = vrot.slane %v2812_v39, 2 }
 0xd5b   : > { %v2814_v8 = vadd.f32 %v2813_v46, %v2812_v39 }
 0xd5d   : > { %v2815_v53 = vrot.slane %v2814_v8, 1 }
 0xd5f   : > { %v2816_v17 = vadd.f32 %v2815_v53, %v2814_v8  ;;  %v5252_v19 = vpop.eup %5251 }
 0xd60   : > { %v3409_v33 = vmul.f32 %v5252_v19, %v6409_v32  ;;  %v3408_v57 = vmul.f32 %v5252_v19, %v6411_v50  ;;  %v3410_v7 = vmul.f32 %v5252_v19, %v6417_v3  ;;  %v3411_v61 = vmul.f32 %v5252_v19, %v6419_v30 }
 0xd61   : > { %5253 = vrcp.f32 %v2816_v17  ;;  %v3414_v3 = vmul.f32 %v5252_v19, %v6431_v54  ;;  %v3415_v30 = vmul.f32 %v5252_v19, %v6433_v29 }
 0xd62   : > { %v3417_v24 = vpack.c.bf16 %v3409_v33, %v3409_v33  ;;  %v3416_v40 = vpack.c.bf16 %v3408_v57, %v3408_v57  ;;  %v3418_v5 = vpack.c.bf16 %v3410_v7, %v3410_v7  ;;  %v3419_v50 = vpack.c.bf16 %v3411_v61, %v3411_v61 }
 0xd63   : > { %v3422_v15 = vpack.c.bf16 %v3414_v3, %v3414_v3 }
 0xd64   : > { %v3433_v41 = vunpack.c.l.b16 %v3417_v24  ;;  %v3432_v32 = vunpack.c.l.b16 %v3416_v40  ;;  %v3434_v27 = vunpack.c.l.b16 %v3418_v5  ;;  %v3435_v49 = vunpack.c.l.b16 %v3419_v50 }
 0xd65   : > { %v3438_v21 = vunpack.c.l.b16 %v3422_v15 }
 0xd6b   : > { %v5254_v28 = vpop.eup %5253 }
 0xd6c   : > { %v2819_v20 = vmul.f32 %v5254_v28, %v6403_v59  ;;  %v2818_v9 = vmul.f32 %v5254_v28, %v6401_v45  ;;  %v3412_v59 = vmul.f32 %v5252_v19, %v6425_v63  ;;  %v3413_v45 = vmul.f32 %v5252_v19, %v6427_v58 }
 0xd6d   : > { %v3423_v63 = vpack.c.bf16 %v3415_v30, %v3415_v30  ;;  %v2820_v2 = vmul.f32 %v5254_v28, %v6437_v62  ;;  %v2821_v26 = vmul.f32 %v5254_v28, %v6439_v13  ;;  %v2822_v12 = vmul.f32 %v5254_v28, %v6443_v31 }
 0xd6e   : > { %v2827_v44 = vpack.c.bf16 %v2819_v20, %v2819_v20  ;;  %v2826_v38 = vpack.c.bf16 %v2818_v9, %v2818_v9  ;;  %v3420_v42 = vpack.c.bf16 %v3412_v59, %v3412_v59  ;;  %v3421_v56 = vpack.c.bf16 %v3413_v45, %v3413_v45 }
 0xd6f   : > { %v3439_v54 = vunpack.c.l.b16 %v3423_v63  ;;  %v2828_v34 = vpack.c.bf16 %v2820_v2, %v2820_v2  ;;  %v2829_v29 = vpack.c.bf16 %v2821_v26, %v2821_v26  ;;  %v2823_v23 = vmul.f32 %v5254_v28, %v6445_v18 }
 0xd70   : > { %v3558_v36 = vunpack.c.l.b16 %v2827_v44  ;;  %v3557_v1 = vunpack.c.l.b16 %v2826_v38  ;;  %v3436_v55 = vunpack.c.l.b16 %v3420_v42  ;;  %v3437_v58 = vunpack.c.l.b16 %v3421_v56 }
 0xd71   : > { %v2824_v52 = vmul.f32 %v5254_v28, %v6449_v37  ;;  %v2825_v43 = vmul.f32 %v5254_v28, %v6451_v6  ;;  %v3559_v35 = vunpack.c.l.b16 %v2828_v34  ;;  %v3560_v62 = vunpack.c.l.b16 %v2829_v29  ;;  %v5161_v37 = vld [vmem:[%s6778_s8] sm:$0xff]  }
 0xd72   : > { %3569 = vperm.xlu0 %5136, %v3558_v36   ;;  %3566 = vperm.xlu1 %5135, %v3557_v1   ;;  %v2830_v22 = vpack.c.bf16 %v2822_v12, %v2822_v12  ;;  %v2831_v13 = vpack.c.bf16 %v2823_v23, %v2823_v23  ;;  %v3632_v56 = vsel %vm2071_vm2, %v6140_v48, 0  ;;  %vm3938_vm2 = vcmask 130048  }
 0xd73   : > { %v2832_v25 = vpack.c.bf16 %v2824_v52, %v2824_v52  ;;  %v2833_v60 = vpack.c.bf16 %v2825_v43, %v2825_v43  ;;  %4986 = vmatpush3.bf16.msra.mxu1 %v5161_v37  ;;  %v5162_v52 = vld [vmem:[%s6778_s8 + $0x20] sm:$0xff]  }
 0xd74   : > { %v3561_v4 = vunpack.c.l.b16 %v2830_v22  ;;  %v3562_v11 = vunpack.c.l.b16 %v2831_v13  ;;  %4987 = vmatprep.subr.bf16.mxu1 %v6814_v47  ;;  %v6565_v22 = vld [vmem:[%s514_s26] sm:$0xff]  ;;  %s4481_s26 = scalar_lea.sflag [#allocation3], %s509_s27 }
 0xd75   : > { %v3563_v31 = vunpack.c.l.b16 %v2832_v25  ;;  %v3564_v18 = vunpack.c.l.b16 %v2833_v60  ;;  %v5165_v25 = vld [vmem:[%s6778_s8 + $0x10] sm:$0xff]   ;;  %v4713_v37 = vld [vmem:[%s6779_s9] ss:$0 sm:$0xff] }
 0xd76   : > { %3444 = vperm.xlu1 %5135, %v3433_v41   ;;  %3441 = vperm.xlu0 %5136, %v3432_v32  }
 0xd7a   : > { %3447 = vperm.xlu1 %5135, %v3434_v27   ;;  %3450 = vperm.xlu0 %5136, %v3435_v49  }
 0xd7e   : > { %3453 = vperm.xlu1 %5135, %v3436_v55   ;;  %3456 = vperm.xlu0 %5136, %v3437_v58  }
 0xd82   : > { %3459 = vperm.xlu1 %5135, %v3438_v21   ;;  %3462 = vperm.xlu0 %5136, %v3439_v54  }
 0xd86   : > { %3572 = vperm.xlu1 %5135, %v3559_v35   ;;  %3575 = vperm.xlu0 %5136, %v3560_v62   ;;  %v5164_v35 = vld [vmem:[%s6778_s8 + $0x28] sm:$0xff]  }
 0xd8a   : > { %3578 = vperm.xlu1 %5135, %v3561_v4   ;;  %3581 = vperm.xlu0 %5136, %v3562_v11  }
 0xd8e   : > { %3584 = vperm.xlu1 %5135, %v3563_v31   ;;  %3587 = vperm.xlu0 %5136, %v3564_v18   ;;  %v5166_v18 = vld [vmem:[%s6778_s8 + $0x18] sm:$0xff]  }
 0xdf1   : > { %v3570_v6 = vpop.permute.xlu0 %3569  ;;  %v3567_v51 = vpop.permute.xlu1 %3566 }
 0xdf2   : > { %v3596_v40 = vrot.slane %v3570_v6, %v5565_v16  ;;  %v3592_v59 = vrot.slane %v3567_v51, %v5565_v16  ;;  %v4731_v51 = vld [vmem:[%s6779_s9 + $0x2] ss:$0 sm:$0xff] }
 0xdf4   : > { %v3621_v27 = vsel %vm1117_vm7, %v3596_v40, %v3592_v59 }
 0xdf5   : > { %v3442_v10 = vpop.permute.xlu0 %3441  ;;  %v3445_v39 = vpop.permute.xlu1 %3444 }
 0xdf6   : > { %v3467_v46 = vrot.slane %v3442_v10, %v5565_v16  ;;  %v3471_v0 = vrot.slane %v3445_v39, %v5565_v16 }
 0xdf8   : > { %v3496_v19 = vsel %vm1117_vm7, %v3471_v0, %v3467_v46 }
 0xdf9   : > { %v3451_v8 = vpop.permute.xlu0 %3450  ;;  %v3448_v53 = vpop.permute.xlu1 %3447 }
 0xdfa   : > { %v3475_v17 = vrot.slane %v3448_v53, %v5565_v16  ;;  %v3479_v28 = vrot.slane %v3451_v8, %v5565_v16 }
 0xdfc   : > { %v3497_v20 = vsel %vm1119_vm6, %v3475_v17, %v3496_v19 }
 0xdfd   : > { %v3457_v9 = vpop.permute.xlu0 %3456  ;;  %v3454_v33 = vpop.permute.xlu1 %3453  ;;  %v3498_v38 = vsel %vm1121_vm8, %v3479_v28, %v3497_v20 }
 0xdfe   : > { %v3483_v57 = vrot.slane %v3454_v33, %v5565_v16  ;;  %v3487_v44 = vrot.slane %v3457_v9, %v5565_v16 }
 0xe00   : > { %v3499_v7 = vsel %vm1123_vm9, %v3483_v57, %v3498_v38 }
 0xe01   : > { %v3463_v61 = vpop.permute.xlu0 %3462  ;;  %v3460_v36 = vpop.permute.xlu1 %3459  ;;  %v3500_v45 = vsel %vm1125_vm10, %v3487_v44, %v3499_v7  ;;  %v4722_v44 = vld [vmem:[%s6779_s9 + $0x1] ss:$0 sm:$0xff] }
 0xe02   : > { %v3495_v1 = vrot.slane %v3463_v61, %v5565_v16  ;;  %v3491_v24 = vrot.slane %v3460_v36, %v5565_v16 }
 0xe04   : > { %v3501_v41 = vsel %vm1127_vm11, %v3491_v24, %v3500_v45  ;;  %v3676_v45 = vld [vmem:[%s526_s1] sm:$0x1]  ;;  %s4493_s1 = sshll.u32 %s510_s18, 4  ;;  %s6730_s1 = int_to_ptr.vmem [resolvable:$true] %s4493_s1 }
 0xe05   : > { %v3502_v32 = vsel %vm1129_vm12, %v3495_v1, %v3501_v41  ;;  %v3576_v5 = vpop.permute.xlu0 %3575  ;;  %v3573_v50 = vpop.permute.xlu1 %3572  ;;  %v3928_v41 = vsub.f32 1.0, %v3676_v45  ;;  %v5173_v45 = vld [vmem:[%s6783_s13 + $0x10] sm:$0xff]   ;;  %s5290_s25 = scalar_lea.vmem %s6730_s1, 16  ;;  %p5297_p13 = scmp.lt.s32.totalorder %s6730_s1, %s5295_s0 }
 0xe06   : > { %v3503_v3 = vpack.c.b16 %v3502_v32, %v3502_v32  ;;  %v3600_v30 = vrot.slane %v3573_v50, %v5565_v16  ;;  %v3604_v49 = vrot.slane %v3576_v5, %v5565_v16  ;;  %p5291_p10 = scmp.ne.s32.totalorder %s6730_s1, %s5290_s25  ;;  %p5298_p0 = scmp.lt.s32.totalorder %s5296_s2, %s5290_s25 }
 0xe07   : > { %v3929_v32 = vmul.f32 -1e+30, %v3928_v41  ;;  %v5174_v41 = vld [vmem:[%s6783_s13 + $0x18] sm:$0xff]  }
 0xe08   : > { %v3622_v42 = vsel %vm1119_vm6, %v3600_v30, %v3621_v27  ;;  %4976 = vmatmul.mubr.msk.bf16.vlgmr.msra.gmra.mrb[24].mxu0 %vm1132_vm13, %v3503_v3  ;;  %p5292_p11 = pnand %p5291_p10, %p5477_p5  ;;  %p5299_p1 = por %p5298_p0, %p5297_p13 }
 0xe09   : > { %4980 = vmatpush3.bf16.msra.mxu0 %v3632_v56  ;;  %v3582_v15 = vpop.permute.xlu0 %3581  ;;  %v3579_v63 = vpop.permute.xlu1 %3578  ;;  %4981 = vmatprep.mubr.msk.bf16.mxu0 %vm5360_vm0, %v6814_v47  ;;  %v3623_v2 = vsel %vm1121_vm8, %v3604_v49, %v3622_v42  ;;  %v3934_v5 = vrot.slane %v3929_v32, %v5561_v14  ;;  %v5175_v32 = vld [vmem:[%s6783_s13 + $0x20] sm:$0xff]  }
 0xe0a   : > { %v3608_v55 = vrot.slane %v3579_v63, %v5565_v16  ;;  %5001 = vmatprep.subr.bf16.mxu0 %v6814_v47  ;;  %v3612_v58 = vrot.slane %v3582_v15, %v5565_v16  ;;  %p5293_p12 = pneg %p5292_p11 }
 0xe0c   : > { %v3624_v26 = vsel %vm1123_vm9, %v3608_v55, %v3623_v2  ;;  %p5300_p2 = pnand %p5299_p1, %p5293_p12 }
 0xe0d   : > { %v3588_v21 = vpop.permute.xlu0 %3587  ;;  %v3585_v54 = vpop.permute.xlu1 %3584  ;;  %v3625_v29 = vsel %vm1125_vm10, %v3612_v58, %v3624_v26 }
 0xe0e   : > { %v3620_v48 = vrot.slane %v3588_v21, %v5565_v16  ;;  %v3616_v34 = vrot.slane %v3585_v54, %v5565_v16  ;;  %v5163_v16 = vld [vmem:[%s6778_s8 + $0x8] sm:$0xff]  }
 0xe0f   : > { %4988 = vmatpush3.bf16.msra.mxu1 %v5163_v16 }
 0xe10   : > { %v3626_v12 = vsel %vm1127_vm11, %v3616_v34, %v3625_v29  ;;  %4993 = vmatprep.subr.bf16.mxu1 %v6814_v47 }
 0xe11   : > { %v3627_v23 = vsel %vm1129_vm12, %v3620_v48, %v3626_v12 }
 0xe12   : > { %v3628_v43 = vpack.c.b16 %v3627_v23, %v3627_v23  ;;  %v5167_v23 = vld [vmem:[%s6778_s8 + $0x30] sm:$0xff]  }
 0xe14   : > { %4982 = vmatmul.mubr.msk.bf16.vlgmr.msra.gmra.mrb[24].mxu0 %vm1132_vm13, %v3628_v43 }
 0xe15   : > { %5002 = vmatpush3.bf16.msra.mxu0 %v5162_v52  ;;  %5005 = vmatprep.mubr.msk.bf16.mxu0 %vm5360_vm0, %v6814_v47 }
 0xe16   : > { %5003 = vmatprep.subr.bf16.mxu0 %v6814_v47 }
 0xe19   : > { %5004 = vmatpush3.bf16.msra.mxu0 %v5164_v35 }
 0xe1a   : > { %5015 = vmatprep.subr.bf16.mxu0 %v6814_v47 }
 0xee7   : > { %v6563_v62 = vpop.f32.mrb[24].mxu0 }
 0xee8   : > { %v3674_v13 = vmax.f32 %v6563_v62, 0.0  ;;  %v4983_v4 = vpop.f32.mrb[25].mxu0 }
 0xee9   : > { %v3671_v11 = vpop.f32.mrb[26].mxu0 }
 0xeea   : > { %v3677_v60 = vpack.c.bf16 %v3674_v13, %v6565_v22  ;;  %v4984_v31 = vpop.f32.mrb[27].mxu0 }
 0xeec   : > { %4990 = vmatmul.mubr.msk.bf16.vlgmr.msra.gmra.mrb[28].mxu1 %vm554_vm1, %v3677_v60  ;;  %5006 = vmatmul.mubr.msk.bf16.vlgmr.msra.gmra.mrb[28].mxu0 %vm554_vm1, %v3677_v60 }
 0xeed   : > { %4994 = vmatpush3.bf16.msra.mxu1 %v5165_v25  ;;  %4997 = vmatprep.mubr.msk.bf16.mxu1 %vm5360_vm0, %v6814_v47 }
 0xeee   : > { %4995 = vmatprep.subr.bf16.mxu1 %v6814_v47  ;;  %5017 = vmatprep.mubr.msk.bf16.mxu0 %vm5360_vm0, %v6814_v47 }
 0xef1   : > { %4996 = vmatpush3.bf16.msra.mxu1 %v5166_v18 }
 0xef2   : > { %5009 = vmatprep.subr.bf16.mxu1 %v6814_v47 }
 0xef4   : > { %4998 = vmatmul.mubr.msk.bf16.vlgmr.msra.gmra.mrb[32].mxu1 %vm554_vm1, %v3677_v60  ;;  %v5168_v60 = vld [vmem:[%s6778_s8 + $0x38] sm:$0xff]  }
 0xef5   : > { %5011 = vmatprep.mubr.msk.bf16.mxu1 %vm5360_vm0, %v6814_v47 }
 0xfbf   : > { %v3738_v6 = vpop.f32.mrb[28].mxu1  ;;  %v3870_v10 = vpop.f32.mrb[28].mxu0 }
 0xfc0   : > { %v4991_v39 = vpop.f32.mrb[29].mxu1  ;;  %v5007_v46 = vpop.f32.mrb[29].mxu0  ;;  %v3739_v53 = vadd.f32 %v4713_v37, %v3738_v6  ;;  %v3871_v17 = vadd.f32 %v4731_v51, %v3870_v10  ;;  %v4742_v10 = vld [vmem:[%s6779_s9 + $0x3] ss:$0 sm:$0xff] }
 0xfc1   : > { %v3741_v0 = vpop.f32.mrb[30].mxu1  ;;  %v3873_v8 = vpop.f32.mrb[30].mxu0 }
 0xfc2   : > { %v3742_v19 = vadd.f32 %v4713_v37, %v3741_v0  ;;  %v3874_v28 = vadd.f32 %v4731_v51, %v3873_v8  ;;  %v4992_v20 = vpop.f32.mrb[31].mxu1  ;;  %v5008_v9 = vpop.f32.mrb[31].mxu0 }
 0xfc4   : > { %v3877_v33 = vpack.c.bf16 %v3742_v19, %v3739_v53  ;;  %v3962_v57 = vpack.c.bf16 %v3874_v28, %v3871_v17 }
 0xfc6   : > { %5016 = vmatpush3.bf16.msra.mxu0 %v3962_v57 }
 0xfc7   : > { %v3804_v38 = vpop.f32.mrb[32].mxu1  ;;  %5029 = vmatprep.subr.bf16.mxu0 %v6814_v47 }
 0xfc8   : > { %v4999_v7 = vpop.f32.mrb[33].mxu1  ;;  %v3805_v36 = vadd.f32 %v4722_v44, %v3804_v38 }
 0xfc9   : > { %v3807_v61 = vpop.f32.mrb[34].mxu1 }
 0xfca   : > { %v3808_v1 = vadd.f32 %v4722_v44, %v3807_v61  ;;  %v5000_v24 = vpop.f32.mrb[35].mxu1 }
 0xfcb   : > { %v5170_v24 = vld [vmem:[%s6781_s11 + $0x8] sm:$0xff]  }
 0xfcc   : > { %v3878_v40 = vpack.c.bf16 %v3808_v1, %v3805_v36 }
 0xfce   : > { %v3883_v59 = vsel %vm554_vm1, %v3878_v40, 0  ;;  %v5171_v40 = vld [vmem:[%s6783_s13] sm:$0xff]  }
 0xfcf   : > { %5010 = vmatpush3.bf16.xpose.msra.mxu1 %v3883_v59  ;;  %v5172_v59 = vld [vmem:[%s6783_s13 + $0x8] sm:$0xff]  }
 0xfd0   : > { %5021 = vmatprep.subr.bf16.mxu1 %v6814_v47 }
 0xfd6   : > { %5012 = vmatmul.mubr.msk.bf16.vlgmr.msra.gmra.mrb[36].mxu1 %vm554_vm1, %v3877_v33 }
 0xfd7   : > { %5025 = vmatprep.mubr.msk.bf16.mxu1 %vm5360_vm0, %v6814_v47  ;;  %5022 = vmatpush3.bf16.msra.mxu1 %v5167_v23 }
 0xfd8   : > { %5023 = vmatprep.subr.bf16.mxu1 %v6814_v47 }
 0xfdb   : > { %5024 = vmatpush3.bf16.msra.mxu1 %v5168_v60 }
 0xfdc   : > { %5037 = vmatprep.subr.bf16.mxu1 %v6814_v47 }
0x10a9   : > { %v3919_v50 = vpop.f32.mrb[36].mxu1 }
0x10aa   : > { %v3926_v3 = vmul.f32 0.17677669, %v3919_v50  ;;  %v5013_v30 = vpop.f32.mrb[37].mxu1 }
0x10ab   : > { %v3922_v27 = vpop.f32.mrb[38].mxu1 }
0x10ac   : > { %v3936_v49 = vadd.f32 %v3934_v5, %v3926_v3  ;;  %v3927_v42 = vmul.f32 0.17677669, %v3922_v27  ;;  %v5014_v56 = vpop.f32.mrb[39].mxu1 }
0x10ae   : > { %v3937_v15 = vadd.f32 %v3934_v5, %v3927_v42  ;;  %v3939_v63 = vsel %vm3938_vm2, %v3936_v49, -inf  ;;  %v5176_v5 = vld [vmem:[%s6783_s13 + $0x28] sm:$0xff]  }
0x10af   : > { %3940 = vmax.xlane.f32.xlu1 %v3939_v63 }
0x10b0   : > { %v3942_v55 = vsel %vm3938_vm2, %v3937_v15, -inf }
0x10b1   : > { %3943 = vmax.xlane.f32.xlu0 %v3942_v55 }
0x113c   : > { %v3941_v58 = vpop.xlane.xlu1 %3940 }
0x113d   : > { %v3945_v2 = vsub.f32 %v3936_v49, %v3941_v58 }
0x113e   : > { %v3944_v26 = vpop.xlane.xlu0 %3943 }
0x113f   : > { %v3947_v21 = vmul.f32 1.442695, %v3945_v2  ;;  %v3946_v14 = vsub.f32 %v3937_v15, %v3944_v26  ;;  %v4747_v15 = vld [vmem:[%s6780_s10] ss:$0 sm:$0xff]  ;;  %v4748_v26 = vld [vmem:[%s6780_s10 + $0x1] ss:$0 sm:$0xff] }
0x1141   : > { %5255 = vpow2.f32 %v3947_v21  ;;  %v3949_v54 = vmul.f32 1.442695, %v3946_v14 }
0x1143   : > { %5257 = vpow2.f32 %v3949_v54 }
0x114b   : > { %v5256_v48 = vpop.eup %5255 }
0x114c   : > { %v3951_v34 = vsel %vm3938_vm2, %v5256_v48, 0.0 }
0x114d   : > { %v5258_v29 = vpop.eup %5257  ;;  %3952 = vadd.xlane.f32.xlu0 %v3951_v34  ;;  %v5177_v34 = vld [vmem:[%s6783_s13 + $0x30] sm:$0xff]  }
0x114e   : > { %v3954_v12 = vsel %vm3938_vm2, %v5258_v29, 0.0 }
0x1151   : > { %3955 = vadd.xlane.f32.xlu0 %v3954_v12  ;;  %v4749_v12 = vld [vmem:[%s6782_s12] ss:$0 sm:$0xff] }
0x11da   : > { %v3953_v52 = vpop.xlane.xlu0 %3952 }
0x11db   : > { %5259 = vrcp.f32 %v3953_v52 }
0x11de   : > { %v3956_v43 = vpop.xlane.xlu0 %3955 }
0x11df   : > { %5261 = vrcp.f32 %v3956_v43 }
0x11e5   : > { %v5260_v16 = vpop.eup %5259 }
0x11e6   : > { %v3959_v4 = vmul.f32 %v5260_v16, %v5256_v48 }
0x11e9   : > { %v5262_v35 = vpop.eup %5261 }
0x11ea   : > { %v3960_v11 = vmul.f32 %v5262_v35, %v5258_v29  ;;  %v5178_v29 = vld [vmem:[%s6783_s13 + $0x38] sm:$0xff]  }
0x11ec   : > { %v3961_v25 = vpack.c.bf16 %v3960_v11, %v3959_v4 }
0x11ee   : > { %5018 = vmatmul.mubr.msk.bf16.vlgmr.msra.gmra.mrb[32].mxu0 %vm3938_vm2, %v3961_v25 }
0x11ef   : > { %5033 = vmatprep.mubr.msk.bf16.mxu0 %vm5360_vm0, %v6814_v47 }
0x12c1   : > { %v4000_v31 = vpop.f32.mrb[32].mxu0 }
0x12c2   : > { %v5019_v18 = vpop.f32.mrb[33].mxu0 }
0x12c3   : > { %v4003_v37 = vpop.f32.mrb[34].mxu0 }
0x12c4   : > { %v4007_v6 = vpack.c.bf16 %v4003_v37, %v4000_v31  ;;  %v5020_v51 = vpop.f32.mrb[35].mxu0  ;;  %v4754_v31 = vld [vmem:[%s6779_s9 + $0x5] ss:$0 sm:$0xff] }
0x12c6   : > { %5026 = vmatmul.mubr.msk.bf16.vlgmr.msra.gmra.mrb[40].mxu1 %vm554_vm1, %v4007_v6 }
0x12c7   : > { %5053 = vmatprep.mubr.msk.bf16.mxu1 %vm5360_vm0, %v6814_v47  ;;  %5038 = vmatpush3.bf16.msra.mxu1 %v5171_v40 }
0x12c8   : > { %5039 = vmatprep.subr.bf16.mxu1 %v6814_v47 }
0x12cb   : > { %5040 = vmatpush3.bf16.msra.mxu1 %v5172_v59 }
0x12cc   : > { %5041 = vmatprep.subr.bf16.mxu1 %v6814_v47 }
0x12cf   : > { %5042 = vmatpush3.bf16.msra.mxu1 %v5173_v45 }
0x12d0   : > { %5043 = vmatprep.subr.bf16.mxu1 %v6814_v47 }
0x12d3   : > { %5044 = vmatpush3.bf16.msra.mxu1 %v5174_v41 }
0x12d4   : > { %5045 = vmatprep.subr.bf16.mxu1 %v6814_v47 }
0x12d7   : > { %5046 = vmatpush3.bf16.msra.mxu1 %v5175_v32 }
0x12d8   : > { %5047 = vmatprep.subr.bf16.mxu1 %v6814_v47 }
0x12db   : > { %5048 = vmatpush3.bf16.msra.mxu1 %v5176_v5 }
0x12dc   : > { %5049 = vmatprep.subr.bf16.mxu1 %v6814_v47 }
0x12df   : > { %5050 = vmatpush3.bf16.msra.mxu1 %v5177_v34 }
0x12e0   : > { %5051 = vmatprep.subr.bf16.mxu1 %v6814_v47 }
0x12e3   : > { %5052 = vmatpush3.bf16.msra.mxu1 %v5178_v29 }
0x1399   : > { %v4070_v39 = vpop.f32.mrb[40].mxu1 }
0x139a   : > { %v4071_v46 = vadd.f32 %v4742_v10, %v4070_v39  ;;  %v5027_v0 = vpop.f32.mrb[41].mxu1 }
0x139b   : > { %v4073_v8 = vpop.f32.mrb[42].mxu1 }
0x139c   : > { %v4077_v53 = vadd.f32 %v4071_v46, %v6565_v22  ;;  %v4074_v17 = vadd.f32 %v4742_v10, %v4073_v8  ;;  %v5028_v19 = vpop.f32.mrb[43].mxu1 }
0x139e   : > { %v4078_v28 = vadd.f32 %v4074_v17, %v3674_v13  ;;  %v4082_v20 = vsel %vm554_vm1, %v4077_v53, 0.0  ;;  %v5169_v13 = vld [vmem:[%s6781_s11] sm:$0xff]  }
0x139f   : > { %4083 = vadd.xlane.f32.xlu1 %v4082_v20  ;;  %5030 = vmatpush3.bf16.msra.mxu0 %v5169_v13  ;;  %v5180_v20 = vld [vmem:[%s6778_s8 + $0x48] sm:$0xff]   ;;  %v5182_v13 = vld [vmem:[%s6781_s11 + $0x18] sm:$0xff]  }
0x13a0   : > { %v4085_v9 = vsel %vm554_vm1, %v4078_v28, 0.0  ;;  %5031 = vmatprep.subr.bf16.mxu0 %v6814_v47 }
0x13a1   : > { %4086 = vadd.xlane.f32.xlu0 %v4085_v9 }
0x13a3   : > { %5032 = vmatpush3.bf16.msra.mxu0 %v5170_v24  ;;  %v4771_v24 = vld [vmem:[%s6779_s9 + $0x4] sm:$0x1] }
0x13a4   : > { %5057 = vmatprep.subr.bf16.mxu0 %v6814_v47 }
0x142c   : > { %v4084_v33 = vpop.xlane.xlu1 %4083 }
0x142d   : > { %v4089_v57 = vmul.f32 0.03125, %v4084_v33 }
0x142e   : > { %v4087_v44 = vpop.xlane.xlu0 %4086 }
0x142f   : > { %v4091_v38 = vsub.f32 %v4077_v53, %v4089_v57  ;;  %v4090_v7 = vmul.f32 0.03125, %v4087_v44 }
0x1431   : > { %v4092_v61 = vsub.f32 %v4078_v28, %v4090_v7  ;;  %v4093_v36 = vmul.f32 %v4091_v38, %v4091_v38  ;;  %v5179_v28 = vld [vmem:[%s6778_s8 + $0x40] sm:$0xff]  }
0x1433   : > { %v4095_v22 = vsel %vm554_vm1, %v4093_v36, 0.0  ;;  %v4094_v1 = vmul.f32 %v4092_v61, %v4092_v61 }
0x1434   : > { %4096 = vadd.xlane.f32.xlu1 %v4095_v22 }
0x1435   : > { %v4098_v62 = vsel %vm554_vm1, %v4094_v1, 0.0 }
0x1436   : > { %4099 = vadd.xlane.f32.xlu0 %v4098_v62  ;;  %v5181_v62 = vld [vmem:[%s6781_s11 + $0x10] sm:$0xff]  }
0x14c1   : > { %v4097_v50 = vpop.xlane.xlu1 %4096 }
0x14c2   : > { %v4101_v3 = vmul.f32 0.03125, %v4097_v50 }
0x14c3   : > { %v4100_v30 = vpop.xlane.xlu0 %4099 }
0x14c4   : > { %v4103_v27 = vadd.f32 1e-12, %v4101_v3  ;;  %v4102_v49 = vmul.f32 0.03125, %v4100_v30  ;;  %v4779_v3 = vld [vmem:[%s6782_s12 + $0x1] sm:$0x1] }
0x14c6   : > { %5263 = vrsqrt.f32 %v4103_v27  ;;  %v4104_v42 = vadd.f32 1e-12, %v4102_v49 }
0x14c8   : > { %5265 = vrsqrt.f32 %v4104_v42 }
0x14d0   : > { %v5264_v56 = vpop.eup %5263 }
0x14d1   : > { %v4107_v63 = vmul.f32 %v5264_v56, %v4091_v38  ;;  %v4765_v38 = vld [vmem:[%s6780_s10 + $0x2] ss:$0 sm:$0xff] }
0x14d2   : > { %v5266_v55 = vpop.eup %5265 }
0x14d3   : > { %v4115_v58 = vmul.f32 %v4747_v15, %v4107_v63  ;;  %v4108_v2 = vmul.f32 %v5266_v55, %v4092_v61  ;;  %v4766_v61 = vld [vmem:[%s6780_s10 + $0x3] ss:$0 sm:$0xff] }
0x14d5   : > { %v4116_v21 = vmul.f32 %v4747_v15, %v4108_v2  ;;  %v4123_v14 = vadd.f32 %v4748_v26, %v4115_v58 }
0x14d7   : > { %v4124_v54 = vadd.f32 %v4748_v26, %v4116_v21 }
0x14d9   : > { %v4125_v48 = vpack.c.bf16 %v4124_v54, %v4123_v14 }
0x14db   : > { %5034 = vmatmul.mubr.msk.bf16.vlgmr.msra.gmra.mrb[36].mxu0 %vm554_vm1, %v4125_v48 }
0x14dc   : > { %5061 = vmatprep.mubr.msk.bf16.mxu0 %vm5360_vm0, %v6814_v47  ;;  %5058 = vmatpush3.bf16.msra.mxu0 %v5179_v28 }
0x14dd   : > { %5059 = vmatprep.subr.bf16.mxu0 %v6814_v47 }
0x14e0   : > { %5060 = vmatpush3.bf16.msra.mxu0 %v5180_v20 }
0x14e1   : > { %5065 = vmatprep.subr.bf16.mxu0 %v6814_v47 }
0x15ae   : > { %v4186_v23 = vpop.f32.mrb[36].mxu0 }
0x15af   : > { %v4187_v52 = vadd.f32 %v4749_v12, %v4186_v23  ;;  %v5035_v43 = vpop.f32.mrb[37].mxu0 }
0x15b0   : > { %v4189_v16 = vpop.f32.mrb[38].mxu0 }
0x15b1   : > { %v4190_v35 = vadd.f32 %v4749_v12, %v4189_v16  ;;  %v5036_v4 = vpop.f32.mrb[39].mxu0  ;;  %v4193_v11 = vmax.f32 %v4187_v52, 0.0 }
0x15b3   : > { %v4194_v25 = vmax.f32 %v4190_v35, 0.0 }
0x15b5   : > { %v4195_v60 = vpack.c.bf16 %v4194_v25, %v4193_v11 }
0x15b7   : > { %5054 = vmatmul.mubr.bf16.vlgmr.msra.gmra.mrb[44].mxu1 %v4195_v60 }
0x168a   : > { %v4302_v18 = vpop.f32.mrb[44].mxu1 }
0x168b   : > { %v4303_v37 = vadd.f32 %v4754_v31, %v4302_v18  ;;  %v5055_v6 = vpop.f32.mrb[45].mxu1 }
0x168c   : > { %v4305_v51 = vpop.f32.mrb[46].mxu1 }
0x168d   : > { %v4308_v10 = vadd.f32 %v4303_v37, %v4123_v14  ;;  %v5056_v39 = vpop.f32.mrb[47].mxu1 }
0x168f   : > { %v4313_v46 = vsel %vm554_vm1, %v4308_v10, 0.0 }
0x1690   : > { %4314 = vadd.xlane.f32.xlu1 %v4313_v46 }
0x171d   : > { %v4315_v0 = vpop.xlane.xlu1 %4314 }
0x171e   : > { %v4316_v8 = vmul.f32 0.03125, %v4315_v0 }
0x1720   : > { %v4317_v53 = vsub.f32 %v4308_v10, %v4316_v8 }
0x1722   : > { %v4318_v17 = vmul.f32 %v4317_v53, %v4317_v53 }
0x1724   : > { %v4319_v19 = vsel %vm554_vm1, %v4318_v17, 0.0 }
0x1725   : > { %4320 = vadd.xlane.f32.xlu0 %v4319_v19 }
0x17b2   : > { %v4321_v9 = vpop.xlane.xlu0 %4320 }
0x17b3   : > { %v4322_v33 = vmul.f32 0.03125, %v4321_v9 }
0x17b5   : > { %v4323_v57 = vadd.f32 1e-12, %v4322_v33 }
0x17b7   : > { %5267 = vrsqrt.f32 %v4323_v57 }
0x17c1   : > { %v5268_v44 = vpop.eup %5267 }
0x17c2   : > { %v4325_v7 = vmul.f32 %v5268_v44, %v4317_v53 }
0x17c4   : > { %v4332_v36 = vmul.f32 %v4765_v38, %v4325_v7 }
0x17c6   : > { %v4339_v22 = vadd.f32 %v4766_v61, %v4332_v36 }
0x17c8   : > { %v4340_v1 = vpack.c.bf16 %v4339_v22, %v4339_v22 }
0x17ca   : > { %5062 = vmatmul.mubr.msk.bf16.vlgmr.msra.gmra.mrb[40].mxu0 %vm554_vm1, %v4340_v1 }
0x17cb   : > { %5069 = vmatprep.mubr.msk.bf16.mxu0 %vm5360_vm0, %v6814_v47  ;;  %5066 = vmatpush3.bf16.msra.mxu0 %v5181_v62  ;;  %vm4467_vm0 = vcmask 1040384  }
0x17cc   : > { %5067 = vmatprep.subr.bf16.mxu0 %v6814_v47 }
0x17cf   : > { %5068 = vmatpush3.bf16.msra.mxu0 %v5182_v13 }
0x189d   : > { %v4397_v40 = vpop.f32.mrb[40].mxu0 }
0x189e   : > { %v4398_v59 = vadd.f32 %v4771_v24, %v4397_v40  ;;  %v5063_v45 = vpop.f32.mrb[41].mxu0 }
0x189f   : > { %v4400_v41 = vpop.f32.mrb[42].mxu0 }
0x18a0   : > { %5269 = vtanh.f32 %v4398_v59  ;;  %v5064_v32 = vpop.f32.mrb[43].mxu0 }
0x18aa   : > { %v5270_v5 = vpop.eup %5269 }
0x18ab   : > { %v4404_v50 = vpack.c.bf16 %v5270_v5, %v5270_v5 }
0x18ad   : > { %5070 = vmatmul.mubr.msk.bf16.vlgmr.msra.gmra.mrb[44].mxu0 %vm554_vm1, %v4404_v50 }
0x1980   : > { %v4461_v47 = vpop.f32.mrb[44].mxu0 }
0x1981   : > { %v4462_v30 = vadd.f32 %v4779_v3, %v4461_v47  ;;  %v5071_v27 = vpop.f32.mrb[45].mxu0 }
0x1982   : > { %v4464_v49 = vpop.f32.mrb[46].mxu0 }
0x1983   : > { %v5072_v42 = vpop.f32.mrb[47].mxu0  ;;  %v4468_v56 = vsel %vm4467_vm0, %v4462_v30, -inf }
0x1984   : > { %4469 = vmax.xlane.f32.xlu1 %v4468_v56 }
0x1a11   : > { %v4470_v15 = vpop.xlane.xlu1 %4469 }
0x1a12   : > { %v4471_v63 = vsub.f32 %v4462_v30, %v4470_v15 }
0x1a14   : > { %v4472_v55 = vmul.f32 1.442695, %v4471_v63 }
0x1a16   : > { %5271 = vpow2.f32 %v4472_v55 }
0x1a20   : > { %v5272_v58 = vpop.eup %5271 }
0x1a21   : > { %v4474_v2 = vsel %vm4467_vm0, %v5272_v58, 0.0 }
0x1a22   : > { %4475 = vadd.xlane.f32.xlu0 %v4474_v2 }
0x1aaf   : > { %v4476_v26 = vpop.xlane.xlu0 %4475 }
0x1ab0   : > { %5273 = vrcp.f32 %v4476_v26 }
0x1aba   : > { %v5274_v21 = vpop.eup %5273 }
0x1abb   : > { %v4478_v14 = vmul.f32 %v5274_v21, %v5272_v58 }
0x1abd   : > { %4479 = vst [vmem:[%s510_s18] sm:$0x1] %v4478_v14 }
0x1abe   : > { %5303 = shalt.err (!%p5300_p2)
}
0x1abf   : > { %s5304_s27 = scalar_lea.hbm %s6728_s21, 16  ;;  %s5308_s20 = scalar_lea.hbm %s6784_s14, 32 }
0x1ac0   : > { %p5305_p3 = scmp.ne.s32.totalorder %s6728_s21, %s5304_s27  ;;  %p5309_p8 = scmp.lt.u32.totalorder %s6728_s21, %s6784_s14 }
0x1ac1   : > { %p5310_p9 = scmp.lt.u32.totalorder %s5308_s20, %s5304_s27  ;;  %p5312_p11 = scmp.lt.u32.totalorder %s5304_s27, %s6728_s21 }
0x1ac2   : > { %p5306_p4 = pnand %p5305_p3, %p5477_p5 }
0x1ac3   : > { %p5311_p10 = por %p5310_p9, %p5309_p8 }
0x1ac4   : > { %p5307_p7 = pneg %p5306_p4 }
0x1ac5   : > { %p5313_p12 = por %p5312_p11, %p5311_p10 }
0x1ac7   : > { %p5314_p13 = pnand %p5313_p12, %p5307_p7 }
0x1ac9   : > { %5317 = shalt.err (!%p5314_p13)
}
0x1aca   : > { %5085 = dma.vmem_to_hbm [thread:$0]  (%p5477_p5), %s6730_s1, 16, %s6728_s21, %s4481_s26  }
0x1acb PF: > { %p5097_p0 = scmp.ge.s32.totalorder %s5356_s16, 2  ;;  %s4505_s2 = sand.u32 1, %s5344_s29  }
0x1acc   : > { %s4506_s25 = scalar_lea.sflag [#allocation3], %s4505_s2 }
0x1acd   : > { %p5092_p1 = pnand %p5097_p0, %p5481_p6 }
0x1acf   : > { %5339 = dma.done.wait (!%p5092_p1), %s4506_s25, 16  }
0x1ad0   : > { %5341 = vsyncadd (!%p5092_p1), %s4506_s25, 4294967280  ;;  %p25_p2 = scmp.ge.s32.totalorder %s5464_s19, 4   ;;  %s6825_s29 = smov %s5348_s30 }
0x1ad1   : > { %s6826_s30 = smov %s5352_s15  ;;  %s6827_s15 = smov %s5475_s22 }
0x1ad2   : > { %s6828_s16 = smov %s5464_s19  ;;  %27 = sbr.rel (!%p25_p2) target bundleno = 9 (0x9), region = 161 }
0x1ad9   :  { %4510 = vsyncpa [#allocation3], 1 }
0x1ada   :  { %4512 = vsyncpa [#allocation3 + $0x1], 1 }
0x1adb   :  { %4513 = vsyncpa [#allocation4], 1 }
0x1adc   :  { %4515 = vsyncpa [#allocation4 + $0x1], 1 }

</bundles_post_ra>
